<compile_context>
chip_gen: v6e
topology: v6e:2x2x1
jax: 0.10.0
libtpu: 0.0.40
codegen_flags: <defaults>
</compile_context>

<pallas_src>
import math

import jax
import jax.numpy as jnp
from jax.experimental import pallas as pl
from jax.experimental.pallas import tpu as pltpu

# ---- model hyper-parameters (small, synthetic, lane-dense d_model) ----------
D_MODEL = 128
D_FF = 256
D_K = 32
D_V = 32
N_HEADS = 4
N_LAYERS = 2
TGT_VOCAB = 16
MAX_LEN = 64
LN_EPS = 1e-5
HDK = N_HEADS * D_K          # 128
HDV = N_HEADS * D_V          # 128


# ==============================================================================
# Fused per-layer kernel
# ==============================================================================
def _layer_norm(y, gamma, beta):
    mean = jnp.mean(y, axis=-1, keepdims=True)
    c = y - mean
    var = jnp.mean(c * c, axis=-1, keepdims=True)
    return c * jax.lax.rsqrt(var + LN_EPS) * gamma + beta


def _attention(x_res, q_all, k_all, v_all, mask, wo, bo, gamma, beta):
    """Multi-head attention core.

    q_all (Lq, H*dk)  -- 1/sqrt(dk) already folded into W_Q
    k_all (Lk, H*dk), v_all (Lk, H*dv)
    mask  bool, broadcastable to (Lq, Lk); True = masked (matches masked_fill)
    Returns (out (Lq, D) after out-proj + residual + LayerNorm,
             attn (H, Lq, Lk)).
    """
    ps, ctxs = [], []
    # TODO(synk): at real sizes replace the static per-head lane slices with a
    # head-batched dot_general (flash-style) to avoid sub-vreg lane slicing.
    for h in range(N_HEADS):
        qh = q_all[:, h * D_K:(h + 1) * D_K]      # (Lq, dk)
        kh = k_all[:, h * D_K:(h + 1) * D_K]      # (Lk, dk)
        vh = v_all[:, h * D_V:(h + 1) * D_V]      # (Lk, dv)

        s = jax.lax.dot_general(qh, kh, (((1,), (1,)), ((), ())),
                                preferred_element_type=jnp.float32)   # (Lq, Lk)
        s = jnp.where(mask, -1e9, s)
        s = s - jnp.max(s, axis=-1, keepdims=True)
        p = jnp.exp(s)
        p = p / jnp.sum(p, axis=-1, keepdims=True)

        ps.append(p[None])                                            # (1, Lq, Lk)
        ctxs.append(jnp.dot(p, vh, preferred_element_type=jnp.float32))

    ctx = jnp.concatenate(ctxs, axis=-1)                              # (Lq, H*dv)
    out = jnp.dot(ctx, wo, preferred_element_type=jnp.float32) + bo + x_res
    out = _layer_norm(out, gamma, beta)
    attn = jnp.concatenate(ps, axis=0)                                # (H, Lq, Lk)
    return out, attn


def decoder_layer_kernel(
        dec_ids_ref, enc_ids_ref, x_ref, enc_ref,
        sa_wqkv_ref, sa_bqkv_ref, sa_wo_ref, sa_bo_ref, sa_g_ref, sa_b_ref,
        ea_wq_ref, ea_bq_ref, ea_wkv_ref, ea_bkv_ref, ea_wo_ref, ea_bo_ref,
        ea_g_ref, ea_b_ref,
        w1_ref, b1_ref, w2_ref, b2_ref, f_g_ref, f_b_ref,
        out_ref, sa_attn_ref, ea_attn_ref):
    """One full DecoderLayer for one batch element (grid=(B,))."""
    S = x_ref.shape[1]
    Se = enc_ref.shape[1]
    x = x_ref[0]            # (S, D)
    enc = enc_ref[0]        # (Se, D)

    # ---- masks built in-kernel (no dense O(S^2) mask DMA) -------------------
    dec_pad = dec_ids_ref[0] == 0            # (1, S)  key is PAD
    enc_pad = enc_ids_ref[0] == 0            # (1, Se)
    row_i = jax.lax.broadcasted_iota(jnp.int32, (S, S), 0)
    col_j = jax.lax.broadcasted_iota(jnp.int32, (S, S), 1)
    self_mask = jnp.logical_or(dec_pad, col_j > row_i)   # (S, S) causal + pad
    enc_mask = enc_pad                                    # (1, Se) -> broadcast

    # ---- self attention (packed QKV projection, single matmul) --------------
    qkv = (jnp.dot(x, sa_wqkv_ref[...], preferred_element_type=jnp.float32)
           + sa_bqkv_ref[...])                            # (S, 3*HDK)
    x, sa_p = _attention(x,
                         qkv[:, 0 * HDK:1 * HDK],
                         qkv[:, 1 * HDK:2 * HDK],
                         qkv[:, 2 * HDK:3 * HDK],
                         self_mask,
                         sa_wo_ref[...], sa_bo_ref[...],
                         sa_g_ref[...], sa_b_ref[...])
    sa_attn_ref[0] = sa_p.astype(sa_attn_ref.dtype)       # single store

    # ---- encoder-decoder attention -------------------------------------------
    q = (jnp.dot(x, ea_wq_ref[...], preferred_element_type=jnp.float32)
         + ea_bq_ref[...])                                # (S, HDK)
    kv = (jnp.dot(enc, ea_wkv_ref[...], preferred_element_type=jnp.float32)
          + ea_bkv_ref[...])                              # (Se, 2*HDK)
    x, ea_p = _attention(x, q, kv[:, :HDK], kv[:, HDK:],
                         enc_mask,
                         ea_wo_ref[...], ea_bo_ref[...],
                         ea_g_ref[...], ea_b_ref[...])
    ea_attn_ref[0] = ea_p.astype(ea_attn_ref.dtype)       # single store

    # ---- position-wise FFN (conv1d k=1 pair) + residual + LayerNorm ----------
    h = jnp.maximum(jnp.dot(x, w1_ref[...], preferred_element_type=jnp.float32)
                    + b1_ref[...], 0.0)
    y = (jnp.dot(h, w2_ref[...], preferred_element_type=jnp.float32)
         + b2_ref[...] + x)
    out_ref[0] = _layer_norm(y, f_g_ref[...], f_b_ref[...]).astype(out_ref.dtype)


# ==============================================================================
# pallas_call wrapper
# ==============================================================================
_WEIGHT_ORDER = (
    'sa_wqkv', 'sa_bqkv', 'sa_wo', 'sa_bo', 'sa_gamma', 'sa_beta',
    'ea_wq', 'ea_bq', 'ea_wkv', 'ea_bkv', 'ea_wo', 'ea_bo', 'ea_gamma', 'ea_beta',
    'w1', 'b1', 'w2', 'b2', 'f_gamma', 'f_beta',
)


def _replicated_spec(shape):
    n = len(shape)
    return pl.BlockSpec(shape, lambda b, _n=n: (0,) * _n)


def _batched_spec(shape):
    n = len(shape)
    return pl.BlockSpec(shape, lambda b, _n=n: (b,) + (0,) * (_n - 1))


def decoder_layer_pallas(x, enc_outputs, dec_ids3, enc_ids3, packed):
    B, S, D = x.shape
    Se = enc_outputs.shape[1]

    weight_args = [packed[name] for name in _WEIGHT_ORDER]
    weight_specs = [_replicated_spec(w.shape) for w in weight_args]

    out, sa_attn, ea_attn = pl.pallas_call(
        decoder_layer_kernel,
        out_shape=(jax.ShapeDtypeStruct((B, S, D), x.dtype),
                   jax.ShapeDtypeStruct((B, N_HEADS, S, S), jnp.float32),
                   jax.ShapeDtypeStruct((B, N_HEADS, S, Se), jnp.float32)),
        grid_spec=pltpu.PrefetchScalarGridSpec(
            num_scalar_prefetch=0,
            grid=(B,),
            in_specs=[
                _batched_spec((1, 1, S)),       # dec token ids
                _batched_spec((1, 1, Se)),      # enc token ids
                _batched_spec((1, S, D)),       # layer input x
                _batched_spec((1, Se, D)),      # encoder outputs
                *weight_specs,
            ],
            out_specs=[
                _batched_spec((1, S, D)),
                _batched_spec((1, N_HEADS, S, S)),
                _batched_spec((1, N_HEADS, S, Se)),
            ],
        ),
        compiler_params=pltpu.CompilerParams(dimension_semantics=("parallel",)),
    )(dec_ids3, enc_ids3, x, enc_outputs, *weight_args)
    return out, sa_attn, ea_attn


def _pack_layer(lp):
    """One-time (per call, outside kernel) weight packing:
       - fold 1/sqrt(d_k) into W_Q / b_Q,
       - concatenate Q/K/V (self) and K/V (enc-dec) weights lane-wise."""
    sa, ea, ff = lp['self_attn'], lp['enc_attn'], lp['ffn']
    inv = 1.0 / math.sqrt(D_K)
    return dict(
        sa_wqkv=jnp.concatenate([sa['wq'] * inv, sa['wk'], sa['wv']], axis=1),
        sa_bqkv=jnp.concatenate([sa['bq'] * inv, sa['bk'], sa['bv']], axis=1),
        sa_wo=sa['wo'], sa_bo=sa['bo'], sa_gamma=sa['gamma'], sa_beta=sa['beta'],
        ea_wq=ea['wq'] * inv, ea_bq=ea['bq'] * inv,
        ea_wkv=jnp.concatenate([ea['wk'], ea['wv']], axis=1),
        ea_bkv=jnp.concatenate([ea['bk'], ea['bv']], axis=1),
        ea_wo=ea['wo'], ea_bo=ea['bo'], ea_gamma=ea['gamma'], ea_beta=ea['beta'],
        w1=ff['w1'], b1=ff['b1'], w2=ff['w2'], b2=ff['b2'],
        f_gamma=ff['gamma'], f_beta=ff['beta'],
    )


# ==============================================================================
# Decoder forward (glue in plain JAX, heavy math in the fused Pallas kernel)
# ==============================================================================
def make_positional_encoding(max_len, d_model):
    position = jnp.arange(max_len, dtype=jnp.float32)[:, None]
    div_term = jnp.exp(jnp.arange(0, d_model, 2, dtype=jnp.float32) *
                       (-math.log(10000.0) / d_model))
    pe = jnp.zeros((max_len, d_model), jnp.float32)
    pe = pe.at[:, 0::2].set(jnp.sin(position * div_term))
    pe = pe.at[:, 1::2].set(jnp.cos(position * div_term))
    return pe


def decoder_forward(dec_inputs, enc_inputs, enc_outputs, params):
    B, S = dec_inputs.shape
    Se = enc_inputs.shape[1]
    # embedding gather + positional encoding (plain JAX glue)
    x = jnp.take(params['tgt_emb'], dec_inputs, axis=0)        # (B, S, D)
    x = x + params['pe'][:S][None, :, :]
    # TODO(synk): PositionalEncoding dropout (p=0.1) omitted -- eval/inference semantics.

    dec_ids3 = dec_inputs.astype(jnp.int32).reshape(B, 1, S)
    enc_ids3 = enc_inputs.astype(jnp.int32).reshape(B, 1, Se)

    self_attns, enc_attns = [], []
    for lp in params['layers']:
        packed = _pack_layer(lp)
        x, sa, ea = decoder_layer_pallas(x, enc_outputs, dec_ids3, enc_ids3, packed)
        self_attns.append(sa)
        enc_attns.append(ea)
    return x, self_attns, enc_attns


# ==============================================================================
# Pure-JAX reference (mirrors the PyTorch forward semantics)
# ==============================================================================
def build_masks(dec_inputs, enc_inputs):
    B, S = dec_inputs.shape
    Se = enc_inputs.shape[1]
    pad_self = jnp.broadcast_to((dec_inputs == 0)[:, None, :], (B, S, S)).astype(jnp.float32)
    subseq = jnp.triu(jnp.ones((S, S), jnp.float32), k=1)[None, :, :]
    self_mask = ((pad_self + subseq) > 0).astype(jnp.float32)
    enc_mask = jnp.broadcast_to((enc_inputs == 0)[:, None, :], (B, S, Se)).astype(jnp.float32)
    return self_mask, enc_mask


def _ln_ref(y, gamma, beta):
    mean = jnp.mean(y, axis=-1, keepdims=True)
    var = jnp.mean((y - mean) ** 2, axis=-1, keepdims=True)
    return (y - mean) / jnp.sqrt(var + LN_EPS) * gamma + beta


def mha_ref(q_in, kv_in, mask, p):
    B, Lq, D = q_in.shape
    Lk = kv_in.shape[1]
    q = (q_in @ p['wq'] + p['bq']).reshape(B, Lq, N_HEADS, D_K).transpose(0, 2, 1, 3)
    k = (kv_in @ p['wk'] + p['bk']).reshape(B, Lk, N_HEADS, D_K).transpose(0, 2, 1, 3)
    v = (kv_in @ p['wv'] + p['bv']).reshape(B, Lk, N_HEADS, D_V).transpose(0, 2, 1, 3)
    s = jnp.einsum('bhqe,bhke->bhqk', q, k) / math.sqrt(D_K)
    s = jnp.where(mask[:, None, :, :] > 0, -1e9, s)
    attn = jax.nn.softmax(s, axis=-1)
    ctx = jnp.einsum('bhqk,bhke->bhqe', attn, v)
    ctx = ctx.transpose(0, 2, 1, 3).reshape(B, Lq, N_HEADS * D_V)
    out = ctx @ p['wo'] + p['bo']
    return _ln_ref(out + q_in, p['gamma'], p['beta']), attn


def ffn_ref(x, p):
    h = jnp.maximum(jnp.einsum('bsd,df->bsf', x, p['w1']) + p['b1'], 0.0)
    y = jnp.einsum('bsf,fd->bsd', h, p['w2']) + p['b2']
    return _ln_ref(y + x, p['gamma'], p['beta'])


def decoder_ref(dec_inputs, enc_inputs, enc_outputs, params):
    S = dec_inputs.shape[1]
    x = jnp.take(params['tgt_emb'], dec_inputs, axis=0)
    x = x + params['pe'][:S][None, :, :]
    self_mask, enc_mask = build_masks(dec_inputs, enc_inputs)
    self_attns, enc_attns = [], []
    for lp in params['layers']:
        x, sa = mha_ref(x, x, self_mask, lp['self_attn'])
        x, ea = mha_ref(x, enc_outputs, enc_mask, lp['enc_attn'])
        x = ffn_ref(x, lp['ffn'])
        self_attns.append(sa)
        enc_attns.append(ea)
    return x, self_attns, enc_attns


# ==============================================================================
# Parameter construction + main
# ==============================================================================
class _KeyGen:
    def __init__(self, key):
        self.key = key

    def __call__(self):
        self.key, sub = jax.random.split(self.key)
        return sub


def _init_mha(kg, scale=0.1):
    return dict(
        wq=jax.random.normal(kg(), (D_MODEL, HDK), jnp.float32) * scale,
        bq=jax.random.normal(kg(), (1, HDK), jnp.float32) * scale,
        wk=jax.random.normal(kg(), (D_MODEL, HDK), jnp.float32) * scale,
        bk=jax.random.normal(kg(), (1, HDK), jnp.float32) * scale,
        wv=jax.random.normal(kg(), (D_MODEL, HDV), jnp.float32) * scale,
        bv=jax.random.normal(kg(), (1, HDV), jnp.float32) * scale,
        wo=jax.random.normal(kg(), (HDV, D_MODEL), jnp.float32) * scale,
        bo=jax.random.normal(kg(), (1, D_MODEL), jnp.float32) * scale,
        gamma=jnp.ones((1, D_MODEL), jnp.float32),
        beta=jnp.zeros((1, D_MODEL), jnp.float32),
    )


def _init_ffn(kg, scale=0.1):
    return dict(
        w1=jax.random.normal(kg(), (D_MODEL, D_FF), jnp.float32) * scale,
        b1=jax.random.normal(kg(), (1, D_FF), jnp.float32) * scale,
        w2=jax.random.normal(kg(), (D_FF, D_MODEL), jnp.float32) * scale,
        b2=jax.random.normal(kg(), (1, D_MODEL), jnp.float32) * scale,
        gamma=jnp.ones((1, D_MODEL), jnp.float32),
        beta=jnp.zeros((1, D_MODEL), jnp.float32),
    )


if __name__ == "__main__":
    kg = _KeyGen(jax.random.PRNGKey(0))

    batch, tgt_len, src_len = 2, 8, 8

    dec_inputs = jax.random.randint(kg(), (batch, tgt_len), 0, TGT_VOCAB)
    enc_inputs = jax.random.randint(kg(), (batch, src_len), 0, TGT_VOCAB)
    enc_outputs = jax.random.normal(kg(), (batch, src_len, D_MODEL), jnp.float32)

    params = dict(
        tgt_emb=jax.random.normal(kg(), (TGT_VOCAB, D_MODEL), jnp.float32) * 0.1,
        pe=make_positional_encoding(MAX_LEN, D_MODEL),
        layers=[dict(self_attn=_init_mha(kg), enc_attn=_init_mha(kg), ffn=_init_ffn(kg))
                for _ in range(N_LAYERS)],
    )

    dec_out, self_attns, enc_attns = decoder_forward(dec_inputs, enc_inputs, enc_outputs, params)
    dec_out = jax.block_until_ready(dec_out)

    ref_out, ref_sa, ref_ea = decoder_ref(dec_inputs, enc_inputs, enc_outputs, params)

    assert dec_out.shape == (batch, tgt_len, D_MODEL)
    assert jnp.allclose(dec_out, ref_out, atol=2e-3, rtol=2e-3), "decoder output mismatch"
    for a, r in zip(self_attns, ref_sa):
        assert a.shape == (batch, N_HEADS, tgt_len, tgt_len)
        assert jnp.allclose(a, r, atol=1e-3, rtol=1e-3), "self-attn mismatch"
    for a, r in zip(enc_attns, ref_ea):
        assert a.shape == (batch, N_HEADS, tgt_len, src_len)
        assert jnp.allclose(a, r, atol=1e-3, rtol=1e-3), "enc-dec attn mismatch"

    print("KERNEL_OK")
</pallas_src>

<mosaic_0001>
module attributes {stable_mosaic.version = 11 : i64} {
  func.func @decoder_layer_kernel(%arg0: i32, %arg1: memref<1x1x8xi32, #tpu.memory_space<vmem>>, %arg2: memref<1x1x8xi32, #tpu.memory_space<vmem>>, %arg3: memref<1x8x128xf32, #tpu.memory_space<vmem>>, %arg4: memref<1x8x128xf32, #tpu.memory_space<vmem>>, %arg5: memref<128x384xf32, #tpu.memory_space<vmem>>, %arg6: memref<1x384xf32, #tpu.memory_space<vmem>>, %arg7: memref<128x128xf32, #tpu.memory_space<vmem>>, %arg8: memref<1x128xf32, #tpu.memory_space<vmem>>, %arg9: memref<1x128xf32, #tpu.memory_space<vmem>>, %arg10: memref<1x128xf32, #tpu.memory_space<vmem>>, %arg11: memref<128x128xf32, #tpu.memory_space<vmem>>, %arg12: memref<1x128xf32, #tpu.memory_space<vmem>>, %arg13: memref<128x256xf32, #tpu.memory_space<vmem>>, %arg14: memref<1x256xf32, #tpu.memory_space<vmem>>, %arg15: memref<128x128xf32, #tpu.memory_space<vmem>>, %arg16: memref<1x128xf32, #tpu.memory_space<vmem>>, %arg17: memref<1x128xf32, #tpu.memory_space<vmem>>, %arg18: memref<1x128xf32, #tpu.memory_space<vmem>>, %arg19: memref<128x256xf32, #tpu.memory_space<vmem>>, %arg20: memref<1x256xf32, #tpu.memory_space<vmem>>, %arg21: memref<256x128xf32, #tpu.memory_space<vmem>>, %arg22: memref<1x128xf32, #tpu.memory_space<vmem>>, %arg23: memref<1x128xf32, #tpu.memory_space<vmem>>, %arg24: memref<1x128xf32, #tpu.memory_space<vmem>>, %arg25: memref<1x8x128xf32, #tpu.memory_space<vmem>>, %arg26: memref<1x4x8x8xf32, #tpu.memory_space<vmem>>, %arg27: memref<1x4x8x8xf32, #tpu.memory_space<vmem>>) attributes {dimension_semantics = [#tpu.dimension_semantics<parallel>], iteration_bounds = array<i64: 2>, scalar_prefetch = 0 : i64, scratch_operands = 0 : i64, tpu.core_type = #tpu.core_type<tc>, window_params = [{transform_indices = @transform_0, window_bounds = array<i64: 1, 1, 8>}, {transform_indices = @transform_1, window_bounds = array<i64: 1, 1, 8>}, {transform_indices = @transform_2, window_bounds = array<i64: 1, 8, 128>}, {transform_indices = @transform_3, window_bounds = array<i64: 1, 8, 128>}, {pipeline_mode = #tpu.pipeline_mode<synchronous>, transform_indices = @transform_4, window_bounds = array<i64: 128, 384>}, {pipeline_mode = #tpu.pipeline_mode<synchronous>, transform_indices = @transform_5, window_bounds = array<i64: 1, 384>}, {pipeline_mode = #tpu.pipeline_mode<synchronous>, transform_indices = @transform_6, window_bounds = array<i64: 128, 128>}, {pipeline_mode = #tpu.pipeline_mode<synchronous>, transform_indices = @transform_7, window_bounds = array<i64: 1, 128>}, {pipeline_mode = #tpu.pipeline_mode<synchronous>, transform_indices = @transform_8, window_bounds = array<i64: 1, 128>}, {pipeline_mode = #tpu.pipeline_mode<synchronous>, transform_indices = @transform_9, window_bounds = array<i64: 1, 128>}, {pipeline_mode = #tpu.pipeline_mode<synchronous>, transform_indices = @transform_10, window_bounds = array<i64: 128, 128>}, {pipeline_mode = #tpu.pipeline_mode<synchronous>, transform_indices = @transform_11, window_bounds = array<i64: 1, 128>}, {pipeline_mode = #tpu.pipeline_mode<synchronous>, transform_indices = @transform_12, window_bounds = array<i64: 128, 256>}, {pipeline_mode = #tpu.pipeline_mode<synchronous>, transform_indices = @transform_13, window_bounds = array<i64: 1, 256>}, {pipeline_mode = #tpu.pipeline_mode<synchronous>, transform_indices = @transform_14, window_bounds = array<i64: 128, 128>}, {pipeline_mode = #tpu.pipeline_mode<synchronous>, transform_indices = @transform_15, window_bounds = array<i64: 1, 128>}, {pipeline_mode = #tpu.pipeline_mode<synchronous>, transform_indices = @transform_16, window_bounds = array<i64: 1, 128>}, {pipeline_mode = #tpu.pipeline_mode<synchronous>, transform_indices = @transform_17, window_bounds = array<i64: 1, 128>}, {pipeline_mode = #tpu.pipeline_mode<synchronous>, transform_indices = @transform_18, window_bounds = array<i64: 128, 256>}, {pipeline_mode = #tpu.pipeline_mode<synchronous>, transform_indices = @transform_19, window_bounds = array<i64: 1, 256>}, {pipeline_mode = #tpu.pipeline_mode<synchronous>, transform_indices = @transform_20, window_bounds = array<i64: 256, 128>}, {pipeline_mode = #tpu.pipeline_mode<synchronous>, transform_indices = @transform_21, window_bounds = array<i64: 1, 128>}, {pipeline_mode = #tpu.pipeline_mode<synchronous>, transform_indices = @transform_22, window_bounds = array<i64: 1, 128>}, {pipeline_mode = #tpu.pipeline_mode<synchronous>, transform_indices = @transform_23, window_bounds = array<i64: 1, 128>}, {transform_indices = @transform_24, window_bounds = array<i64: 1, 8, 128>}, {transform_indices = @transform_25, window_bounds = array<i64: 1, 4, 8, 8>}, {transform_indices = @transform_26, window_bounds = array<i64: 1, 4, 8, 8>}]} {
    %c0 = arith.constant 0 : index
    %c0_0 = arith.constant 0 : index
    %c0_1 = arith.constant 0 : index
    %0 = vector.load %arg3[%c0, %c0_0, %c0_1] : memref<1x8x128xf32, #tpu.memory_space<vmem>>, vector<1x8x128xf32>
    %1 = vector.shape_cast %0 : vector<1x8x128xf32> to vector<8x128xf32>
    %c0_2 = arith.constant 0 : index
    %c0_3 = arith.constant 0 : index
    %c0_4 = arith.constant 0 : index
    %2 = vector.load %arg4[%c0_2, %c0_3, %c0_4] : memref<1x8x128xf32, #tpu.memory_space<vmem>>, vector<1x8x128xf32>
    %3 = vector.shape_cast %2 : vector<1x8x128xf32> to vector<8x128xf32>
    %c0_5 = arith.constant 0 : index
    %c0_6 = arith.constant 0 : index
    %c0_7 = arith.constant 0 : index
    %4 = vector.load %arg1[%c0_5, %c0_6, %c0_7] : memref<1x1x8xi32, #tpu.memory_space<vmem>>, vector<1x1x8xi32>
    %5 = vector.shape_cast %4 : vector<1x1x8xi32> to vector<1x8xi32>
    %c0_i32 = arith.constant 0 : i32
    %6 = vector.broadcast %c0_i32 : i32 to vector<1x8xi32>
    %7 = arith.cmpi eq, %5, %6 : vector<1x8xi32>
    %c0_8 = arith.constant 0 : index
    %c0_9 = arith.constant 0 : index
    %c0_10 = arith.constant 0 : index
    %8 = vector.load %arg2[%c0_8, %c0_9, %c0_10] : memref<1x1x8xi32, #tpu.memory_space<vmem>>, vector<1x1x8xi32>
    %9 = vector.shape_cast %8 : vector<1x1x8xi32> to vector<1x8xi32>
    %c0_i32_11 = arith.constant 0 : i32
    %10 = vector.broadcast %c0_i32_11 : i32 to vector<1x8xi32>
    %11 = arith.cmpi eq, %9, %10 : vector<1x8xi32>
    %12 = tpu.iota {dimensions = array<i32: 0>} : vector<8x8xi32>
    %13 = tpu.iota {dimensions = array<i32: 1>} : vector<8x8xi32>
    %14 = arith.cmpi sgt, %13, %12 : vector<8x8xi32>
    %15 = vector.broadcast %7 : vector<1x8xi1> to vector<8x8xi1>
    %16 = arith.ori %15, %14 : vector<8x8xi1>
    %c0_12 = arith.constant 0 : index
    %c0_13 = arith.constant 0 : index
    %17 = vector.load %arg5[%c0_12, %c0_13] : memref<128x384xf32, #tpu.memory_space<vmem>>, vector<128x384xf32>
    %cst = arith.constant dense<0.000000e+00> : vector<8x384xf32>
    %18 = tpu.matmul %1, %17, %cst {dimension_numbers = #tpu.dot_dimension_numbers<[1], [0], [0], [1], [0, 0, 1, 1], [], []>} : vector<8x128xf32>, vector<128x384xf32>, vector<8x384xf32> -> vector<8x384xf32>
    %c0_14 = arith.constant 0 : index
    %c0_15 = arith.constant 0 : index
    %19 = vector.load %arg6[%c0_14, %c0_15] : memref<1x384xf32, #tpu.memory_space<vmem>>, vector<1x384xf32>
    %20 = vector.broadcast %19 : vector<1x384xf32> to vector<8x384xf32>
    %21 = arith.addf %18, %20 : vector<8x384xf32>
    %22 = vector.extract_strided_slice %21 {offsets = [0, 0], sizes = [8, 128], strides = [1, 1]} : vector<8x384xf32> to vector<8x128xf32>
    %23 = vector.extract_strided_slice %21 {offsets = [0, 128], sizes = [8, 128], strides = [1, 1]} : vector<8x384xf32> to vector<8x128xf32>
    %24 = vector.extract_strided_slice %21 {offsets = [0, 256], sizes = [8, 128], strides = [1, 1]} : vector<8x384xf32> to vector<8x128xf32>
    %c0_16 = arith.constant 0 : index
    %c0_17 = arith.constant 0 : index
    %25 = vector.load %arg7[%c0_16, %c0_17] : memref<128x128xf32, #tpu.memory_space<vmem>>, vector<128x128xf32>
    %c0_18 = arith.constant 0 : index
    %c0_19 = arith.constant 0 : index
    %26 = vector.load %arg8[%c0_18, %c0_19] : memref<1x128xf32, #tpu.memory_space<vmem>>, vector<1x128xf32>
    %c0_20 = arith.constant 0 : index
    %c0_21 = arith.constant 0 : index
    %27 = vector.load %arg9[%c0_20, %c0_21] : memref<1x128xf32, #tpu.memory_space<vmem>>, vector<1x128xf32>
    %c0_22 = arith.constant 0 : index
    %c0_23 = arith.constant 0 : index
    %28 = vector.load %arg10[%c0_22, %c0_23] : memref<1x128xf32, #tpu.memory_space<vmem>>, vector<1x128xf32>
    %29 = vector.extract_strided_slice %22 {offsets = [0, 0], sizes = [8, 32], strides = [1, 1]} : vector<8x128xf32> to vector<8x32xf32>
    %30 = vector.extract_strided_slice %23 {offsets = [0, 0], sizes = [8, 32], strides = [1, 1]} : vector<8x128xf32> to vector<8x32xf32>
    %31 = vector.extract_strided_slice %24 {offsets = [0, 0], sizes = [8, 32], strides = [1, 1]} : vector<8x128xf32> to vector<8x32xf32>
    %cst_24 = arith.constant dense<0.000000e+00> : vector<8x8xf32>
    %32 = tpu.matmul %29, %30, %cst_24 {dimension_numbers = #tpu.dot_dimension_numbers<[1], [1], [0], [0], [0, 0, 1, 0], [], []>} : vector<8x32xf32>, vector<8x32xf32>, vector<8x8xf32> -> vector<8x8xf32>
    %cst_25 = arith.constant -1.000000e+09 : f32
    %33 = vector.broadcast %cst_25 : f32 to vector<8x8xf32>
    %34 = arith.select %16, %33, %32 : vector<8x8xi1>, vector<8x8xf32>
    %cst_26 = arith.constant dense<0xFF800000> : vector<8xf32>
    %35 = vector.multi_reduction <maximumf>, %34, %cst_26 [1] : vector<8x8xf32> to vector<8xf32>
    %36 = vector.shape_cast %35 : vector<8xf32> to vector<8x1xf32>
    %37 = vector.broadcast %36 : vector<8x1xf32> to vector<8x8xf32>
    %38 = arith.subf %34, %37 : vector<8x8xf32>
    %39 = math.exp %38 : vector<8x8xf32>
    %cst_27 = arith.constant dense<0.000000e+00> : vector<8xf32>
    %40 = vector.multi_reduction <add>, %39, %cst_27 [1] : vector<8x8xf32> to vector<8xf32>
    %41 = vector.shape_cast %40 : vector<8xf32> to vector<8x1xf32>
    %42 = vector.broadcast %41 : vector<8x1xf32> to vector<8x8xf32>
    %43 = arith.divf %39, %42 : vector<8x8xf32>
    %44 = vector.shape_cast %43 : vector<8x8xf32> to vector<1x8x8xf32>
    %cst_28 = arith.constant dense<0.000000e+00> : vector<8x32xf32>
    %45 = tpu.matmul %43, %31, %cst_28 {dimension_numbers = #tpu.dot_dimension_numbers<[1], [0], [0], [1], [0, 0, 1, 1], [], []>} : vector<8x8xf32>, vector<8x32xf32>, vector<8x32xf32> -> vector<8x32xf32>
    %46 = vector.extract_strided_slice %22 {offsets = [0, 32], sizes = [8, 32], strides = [1, 1]} : vector<8x128xf32> to vector<8x32xf32>
    %47 = vector.extract_strided_slice %23 {offsets = [0, 32], sizes = [8, 32], strides = [1, 1]} : vector<8x128xf32> to vector<8x32xf32>
    %48 = vector.extract_strided_slice %24 {offsets = [0, 32], sizes = [8, 32], strides = [1, 1]} : vector<8x128xf32> to vector<8x32xf32>
    %cst_29 = arith.constant dense<0.000000e+00> : vector<8x8xf32>
    %49 = tpu.matmul %46, %47, %cst_29 {dimension_numbers = #tpu.dot_dimension_numbers<[1], [1], [0], [0], [0, 0, 1, 0], [], []>} : vector<8x32xf32>, vector<8x32xf32>, vector<8x8xf32> -> vector<8x8xf32>
    %cst_30 = arith.constant -1.000000e+09 : f32
    %50 = vector.broadcast %cst_30 : f32 to vector<8x8xf32>
    %51 = arith.select %16, %50, %49 : vector<8x8xi1>, vector<8x8xf32>
    %cst_31 = arith.constant dense<0xFF800000> : vector<8xf32>
    %52 = vector.multi_reduction <maximumf>, %51, %cst_31 [1] : vector<8x8xf32> to vector<8xf32>
    %53 = vector.shape_cast %52 : vector<8xf32> to vector<8x1xf32>
    %54 = vector.broadcast %53 : vector<8x1xf32> to vector<8x8xf32>
    %55 = arith.subf %51, %54 : vector<8x8xf32>
    %56 = math.exp %55 : vector<8x8xf32>
    %cst_32 = arith.constant dense<0.000000e+00> : vector<8xf32>
    %57 = vector.multi_reduction <add>, %56, %cst_32 [1] : vector<8x8xf32> to vector<8xf32>
    %58 = vector.shape_cast %57 : vector<8xf32> to vector<8x1xf32>
    %59 = vector.broadcast %58 : vector<8x1xf32> to vector<8x8xf32>
    %60 = arith.divf %56, %59 : vector<8x8xf32>
    %61 = vector.shape_cast %60 : vector<8x8xf32> to vector<1x8x8xf32>
    %cst_33 = arith.constant dense<0.000000e+00> : vector<8x32xf32>
    %62 = tpu.matmul %60, %48, %cst_33 {dimension_numbers = #tpu.dot_dimension_numbers<[1], [0], [0], [1], [0, 0, 1, 1], [], []>} : vector<8x8xf32>, vector<8x32xf32>, vector<8x32xf32> -> vector<8x32xf32>
    %63 = vector.extract_strided_slice %22 {offsets = [0, 64], sizes = [8, 32], strides = [1, 1]} : vector<8x128xf32> to vector<8x32xf32>
    %64 = vector.extract_strided_slice %23 {offsets = [0, 64], sizes = [8, 32], strides = [1, 1]} : vector<8x128xf32> to vector<8x32xf32>
    %65 = vector.extract_strided_slice %24 {offsets = [0, 64], sizes = [8, 32], strides = [1, 1]} : vector<8x128xf32> to vector<8x32xf32>
    %cst_34 = arith.constant dense<0.000000e+00> : vector<8x8xf32>
    %66 = tpu.matmul %63, %64, %cst_34 {dimension_numbers = #tpu.dot_dimension_numbers<[1], [1], [0], [0], [0, 0, 1, 0], [], []>} : vector<8x32xf32>, vector<8x32xf32>, vector<8x8xf32> -> vector<8x8xf32>
    %cst_35 = arith.constant -1.000000e+09 : f32
    %67 = vector.broadcast %cst_35 : f32 to vector<8x8xf32>
    %68 = arith.select %16, %67, %66 : vector<8x8xi1>, vector<8x8xf32>
    %cst_36 = arith.constant dense<0xFF800000> : vector<8xf32>
    %69 = vector.multi_reduction <maximumf>, %68, %cst_36 [1] : vector<8x8xf32> to vector<8xf32>
    %70 = vector.shape_cast %69 : vector<8xf32> to vector<8x1xf32>
    %71 = vector.broadcast %70 : vector<8x1xf32> to vector<8x8xf32>
    %72 = arith.subf %68, %71 : vector<8x8xf32>
    %73 = math.exp %72 : vector<8x8xf32>
    %cst_37 = arith.constant dense<0.000000e+00> : vector<8xf32>
    %74 = vector.multi_reduction <add>, %73, %cst_37 [1] : vector<8x8xf32> to vector<8xf32>
    %75 = vector.shape_cast %74 : vector<8xf32> to vector<8x1xf32>
    %76 = vector.broadcast %75 : vector<8x1xf32> to vector<8x8xf32>
    %77 = arith.divf %73, %76 : vector<8x8xf32>
    %78 = vector.shape_cast %77 : vector<8x8xf32> to vector<1x8x8xf32>
    %cst_38 = arith.constant dense<0.000000e+00> : vector<8x32xf32>
    %79 = tpu.matmul %77, %65, %cst_38 {dimension_numbers = #tpu.dot_dimension_numbers<[1], [0], [0], [1], [0, 0, 1, 1], [], []>} : vector<8x8xf32>, vector<8x32xf32>, vector<8x32xf32> -> vector<8x32xf32>
    %80 = vector.extract_strided_slice %22 {offsets = [0, 96], sizes = [8, 32], strides = [1, 1]} : vector<8x128xf32> to vector<8x32xf32>
    %81 = vector.extract_strided_slice %23 {offsets = [0, 96], sizes = [8, 32], strides = [1, 1]} : vector<8x128xf32> to vector<8x32xf32>
    %82 = vector.extract_strided_slice %24 {offsets = [0, 96], sizes = [8, 32], strides = [1, 1]} : vector<8x128xf32> to vector<8x32xf32>
    %cst_39 = arith.constant dense<0.000000e+00> : vector<8x8xf32>
    %83 = tpu.matmul %80, %81, %cst_39 {dimension_numbers = #tpu.dot_dimension_numbers<[1], [1], [0], [0], [0, 0, 1, 0], [], []>} : vector<8x32xf32>, vector<8x32xf32>, vector<8x8xf32> -> vector<8x8xf32>
    %cst_40 = arith.constant -1.000000e+09 : f32
    %84 = vector.broadcast %cst_40 : f32 to vector<8x8xf32>
    %85 = arith.select %16, %84, %83 : vector<8x8xi1>, vector<8x8xf32>
    %cst_41 = arith.constant dense<0xFF800000> : vector<8xf32>
    %86 = vector.multi_reduction <maximumf>, %85, %cst_41 [1] : vector<8x8xf32> to vector<8xf32>
    %87 = vector.shape_cast %86 : vector<8xf32> to vector<8x1xf32>
    %88 = vector.broadcast %87 : vector<8x1xf32> to vector<8x8xf32>
    %89 = arith.subf %85, %88 : vector<8x8xf32>
    %90 = math.exp %89 : vector<8x8xf32>
    %cst_42 = arith.constant dense<0.000000e+00> : vector<8xf32>
    %91 = vector.multi_reduction <add>, %90, %cst_42 [1] : vector<8x8xf32> to vector<8xf32>
    %92 = vector.shape_cast %91 : vector<8xf32> to vector<8x1xf32>
    %93 = vector.broadcast %92 : vector<8x1xf32> to vector<8x8xf32>
    %94 = arith.divf %90, %93 : vector<8x8xf32>
    %95 = vector.shape_cast %94 : vector<8x8xf32> to vector<1x8x8xf32>
    %cst_43 = arith.constant dense<0.000000e+00> : vector<8x32xf32>
    %96 = tpu.matmul %94, %82, %cst_43 {dimension_numbers = #tpu.dot_dimension_numbers<[1], [0], [0], [1], [0, 0, 1, 1], [], []>} : vector<8x8xf32>, vector<8x32xf32>, vector<8x32xf32> -> vector<8x32xf32>
    %97 = tpu.concatenate %45, %62, %79, %96 in 1 : vector<8x32xf32>, vector<8x32xf32>, vector<8x32xf32>, vector<8x32xf32> -> vector<8x128xf32>
    %cst_44 = arith.constant dense<0.000000e+00> : vector<8x128xf32>
    %98 = tpu.matmul %97, %25, %cst_44 {dimension_numbers = #tpu.dot_dimension_numbers<[1], [0], [0], [1], [0, 0, 1, 1], [], []>} : vector<8x128xf32>, vector<128x128xf32>, vector<8x128xf32> -> vector<8x128xf32>
    %99 = vector.broadcast %26 : vector<1x128xf32> to vector<8x128xf32>
    %100 = arith.addf %98, %99 : vector<8x128xf32>
    %101 = arith.addf %100, %1 : vector<8x128xf32>
    %cst_45 = arith.constant dense<0.000000e+00> : vector<8xf32>
    %102 = vector.multi_reduction <add>, %101, %cst_45 [1] : vector<8x128xf32> to vector<8xf32>
    %103 = vector.shape_cast %102 : vector<8xf32> to vector<8x1xf32>
    %cst_46 = arith.constant 1.280000e+02 : f32
    %104 = vector.broadcast %cst_46 : f32 to vector<8x1xf32>
    %105 = arith.divf %103, %104 : vector<8x1xf32>
    %106 = vector.broadcast %105 : vector<8x1xf32> to vector<8x128xf32>
    %107 = arith.subf %101, %106 : vector<8x128xf32>
    %108 = arith.mulf %107, %107 : vector<8x128xf32>
    %cst_47 = arith.constant dense<0.000000e+00> : vector<8xf32>
    %109 = vector.multi_reduction <add>, %108, %cst_47 [1] : vector<8x128xf32> to vector<8xf32>
    %110 = vector.shape_cast %109 : vector<8xf32> to vector<8x1xf32>
    %cst_48 = arith.constant 1.280000e+02 : f32
    %111 = vector.broadcast %cst_48 : f32 to vector<8x1xf32>
    %112 = arith.divf %110, %111 : vector<8x1xf32>
    %cst_49 = arith.constant 9.99999974E-6 : f32
    %113 = vector.broadcast %cst_49 : f32 to vector<8x1xf32>
    %114 = arith.addf %112, %113 : vector<8x1xf32>
    %115 = math.rsqrt %114 : vector<8x1xf32>
    %116 = vector.broadcast %115 : vector<8x1xf32> to vector<8x128xf32>
    %117 = arith.mulf %107, %116 : vector<8x128xf32>
    %118 = vector.broadcast %27 : vector<1x128xf32> to vector<8x128xf32>
    %119 = arith.mulf %117, %118 : vector<8x128xf32>
    %120 = vector.broadcast %28 : vector<1x128xf32> to vector<8x128xf32>
    %121 = arith.addf %119, %120 : vector<8x128xf32>
    %122 = tpu.concatenate %44, %61, %78, %95 in 0 : vector<1x8x8xf32>, vector<1x8x8xf32>, vector<1x8x8xf32>, vector<1x8x8xf32> -> vector<4x8x8xf32>
    %c0_50 = arith.constant 0 : index
    %c0_51 = arith.constant 0 : index
    %c0_52 = arith.constant 0 : index
    %c0_53 = arith.constant 0 : index
    %123 = vector.load %arg26[%c0_50, %c0_51, %c0_52, %c0_53] : memref<1x4x8x8xf32, #tpu.memory_space<vmem>>, vector<1x4x8x8xf32>
    %124 = vector.shape_cast %123 : vector<1x4x8x8xf32> to vector<4x8x8xf32>
    %125 = vector.shape_cast %122 : vector<4x8x8xf32> to vector<1x4x8x8xf32>
    tpu.vector_store %arg26[%c0_50, %c0_51, %c0_52, %c0_53], %125 {strides = array<i32>} : memref<1x4x8x8xf32, #tpu.memory_space<vmem>>, vector<1x4x8x8xf32>,
    %c0_54 = arith.constant 0 : index
    %c0_55 = arith.constant 0 : index
    %126 = vector.load %arg11[%c0_54, %c0_55] : memref<128x128xf32, #tpu.memory_space<vmem>>, vector<128x128xf32>
    %cst_56 = arith.constant dense<0.000000e+00> : vector<8x128xf32>
    %127 = tpu.matmul %121, %126, %cst_56 {dimension_numbers = #tpu.dot_dimension_numbers<[1], [0], [0], [1], [0, 0, 1, 1], [], []>} : vector<8x128xf32>, vector<128x128xf32>, vector<8x128xf32> -> vector<8x128xf32>
    %c0_57 = arith.constant 0 : index
    %c0_58 = arith.constant 0 : index
    %128 = vector.load %arg12[%c0_57, %c0_58] : memref<1x128xf32, #tpu.memory_space<vmem>>, vector<1x128xf32>
    %129 = vector.broadcast %128 : vector<1x128xf32> to vector<8x128xf32>
    %130 = arith.addf %127, %129 : vector<8x128xf32>
    %c0_59 = arith.constant 0 : index
    %c0_60 = arith.constant 0 : index
    %131 = vector.load %arg13[%c0_59, %c0_60] : memref<128x256xf32, #tpu.memory_space<vmem>>, vector<128x256xf32>
    %cst_61 = arith.constant dense<0.000000e+00> : vector<8x256xf32>
    %132 = tpu.matmul %3, %131, %cst_61 {dimension_numbers = #tpu.dot_dimension_numbers<[1], [0], [0], [1], [0, 0, 1, 1], [], []>} : vector<8x128xf32>, vector<128x256xf32>, vector<8x256xf32> -> vector<8x256xf32>
    %c0_62 = arith.constant 0 : index
    %c0_63 = arith.constant 0 : index
    %133 = vector.load %arg14[%c0_62, %c0_63] : memref<1x256xf32, #tpu.memory_space<vmem>>, vector<1x256xf32>
    %134 = vector.broadcast %133 : vector<1x256xf32> to vector<8x256xf32>
    %135 = arith.addf %132, %134 : vector<8x256xf32>
    %136 = vector.extract_strided_slice %135 {offsets = [0, 0], sizes = [8, 128], strides = [1, 1]} : vector<8x256xf32> to vector<8x128xf32>
    %137 = vector.extract_strided_slice %135 {offsets = [0, 128], sizes = [8, 128], strides = [1, 1]} : vector<8x256xf32> to vector<8x128xf32>
    %c0_64 = arith.constant 0 : index
    %c0_65 = arith.constant 0 : index
    %138 = vector.load %arg15[%c0_64, %c0_65] : memref<128x128xf32, #tpu.memory_space<vmem>>, vector<128x128xf32>
    %c0_66 = arith.constant 0 : index
    %c0_67 = arith.constant 0 : index
    %139 = vector.load %arg16[%c0_66, %c0_67] : memref<1x128xf32, #tpu.memory_space<vmem>>, vector<1x128xf32>
    %c0_68 = arith.constant 0 : index
    %c0_69 = arith.constant 0 : index
    %140 = vector.load %arg17[%c0_68, %c0_69] : memref<1x128xf32, #tpu.memory_space<vmem>>, vector<1x128xf32>
    %c0_70 = arith.constant 0 : index
    %c0_71 = arith.constant 0 : index
    %141 = vector.load %arg18[%c0_70, %c0_71] : memref<1x128xf32, #tpu.memory_space<vmem>>, vector<1x128xf32>
    %142 = vector.extract_strided_slice %130 {offsets = [0, 0], sizes = [8, 32], strides = [1, 1]} : vector<8x128xf32> to vector<8x32xf32>
    %143 = vector.extract_strided_slice %136 {offsets = [0, 0], sizes = [8, 32], strides = [1, 1]} : vector<8x128xf32> to vector<8x32xf32>
    %144 = vector.extract_strided_slice %137 {offsets = [0, 0], sizes = [8, 32], strides = [1, 1]} : vector<8x128xf32> to vector<8x32xf32>
    %cst_72 = arith.constant dense<0.000000e+00> : vector<8x8xf32>
    %145 = tpu.matmul %142, %143, %cst_72 {dimension_numbers = #tpu.dot_dimension_numbers<[1], [1], [0], [0], [0, 0, 1, 0], [], []>} : vector<8x32xf32>, vector<8x32xf32>, vector<8x8xf32> -> vector<8x8xf32>
    %cst_73 = arith.constant -1.000000e+09 : f32
    %146 = vector.shape_cast %11 : vector<1x8xi1> to vector<1x8xi1>
    %147 = vector.broadcast %146 : vector<1x8xi1> to vector<8x8xi1>
    %148 = vector.broadcast %cst_73 : f32 to vector<8x8xf32>
    %149 = arith.select %147, %148, %145 : vector<8x8xi1>, vector<8x8xf32>
    %cst_74 = arith.constant dense<0xFF800000> : vector<8xf32>
    %150 = vector.multi_reduction <maximumf>, %149, %cst_74 [1] : vector<8x8xf32> to vector<8xf32>
    %151 = vector.shape_cast %150 : vector<8xf32> to vector<8x1xf32>
    %152 = vector.broadcast %151 : vector<8x1xf32> to vector<8x8xf32>
    %153 = arith.subf %149, %152 : vector<8x8xf32>
    %154 = math.exp %153 : vector<8x8xf32>
    %cst_75 = arith.constant dense<0.000000e+00> : vector<8xf32>
    %155 = vector.multi_reduction <add>, %154, %cst_75 [1] : vector<8x8xf32> to vector<8xf32>
    %156 = vector.shape_cast %155 : vector<8xf32> to vector<8x1xf32>
    %157 = vector.broadcast %156 : vector<8x1xf32> to vector<8x8xf32>
    %158 = arith.divf %154, %157 : vector<8x8xf32>
    %159 = vector.shape_cast %158 : vector<8x8xf32> to vector<1x8x8xf32>
    %cst_76 = arith.constant dense<0.000000e+00> : vector<8x32xf32>
    %160 = tpu.matmul %158, %144, %cst_76 {dimension_numbers = #tpu.dot_dimension_numbers<[1], [0], [0], [1], [0, 0, 1, 1], [], []>} : vector<8x8xf32>, vector<8x32xf32>, vector<8x32xf32> -> vector<8x32xf32>
    %161 = vector.extract_strided_slice %130 {offsets = [0, 32], sizes = [8, 32], strides = [1, 1]} : vector<8x128xf32> to vector<8x32xf32>
    %162 = vector.extract_strided_slice %136 {offsets = [0, 32], sizes = [8, 32], strides = [1, 1]} : vector<8x128xf32> to vector<8x32xf32>
    %163 = vector.extract_strided_slice %137 {offsets = [0, 32], sizes = [8, 32], strides = [1, 1]} : vector<8x128xf32> to vector<8x32xf32>
    %cst_77 = arith.constant dense<0.000000e+00> : vector<8x8xf32>
    %164 = tpu.matmul %161, %162, %cst_77 {dimension_numbers = #tpu.dot_dimension_numbers<[1], [1], [0], [0], [0, 0, 1, 0], [], []>} : vector<8x32xf32>, vector<8x32xf32>, vector<8x8xf32> -> vector<8x8xf32>
    %cst_78 = arith.constant -1.000000e+09 : f32
    %165 = vector.shape_cast %11 : vector<1x8xi1> to vector<1x8xi1>
    %166 = vector.broadcast %165 : vector<1x8xi1> to vector<8x8xi1>
    %167 = vector.broadcast %cst_78 : f32 to vector<8x8xf32>
    %168 = arith.select %166, %167, %164 : vector<8x8xi1>, vector<8x8xf32>
    %cst_79 = arith.constant dense<0xFF800000> : vector<8xf32>
    %169 = vector.multi_reduction <maximumf>, %168, %cst_79 [1] : vector<8x8xf32> to vector<8xf32>
    %170 = vector.shape_cast %169 : vector<8xf32> to vector<8x1xf32>
    %171 = vector.broadcast %170 : vector<8x1xf32> to vector<8x8xf32>
    %172 = arith.subf %168, %171 : vector<8x8xf32>
    %173 = math.exp %172 : vector<8x8xf32>
    %cst_80 = arith.constant dense<0.000000e+00> : vector<8xf32>
    %174 = vector.multi_reduction <add>, %173, %cst_80 [1] : vector<8x8xf32> to vector<8xf32>
    %175 = vector.shape_cast %174 : vector<8xf32> to vector<8x1xf32>
    %176 = vector.broadcast %175 : vector<8x1xf32> to vector<8x8xf32>
    %177 = arith.divf %173, %176 : vector<8x8xf32>
    %178 = vector.shape_cast %177 : vector<8x8xf32> to vector<1x8x8xf32>
    %cst_81 = arith.constant dense<0.000000e+00> : vector<8x32xf32>
    %179 = tpu.matmul %177, %163, %cst_81 {dimension_numbers = #tpu.dot_dimension_numbers<[1], [0], [0], [1], [0, 0, 1, 1], [], []>} : vector<8x8xf32>, vector<8x32xf32>, vector<8x32xf32> -> vector<8x32xf32>
    %180 = vector.extract_strided_slice %130 {offsets = [0, 64], sizes = [8, 32], strides = [1, 1]} : vector<8x128xf32> to vector<8x32xf32>
    %181 = vector.extract_strided_slice %136 {offsets = [0, 64], sizes = [8, 32], strides = [1, 1]} : vector<8x128xf32> to vector<8x32xf32>
    %182 = vector.extract_strided_slice %137 {offsets = [0, 64], sizes = [8, 32], strides = [1, 1]} : vector<8x128xf32> to vector<8x32xf32>
    %cst_82 = arith.constant dense<0.000000e+00> : vector<8x8xf32>
    %183 = tpu.matmul %180, %181, %cst_82 {dimension_numbers = #tpu.dot_dimension_numbers<[1], [1], [0], [0], [0, 0, 1, 0], [], []>} : vector<8x32xf32>, vector<8x32xf32>, vector<8x8xf32> -> vector<8x8xf32>
    %cst_83 = arith.constant -1.000000e+09 : f32
    %184 = vector.shape_cast %11 : vector<1x8xi1> to vector<1x8xi1>
    %185 = vector.broadcast %184 : vector<1x8xi1> to vector<8x8xi1>
    %186 = vector.broadcast %cst_83 : f32 to vector<8x8xf32>
    %187 = arith.select %185, %186, %183 : vector<8x8xi1>, vector<8x8xf32>
    %cst_84 = arith.constant dense<0xFF800000> : vector<8xf32>
    %188 = vector.multi_reduction <maximumf>, %187, %cst_84 [1] : vector<8x8xf32> to vector<8xf32>
    %189 = vector.shape_cast %188 : vector<8xf32> to vector<8x1xf32>
    %190 = vector.broadcast %189 : vector<8x1xf32> to vector<8x8xf32>
    %191 = arith.subf %187, %190 : vector<8x8xf32>
    %192 = math.exp %191 : vector<8x8xf32>
    %cst_85 = arith.constant dense<0.000000e+00> : vector<8xf32>
    %193 = vector.multi_reduction <add>, %192, %cst_85 [1] : vector<8x8xf32> to vector<8xf32>
    %194 = vector.shape_cast %193 : vector<8xf32> to vector<8x1xf32>
    %195 = vector.broadcast %194 : vector<8x1xf32> to vector<8x8xf32>
    %196 = arith.divf %192, %195 : vector<8x8xf32>
    %197 = vector.shape_cast %196 : vector<8x8xf32> to vector<1x8x8xf32>
    %cst_86 = arith.constant dense<0.000000e+00> : vector<8x32xf32>
    %198 = tpu.matmul %196, %182, %cst_86 {dimension_numbers = #tpu.dot_dimension_numbers<[1], [0], [0], [1], [0, 0, 1, 1], [], []>} : vector<8x8xf32>, vector<8x32xf32>, vector<8x32xf32> -> vector<8x32xf32>
    %199 = vector.extract_strided_slice %130 {offsets = [0, 96], sizes = [8, 32], strides = [1, 1]} : vector<8x128xf32> to vector<8x32xf32>
    %200 = vector.extract_strided_slice %136 {offsets = [0, 96], sizes = [8, 32], strides = [1, 1]} : vector<8x128xf32> to vector<8x32xf32>
    %201 = vector.extract_strided_slice %137 {offsets = [0, 96], sizes = [8, 32], strides = [1, 1]} : vector<8x128xf32> to vector<8x32xf32>
    %cst_87 = arith.constant dense<0.000000e+00> : vector<8x8xf32>
    %202 = tpu.matmul %199, %200, %cst_87 {dimension_numbers = #tpu.dot_dimension_numbers<[1], [1], [0], [0], [0, 0, 1, 0], [], []>} : vector<8x32xf32>, vector<8x32xf32>, vector<8x8xf32> -> vector<8x8xf32>
    %cst_88 = arith.constant -1.000000e+09 : f32
    %203 = vector.shape_cast %11 : vector<1x8xi1> to vector<1x8xi1>
    %204 = vector.broadcast %203 : vector<1x8xi1> to vector<8x8xi1>
    %205 = vector.broadcast %cst_88 : f32 to vector<8x8xf32>
    %206 = arith.select %204, %205, %202 : vector<8x8xi1>, vector<8x8xf32>
    %cst_89 = arith.constant dense<0xFF800000> : vector<8xf32>
    %207 = vector.multi_reduction <maximumf>, %206, %cst_89 [1] : vector<8x8xf32> to vector<8xf32>
    %208 = vector.shape_cast %207 : vector<8xf32> to vector<8x1xf32>
    %209 = vector.broadcast %208 : vector<8x1xf32> to vector<8x8xf32>
    %210 = arith.subf %206, %209 : vector<8x8xf32>
    %211 = math.exp %210 : vector<8x8xf32>
    %cst_90 = arith.constant dense<0.000000e+00> : vector<8xf32>
    %212 = vector.multi_reduction <add>, %211, %cst_90 [1] : vector<8x8xf32> to vector<8xf32>
    %213 = vector.shape_cast %212 : vector<8xf32> to vector<8x1xf32>
    %214 = vector.broadcast %213 : vector<8x1xf32> to vector<8x8xf32>
    %215 = arith.divf %211, %214 : vector<8x8xf32>
    %216 = vector.shape_cast %215 : vector<8x8xf32> to vector<1x8x8xf32>
    %cst_91 = arith.constant dense<0.000000e+00> : vector<8x32xf32>
    %217 = tpu.matmul %215, %201, %cst_91 {dimension_numbers = #tpu.dot_dimension_numbers<[1], [0], [0], [1], [0, 0, 1, 1], [], []>} : vector<8x8xf32>, vector<8x32xf32>, vector<8x32xf32> -> vector<8x32xf32>
    %218 = tpu.concatenate %160, %179, %198, %217 in 1 : vector<8x32xf32>, vector<8x32xf32>, vector<8x32xf32>, vector<8x32xf32> -> vector<8x128xf32>
    %cst_92 = arith.constant dense<0.000000e+00> : vector<8x128xf32>
    %219 = tpu.matmul %218, %138, %cst_92 {dimension_numbers = #tpu.dot_dimension_numbers<[1], [0], [0], [1], [0, 0, 1, 1], [], []>} : vector<8x128xf32>, vector<128x128xf32>, vector<8x128xf32> -> vector<8x128xf32>
    %220 = vector.broadcast %139 : vector<1x128xf32> to vector<8x128xf32>
    %221 = arith.addf %219, %220 : vector<8x128xf32>
    %222 = arith.addf %221, %121 : vector<8x128xf32>
    %cst_93 = arith.constant dense<0.000000e+00> : vector<8xf32>
    %223 = vector.multi_reduction <add>, %222, %cst_93 [1] : vector<8x128xf32> to vector<8xf32>
    %224 = vector.shape_cast %223 : vector<8xf32> to vector<8x1xf32>
    %cst_94 = arith.constant 1.280000e+02 : f32
    %225 = vector.broadcast %cst_94 : f32 to vector<8x1xf32>
    %226 = arith.divf %224, %225 : vector<8x1xf32>
    %227 = vector.broadcast %226 : vector<8x1xf32> to vector<8x128xf32>
    %228 = arith.subf %222, %227 : vector<8x128xf32>
    %229 = arith.mulf %228, %228 : vector<8x128xf32>
    %cst_95 = arith.constant dense<0.000000e+00> : vector<8xf32>
    %230 = vector.multi_reduction <add>, %229, %cst_95 [1] : vector<8x128xf32> to vector<8xf32>
    %231 = vector.shape_cast %230 : vector<8xf32> to vector<8x1xf32>
    %cst_96 = arith.constant 1.280000e+02 : f32
    %232 = vector.broadcast %cst_96 : f32 to vector<8x1xf32>
    %233 = arith.divf %231, %232 : vector<8x1xf32>
    %cst_97 = arith.constant 9.99999974E-6 : f32
    %234 = vector.broadcast %cst_97 : f32 to vector<8x1xf32>
    %235 = arith.addf %233, %234 : vector<8x1xf32>
    %236 = math.rsqrt %235 : vector<8x1xf32>
    %237 = vector.broadcast %236 : vector<8x1xf32> to vector<8x128xf32>
    %238 = arith.mulf %228, %237 : vector<8x128xf32>
    %239 = vector.broadcast %140 : vector<1x128xf32> to vector<8x128xf32>
    %240 = arith.mulf %238, %239 : vector<8x128xf32>
    %241 = vector.broadcast %141 : vector<1x128xf32> to vector<8x128xf32>
    %242 = arith.addf %240, %241 : vector<8x128xf32>
    %243 = tpu.concatenate %159, %178, %197, %216 in 0 : vector<1x8x8xf32>, vector<1x8x8xf32>, vector<1x8x8xf32>, vector<1x8x8xf32> -> vector<4x8x8xf32>
    %c0_98 = arith.constant 0 : index
    %c0_99 = arith.constant 0 : index
    %c0_100 = arith.constant 0 : index
    %c0_101 = arith.constant 0 : index
    %244 = vector.load %arg27[%c0_98, %c0_99, %c0_100, %c0_101] : memref<1x4x8x8xf32, #tpu.memory_space<vmem>>, vector<1x4x8x8xf32>
    %245 = vector.shape_cast %244 : vector<1x4x8x8xf32> to vector<4x8x8xf32>
    %246 = vector.shape_cast %243 : vector<4x8x8xf32> to vector<1x4x8x8xf32>
    tpu.vector_store %arg27[%c0_98, %c0_99, %c0_100, %c0_101], %246 {strides = array<i32>} : memref<1x4x8x8xf32, #tpu.memory_space<vmem>>, vector<1x4x8x8xf32>,
    %c0_102 = arith.constant 0 : index
    %c0_103 = arith.constant 0 : index
    %247 = vector.load %arg19[%c0_102, %c0_103] : memref<128x256xf32, #tpu.memory_space<vmem>>, vector<128x256xf32>
    %cst_104 = arith.constant dense<0.000000e+00> : vector<8x256xf32>
    %248 = tpu.matmul %242, %247, %cst_104 {dimension_numbers = #tpu.dot_dimension_numbers<[1], [0], [0], [1], [0, 0, 1, 1], [], []>} : vector<8x128xf32>, vector<128x256xf32>, vector<8x256xf32> -> vector<8x256xf32>
    %c0_105 = arith.constant 0 : index
    %c0_106 = arith.constant 0 : index
    %249 = vector.load %arg20[%c0_105, %c0_106] : memref<1x256xf32, #tpu.memory_space<vmem>>, vector<1x256xf32>
    %250 = vector.broadcast %249 : vector<1x256xf32> to vector<8x256xf32>
    %251 = arith.addf %248, %250 : vector<8x256xf32>
    %cst_107 = arith.constant 0.000000e+00 : f32
    %252 = vector.broadcast %cst_107 : f32 to vector<8x256xf32>
    %253 = arith.maximumf %251, %252 : vector<8x256xf32>
    %c0_108 = arith.constant 0 : index
    %c0_109 = arith.constant 0 : index
    %254 = vector.load %arg21[%c0_108, %c0_109] : memref<256x128xf32, #tpu.memory_space<vmem>>, vector<256x128xf32>
    %cst_110 = arith.constant dense<0.000000e+00> : vector<8x128xf32>
    %255 = tpu.matmul %253, %254, %cst_110 {dimension_numbers = #tpu.dot_dimension_numbers<[1], [0], [0], [1], [0, 0, 1, 1], [], []>} : vector<8x256xf32>, vector<256x128xf32>, vector<8x128xf32> -> vector<8x128xf32>
    %c0_111 = arith.constant 0 : index
    %c0_112 = arith.constant 0 : index
    %256 = vector.load %arg22[%c0_111, %c0_112] : memref<1x128xf32, #tpu.memory_space<vmem>>, vector<1x128xf32>
    %257 = vector.broadcast %256 : vector<1x128xf32> to vector<8x128xf32>
    %258 = arith.addf %255, %257 : vector<8x128xf32>
    %259 = arith.addf %258, %242 : vector<8x128xf32>
    %c0_113 = arith.constant 0 : index
    %c0_114 = arith.constant 0 : index
    %260 = vector.load %arg23[%c0_113, %c0_114] : memref<1x128xf32, #tpu.memory_space<vmem>>, vector<1x128xf32>
    %c0_115 = arith.constant 0 : index
    %c0_116 = arith.constant 0 : index
    %261 = vector.load %arg24[%c0_115, %c0_116] : memref<1x128xf32, #tpu.memory_space<vmem>>, vector<1x128xf32>
    %cst_117 = arith.constant dense<0.000000e+00> : vector<8xf32>
    %262 = vector.multi_reduction <add>, %259, %cst_117 [1] : vector<8x128xf32> to vector<8xf32>
    %263 = vector.shape_cast %262 : vector<8xf32> to vector<8x1xf32>
    %cst_118 = arith.constant 1.280000e+02 : f32
    %264 = vector.broadcast %cst_118 : f32 to vector<8x1xf32>
    %265 = arith.divf %263, %264 : vector<8x1xf32>
    %266 = vector.broadcast %265 : vector<8x1xf32> to vector<8x128xf32>
    %267 = arith.subf %259, %266 : vector<8x128xf32>
    %268 = arith.mulf %267, %267 : vector<8x128xf32>
    %cst_119 = arith.constant dense<0.000000e+00> : vector<8xf32>
    %269 = vector.multi_reduction <add>, %268, %cst_119 [1] : vector<8x128xf32> to vector<8xf32>
    %270 = vector.shape_cast %269 : vector<8xf32> to vector<8x1xf32>
    %cst_120 = arith.constant 1.280000e+02 : f32
    %271 = vector.broadcast %cst_120 : f32 to vector<8x1xf32>
    %272 = arith.divf %270, %271 : vector<8x1xf32>
    %cst_121 = arith.constant 9.99999974E-6 : f32
    %273 = vector.broadcast %cst_121 : f32 to vector<8x1xf32>
    %274 = arith.addf %272, %273 : vector<8x1xf32>
    %275 = math.rsqrt %274 : vector<8x1xf32>
    %276 = vector.broadcast %275 : vector<8x1xf32> to vector<8x128xf32>
    %277 = arith.mulf %267, %276 : vector<8x128xf32>
    %278 = vector.broadcast %260 : vector<1x128xf32> to vector<8x128xf32>
    %279 = arith.mulf %277, %278 : vector<8x128xf32>
    %280 = vector.broadcast %261 : vector<1x128xf32> to vector<8x128xf32>
    %281 = arith.addf %279, %280 : vector<8x128xf32>
    %c0_122 = arith.constant 0 : index
    %c0_123 = arith.constant 0 : index
    %c0_124 = arith.constant 0 : index
    %282 = vector.load %arg25[%c0_122, %c0_123, %c0_124] : memref<1x8x128xf32, #tpu.memory_space<vmem>>, vector<1x8x128xf32>
    %283 = vector.shape_cast %282 : vector<1x8x128xf32> to vector<8x128xf32>
    %284 = vector.shape_cast %281 : vector<8x128xf32> to vector<1x8x128xf32>
    tpu.vector_store %arg25[%c0_122, %c0_123, %c0_124], %284 {strides = array<i32>} : memref<1x8x128xf32, #tpu.memory_space<vmem>>, vector<1x8x128xf32>,
    return
  }
  func.func @transform_0(%arg0: i32) -> (i32, i32, i32) {
    %c0_i32 = arith.constant 0 : i32
    %c0_i32_0 = arith.constant 0 : i32
    %c0_i32_1 = arith.constant 0 : i32
    return %arg0, %c0_i32, %c0_i32_0 : i32, i32, i32
  }
  func.func @transform_1(%arg0: i32) -> (i32, i32, i32) {
    %c0_i32 = arith.constant 0 : i32
    %c0_i32_0 = arith.constant 0 : i32
    %c0_i32_1 = arith.constant 0 : i32
    return %arg0, %c0_i32, %c0_i32_0 : i32, i32, i32
  }
  func.func @transform_2(%arg0: i32) -> (i32, i32, i32) {
    %c0_i32 = arith.constant 0 : i32
    %c0_i32_0 = arith.constant 0 : i32
    %c0_i32_1 = arith.constant 0 : i32
    return %arg0, %c0_i32, %c0_i32_0 : i32, i32, i32
  }
  func.func @transform_3(%arg0: i32) -> (i32, i32, i32) {
    %c0_i32 = arith.constant 0 : i32
    %c0_i32_0 = arith.constant 0 : i32
    %c0_i32_1 = arith.constant 0 : i32
    return %arg0, %c0_i32, %c0_i32_0 : i32, i32, i32
  }
  func.func @transform_4(%arg0: i32) -> (i32, i32) {
    %c0_i32 = arith.constant 0 : i32
    %c0_i32_0 = arith.constant 0 : i32
    %c0_i32_1 = arith.constant 0 : i32
    return %c0_i32, %c0_i32_0 : i32, i32
  }
  func.func @transform_5(%arg0: i32) -> (i32, i32) {
    %c0_i32 = arith.constant 0 : i32
    %c0_i32_0 = arith.constant 0 : i32
    %c0_i32_1 = arith.constant 0 : i32
    return %c0_i32, %c0_i32_0 : i32, i32
  }
  func.func @transform_6(%arg0: i32) -> (i32, i32) {
    %c0_i32 = arith.constant 0 : i32
    %c0_i32_0 = arith.constant 0 : i32
    %c0_i32_1 = arith.constant 0 : i32
    return %c0_i32, %c0_i32_0 : i32, i32
  }
  func.func @transform_7(%arg0: i32) -> (i32, i32) {
    %c0_i32 = arith.constant 0 : i32
    %c0_i32_0 = arith.constant 0 : i32
    %c0_i32_1 = arith.constant 0 : i32
    return %c0_i32, %c0_i32_0 : i32, i32
  }
  func.func @transform_8(%arg0: i32) -> (i32, i32) {
    %c0_i32 = arith.constant 0 : i32
    %c0_i32_0 = arith.constant 0 : i32
    %c0_i32_1 = arith.constant 0 : i32
    return %c0_i32, %c0_i32_0 : i32, i32
  }
  func.func @transform_9(%arg0: i32) -> (i32, i32) {
    %c0_i32 = arith.constant 0 : i32
    %c0_i32_0 = arith.constant 0 : i32
    %c0_i32_1 = arith.constant 0 : i32
    return %c0_i32, %c0_i32_0 : i32, i32
  }
  func.func @transform_10(%arg0: i32) -> (i32, i32) {
    %c0_i32 = arith.constant 0 : i32
    %c0_i32_0 = arith.constant 0 : i32
    %c0_i32_1 = arith.constant 0 : i32
    return %c0_i32, %c0_i32_0 : i32, i32
  }
  func.func @transform_11(%arg0: i32) -> (i32, i32) {
    %c0_i32 = arith.constant 0 : i32
    %c0_i32_0 = arith.constant 0 : i32
    %c0_i32_1 = arith.constant 0 : i32
    return %c0_i32, %c0_i32_0 : i32, i32
  }
  func.func @transform_12(%arg0: i32) -> (i32, i32) {
    %c0_i32 = arith.constant 0 : i32
    %c0_i32_0 = arith.constant 0 : i32
    %c0_i32_1 = arith.constant 0 : i32
    return %c0_i32, %c0_i32_0 : i32, i32
  }
  func.func @transform_13(%arg0: i32) -> (i32, i32) {
    %c0_i32 = arith.constant 0 : i32
    %c0_i32_0 = arith.constant 0 : i32
    %c0_i32_1 = arith.constant 0 : i32
    return %c0_i32, %c0_i32_0 : i32, i32
  }
  func.func @transform_14(%arg0: i32) -> (i32, i32) {
    %c0_i32 = arith.constant 0 : i32
    %c0_i32_0 = arith.constant 0 : i32
    %c0_i32_1 = arith.constant 0 : i32
    return %c0_i32, %c0_i32_0 : i32, i32
  }
  func.func @transform_15(%arg0: i32) -> (i32, i32) {
    %c0_i32 = arith.constant 0 : i32
    %c0_i32_0 = arith.constant 0 : i32
    %c0_i32_1 = arith.constant 0 : i32
    return %c0_i32, %c0_i32_0 : i32, i32
  }
  func.func @transform_16(%arg0: i32) -> (i32, i32) {
    %c0_i32 = arith.constant 0 : i32
    %c0_i32_0 = arith.constant 0 : i32
    %c0_i32_1 = arith.constant 0 : i32
    return %c0_i32, %c0_i32_0 : i32, i32
  }
  func.func @transform_17(%arg0: i32) -> (i32, i32) {
    %c0_i32 = arith.constant 0 : i32
    %c0_i32_0 = arith.constant 0 : i32
    %c0_i32_1 = arith.constant 0 : i32
    return %c0_i32, %c0_i32_0 : i32, i32
  }
  func.func @transform_18(%arg0: i32) -> (i32, i32) {
    %c0_i32 = arith.constant 0 : i32
    %c0_i32_0 = arith.constant 0 : i32
    %c0_i32_1 = arith.constant 0 : i32
    return %c0_i32, %c0_i32_0 : i32, i32
  }
  func.func @transform_19(%arg0: i32) -> (i32, i32) {
    %c0_i32 = arith.constant 0 : i32
    %c0_i32_0 = arith.constant 0 : i32
    %c0_i32_1 = arith.constant 0 : i32
    return %c0_i32, %c0_i32_0 : i32, i32
  }
  func.func @transform_20(%arg0: i32) -> (i32, i32) {
    %c0_i32 = arith.constant 0 : i32
    %c0_i32_0 = arith.constant 0 : i32
    %c0_i32_1 = arith.constant 0 : i32
    return %c0_i32, %c0_i32_0 : i32, i32
  }
  func.func @transform_21(%arg0: i32) -> (i32, i32) {
    %c0_i32 = arith.constant 0 : i32
    %c0_i32_0 = arith.constant 0 : i32
    %c0_i32_1 = arith.constant 0 : i32
    return %c0_i32, %c0_i32_0 : i32, i32
  }
  func.func @transform_22(%arg0: i32) -> (i32, i32) {
    %c0_i32 = arith.constant 0 : i32
    %c0_i32_0 = arith.constant 0 : i32
    %c0_i32_1 = arith.constant 0 : i32
    return %c0_i32, %c0_i32_0 : i32, i32
  }
  func.func @transform_23(%arg0: i32) -> (i32, i32) {
    %c0_i32 = arith.constant 0 : i32
    %c0_i32_0 = arith.constant 0 : i32
    %c0_i32_1 = arith.constant 0 : i32
    return %c0_i32, %c0_i32_0 : i32, i32
  }
  func.func @transform_24(%arg0: i32) -> (i32, i32, i32) {
    %c0_i32 = arith.constant 0 : i32
    %c0_i32_0 = arith.constant 0 : i32
    %c0_i32_1 = arith.constant 0 : i32
    return %arg0, %c0_i32, %c0_i32_0 : i32, i32, i32
  }
  func.func @transform_25(%arg0: i32) -> (i32, i32, i32, i32) {
    %c0_i32 = arith.constant 0 : i32
    %c0_i32_0 = arith.constant 0 : i32
    %c0_i32_1 = arith.constant 0 : i32
    %c0_i32_2 = arith.constant 0 : i32
    return %arg0, %c0_i32, %c0_i32_0, %c0_i32_1 : i32, i32, i32, i32
  }
  func.func @transform_26(%arg0: i32) -> (i32, i32, i32, i32) {
    %c0_i32 = arith.constant 0 : i32
    %c0_i32_0 = arith.constant 0 : i32
    %c0_i32_1 = arith.constant 0 : i32
    %c0_i32_2 = arith.constant 0 : i32
    return %arg0, %c0_i32, %c0_i32_0, %c0_i32_1 : i32, i32, i32, i32
  }
}

</mosaic_0001>

<bundles_post_ra>
// kernel: tpu_custom_call.1
= control target key start
LH: loop header
LB: loop body
LE: loop exit
PB: predicated region body
PF: predicated region fallthrough
CT: control target
= control target key end

     0   :  { %s5652_s0 = inlined_call_operand.hbm [shape: s32[2,1,8], index: 0, kind: input, shape index: {}]   ;;  %s5653_s1 = inlined_call_operand.hbm [shape: s32[2,1,8], index: 1, kind: input, shape index: {}]   ;;  %s5654_s2 = inlined_call_operand.hbm [shape: f32[2,8,128], index: 2, kind: input, shape index: {}]   ;;  %s5655_s3 = inlined_call_operand.hbm [shape: f32[2,8,128], index: 3, kind: input, shape index: {}]   ;;  %s5656_s4 = inlined_call_operand.hbm [shape: f32[128,384], index: 4, kind: input, shape index: {}]   ;;  %s5657_s5 = inlined_call_operand.vmem [shape: f32[1,384], index: 5, kind: input, shape index: {}]   ;;  %s5658_s6 = inlined_call_operand.hbm [shape: f32[128,128], index: 6, kind: input, shape index: {}]   ;;  %s5659_s7 = inlined_call_operand.vmem [shape: f32[1,128], index: 7, kind: input, shape index: {}]   ;;  %s5660_s8 = inlined_call_operand.vmem [shape: f32[1,128], index: 8, kind: input, shape index: {}]   ;;  %s5661_s9 = inlined_call_operand.vmem [shape: f32[1,128], index: 9, kind: input, shape index: {}]   ;;  %s5662_s10 = inlined_call_operand.hbm [shape: f32[128,128], index: 10, kind: input, shape index: {}]   ;;  %s5663_s11 = inlined_call_operand.vmem [shape: f32[1,128], index: 11, kind: input, shape index: {}]   ;;  %s5664_s12 = inlined_call_operand.hbm [shape: f32[128,256], index: 12, kind: input, shape index: {}]   ;;  %s5665_s13 = inlined_call_operand.vmem [shape: f32[1,256], index: 13, kind: input, shape index: {}]   ;;  %s5666_s14 = inlined_call_operand.hbm [shape: f32[128,128], index: 14, kind: input, shape index: {}]   ;;  %s5667_s15 = inlined_call_operand.vmem [shape: f32[1,128], index: 15, kind: input, shape index: {}]   ;;  %s5668_s16 = inlined_call_operand.vmem [shape: f32[1,128], index: 16, kind: input, shape index: {}]   ;;  %s5669_s17 = inlined_call_operand.vmem [shape: f32[1,128], index: 17, kind: input, shape index: {}]   ;;  %s5670_s18 = inlined_call_operand.hbm [shape: f32[128,256], index: 18, kind: input, shape index: {}]   ;;  %s5671_s19 = inlined_call_operand.vmem [shape: f32[1,256], index: 19, kind: input, shape index: {}]   ;;  %s5672_s20 = inlined_call_operand.hbm [shape: f32[256,128], index: 20, kind: input, shape index: {}]   ;;  %s5673_s21 = inlined_call_operand.vmem [shape: f32[1,128], index: 21, kind: input, shape index: {}]   ;;  %s5674_s22 = inlined_call_operand.vmem [shape: f32[1,128], index: 22, kind: input, shape index: {}]   ;;  %s5675_s23 = inlined_call_operand.vmem [shape: f32[1,128], index: 23, kind: input, shape index: {}]   ;;  %s5676_s24 = inlined_call_operand.hbm [shape: f32[2,8,128], index: 24, kind: output, shape index: {0}]   ;;  %s5677_s25 = inlined_call_operand.hbm [shape: f32[2,4,8,8], index: 25, kind: output, shape index: {1}]   ;;  %s5678_s26 = inlined_call_operand.hbm [shape: f32[2,4,8,8], index: 26, kind: output, shape index: {2}]  }
   0x1   :  { %5711 = sst [smem:[#allocation39_spill]] %s5652_s0 }
   0x2   :  { %5712 = sst [smem:[#allocation40_spill]] %s5653_s1 }
   0x3   :  { %5713 = sst [smem:[#allocation41_spill]] %s5654_s2 }
   0x4   :  { %5714 = sst [smem:[#allocation42_spill]] %s5655_s3 }
   0x5   :  { %5715 = sst [smem:[#allocation43_spill]] %s5656_s4 }
   0x6   :  { %5716 = sst [smem:[#allocation44_spill]] %s5657_s5 }
   0x7   :  { %5717 = sst [smem:[#allocation45_spill]] %s5658_s6 }
   0x8   :  { %5718 = sst [smem:[#allocation46_spill]] %s5659_s7 }
   0x9   :  { %5719 = sst [smem:[#allocation47_spill]] %s5660_s8 }
   0xa   :  { %5720 = sst [smem:[#allocation48_spill]] %s5661_s9 }
   0xb   :  { %5721 = sst [smem:[#allocation49_spill]] %s5662_s10 }
   0xc   :  { %5722 = sst [smem:[#allocation50_spill]] %s5664_s12 }
   0xd   :  { %5723 = sst [smem:[#allocation51_spill]] %s5666_s14 }
   0xe   :  { %5724 = sst [smem:[#allocation52_spill]] %s5670_s18 }
   0xf   :  { %5725 = sst [smem:[#allocation53_spill]] %s5671_s19 }
  0x10   :  { %5726 = sst [smem:[#allocation54_spill]] %s5673_s21 }
  0x11   :  { %5727 = sst [smem:[#allocation55_spill]] %s5674_s22 }
  0x12   :  { %5728 = sst [smem:[#allocation56_spill]] %s5675_s23 }
  0x13   :  { %5729 = sst [smem:[#allocation57_spill]] %s5676_s24 }
  0x14   :  { %5730 = sst [smem:[#allocation58_spill]] %s5677_s25 }
  0x15   :  { %5731 = sst [smem:[#allocation59_spill]] %s5678_s26 }
  0x16   :  { %32 = vsyncpa [#allocation3], 0 }
  0x17   :  { %34 = vsyncpa [#allocation3 + $0x1], 0 }
  0x18   :  { %35 = vsyncpa [#allocation6], 0 }
  0x19   :  { %37 = vsyncpa [#allocation6 + $0x1], 0 }
  0x1a   :  { %38 = vsyncpa [#allocation9], 0 }
  0x1b   :  { %40 = vsyncpa [#allocation9 + $0x1], 0 }
  0x1c   :  { %41 = vsyncpa [#allocation12], 0 }
  0x1d   :  { %42 = vsyncpa [#allocation15], 0 }
  0x1e   :  { %43 = vsyncpa [#allocation18], 0 }
  0x1f   :  { %44 = vsyncpa [#allocation4], 0 }
  0x20   :  { %46 = vsyncpa [#allocation4 + $0x1], 0 }
  0x21   :  { %47 = vsyncpa [#allocation22], 0 }
  0x22   :  { %49 = vsyncpa [#allocation22 + $0x1], 0  ;;  %s4866_s27 = smov 0   ;;  %s4868_s3 = smov 0  }
  0x23   :  { %s4870_s7 = smov 0   ;;  %s4872_s28 = smov 0  }
  0x24 LB: > { %5732 = sst [smem:[#allocation33_spill]] %s4689_s27  ;;  %s4703_s8 = smov [#allocation10]   ;;  %s4701_s28 = sphi %s4872_s28, %s5794_s28   ;;  %s4697_s7 = sphi %s4870_s7, %s5796_s7   ;;  %s4693_s3 = sphi %s4868_s3, %s5798_s3   ;;  %s4689_s27 = sphi %s4866_s27, %s5797_s27  }
  0x25   : > { %5733 = sst [smem:[#allocation34_spill]] %s4697_s7  ;;  %s674_s4 = sshll.u32 %s4703_s8, 4  ;;  %s675_s4 = int_to_ptr.vmem [resolvable:$true] %s674_s4 }
  0x26   : > { %s4887_s29 = sadd.s32 4294967295, %s4701_s28   ;;  %p3640_p0 = scmp.ge.s32.totalorder %s4701_s28, 1 }
  0x27   : > { %p5697_p1 = scmp.eq.s32.totalorder %s4887_s29, 0  ;;  %p662_p2 = scmp.lt.s32.totalorder %s4701_s28, 3 }
  0x28   : > { %s4704_s9 = smov [#allocation11]   ;;  %s4705_s5 = smov [#allocation14]  }
  0x29   : > { %p4892_p3 = pnand %p3640_p0, %p662_p2  ;;  %s690_s30 = sshll.u32 %s4704_s9, 4  ;;  %s4905_s30 = int_to_ptr.vmem [resolvable:$true] %s690_s30 }
  0x2a   : > { %s4907_s10 = sshll.u32 %s4705_s5, 4  ;;  %s4274_s1 = scalar_lea.vmem %s675_s4, 6144  ;;  %s729_s10 = int_to_ptr.vmem [resolvable:$true] %s4907_s10 }
  0x2b   : > { %s5734_s0 = scalar_select %p4892_p3, 1, 0 }
  0x2c   : > { %p4111_p5 = pneg %p4892_p3  ;;  %p4275_p8 = scmp.ne.s32.totalorder %s675_s4, %s4274_s1 }
  0x2d   : > { %p4282_p11 = scmp.lt.s32.totalorder %s675_s4, %s675_s4  ;;  %p4283_p12 = scmp.lt.s32.totalorder %s4274_s1, %s4274_s1 }
  0x2e   : > { %p4901_p6 = pnand %p4111_p5, %p5697_p1 }
  0x2f   : > { %p4284_p13 = por %p4283_p12, %p4282_p11 }
  0x30   : > { %s5735_s2 = scalar_select %p4901_p6, 1, 0 }
  0x31   : > { %p4911_p7 = pneg %p4901_p6 }
  0x33   : > { %s5736_s6 = scalar_select %p4911_p7, 1, 0 }
  0x34   : > { %p4277_p9 = pnand %p4275_p8, %p4911_p7 }
  0x36   : > { %p4278_p10 = pneg %p4277_p9 }
  0x38   : > { %p4285_p0 = pnand %p4284_p13, %p4278_p10 }
  0x3a   : > { %4288 = shalt.err (!%p4285_p0)
}
  0x3b   : > { %s4706_s8 = smov 384   ;;  %s4707_s9 = smov 24  }
  0x3c   : > { %s5737_s23 = sld [smem:[#allocation43_spill]]  ;;  %s4300_s22 = scalar_lea.vmem %s4905_s30, 2048 }
  0x3d   : > { %p4301_p2 = scmp.ne.s32.totalorder %s4905_s30, %s4300_s22  ;;  %p4308_p9 = scmp.lt.s32.totalorder %s4905_s30, %s4905_s30 }
  0x3e   : > { %p4309_p10 = scmp.lt.s32.totalorder %s4300_s22, %s4300_s22 }
  0x3f   : > { %p4303_p5 = pnand %p4301_p2, %p4911_p7 }
  0x40   : > { %p4310_p11 = por %p4309_p10, %p4308_p9 }
  0x41   : > { %p4304_p8 = pneg %p4303_p5 }
  0x42   : > { %4114 = dma.hbm_to_vmem [thread:$0]  (!%p4901_p6), %s5737_s23, 6144, %s675_s4, [#allocation9], %s4706_s8, %s4706_s8, %s4707_s9  }
  0x43   : > { %p4311_p12 = pnand %p4310_p11, %p4304_p8 }
  0x45   : > { %4314 = shalt.err (!%p4311_p12)
}
  0x46   : > { %s5687_s1 = smov 128   ;;  %s5689_s26 = smov 8  }
  0x47   : > { %s5738_s4 = sld [smem:[#allocation45_spill]]  ;;  %s4326_s8 = scalar_lea.vmem %s729_s10, 4096 }
  0x48   : > { %p4327_p13 = scmp.ne.s32.totalorder %s729_s10, %s4326_s8  ;;  %p4334_p5 = scmp.lt.s32.totalorder %s729_s10, %s729_s10 }
  0x49   : > { %p4335_p8 = scmp.lt.s32.totalorder %s4326_s8, %s4326_s8 }
  0x4a   : > { %p4329_p0 = pnand %p4327_p13, %p4911_p7 }
  0x4b   : > { %p4336_p9 = por %p4335_p8, %p4334_p5 }
  0x4c   : > { %p4330_p2 = pneg %p4329_p0 }
  0x4d   : > { %4117 = dma.hbm_to_vmem [thread:$0]  (!%p4901_p6), %s5738_s4, 2048, %s4905_s30, [#allocation12], %s5687_s1, %s5687_s1, %s5689_s26  }
  0x4e   : > { %p4337_p10 = pnand %p4336_p9, %p4330_p2 }
  0x50   : > { %4340 = shalt.err (!%p4337_p10)
}
  0x51   : > { %s4710_s22 = smov 256   ;;  %s4711_s9 = smov 16  }
  0x52   : > { %s5739_s12 = sld [smem:[#allocation50_spill]]  ;;  %s4712_s30 = smov [#allocation17]  }
  0x53   : > { %s766_s23 = sshll.u32 %s4712_s30, 4  ;;  %s767_s23 = int_to_ptr.vmem [resolvable:$true] %s766_s23 }
  0x54   : > { %s4352_s24 = scalar_lea.vmem %s767_s23, 4096  ;;  %p4360_p0 = scmp.lt.s32.totalorder %s767_s23, %s767_s23 }
  0x55   : > { %p4353_p11 = scmp.ne.s32.totalorder %s767_s23, %s4352_s24  ;;  %p4361_p2 = scmp.lt.s32.totalorder %s4352_s24, %s4352_s24 }
  0x57   : > { %p4355_p12 = pnand %p4353_p11, %p4911_p7  ;;  %p4362_p5 = por %p4361_p2, %p4360_p0 }
  0x58   : > { %4123 = dma.hbm_to_vmem [thread:$0]  (!%p4901_p6), %s5739_s12, 4096, %s729_s10, [#allocation15], %s4710_s22, %s4710_s22, %s4711_s9  }
  0x59   : > { %p4356_p13 = pneg %p4355_p12 }
  0x5b   : > { %p4363_p8 = pnand %p4362_p5, %p4356_p13 }
  0x5d   : > { %4366 = shalt.err (!%p4363_p8)
}
  0x5e   : > { %s5740_s18 = sld [smem:[#allocation52_spill]]  ;;  %s5686_s25 = sadd.s32 4294967294, %s4701_s28  }
  0x5f   : > { %s4954_s10 = sadd.s32 1, %s4701_s28   ;;  %s62_s30 = sadd.s32 1, %s4697_s7 }
  0x60   : > { %5741 = sst [smem:[#allocation35_spill]] %s4954_s10  ;;  %s59_s5 = ssub.s32 %s4701_s28, %s4954_s10 }
  0x61   : > { %p60_p9 = scmp.eq.s32.totalorder %s59_s5, 0  ;;  %p69_p10 = scmp.ne.s32.totalorder %s4697_s7, %s4693_s3 }
  0x62   : > { %p70_p11 = scmp.eq.s32.totalorder %s4701_s28, 0  ;;  %p75_p12 = scmp.ne.s32.totalorder %s4693_s3, %s4689_s27 }
  0x63   : > { %s4965_s24 = scalar_select %p60_p9, %s4697_s7, %s62_s30  }
  0x64   : > { %4129 = dma.hbm_to_vmem [thread:$0]  (!%p4901_p6), %s5740_s18, 4096, %s767_s23, [#allocation18], %s4710_s22, %s4710_s22, %s4711_s9  }
  0x65   : > { %5742 = sst [smem:[#allocation36_spill]] %s4965_s24  ;;  %p71_p13 = por %p70_p11, %p69_p10 }
  0x66   : > { %p4969_p0 = por %p5697_p1, %p75_p12  ;;  %p597_p2 = scmp.eq.s32.totalorder %s4887_s29, 1 }
  0x67   : > { %p603_p5 = scmp.eq.s32.totalorder %s5686_s25, 1  ;;  %p4163_p8 = scmp.lt.s32.totalorder %s4701_s28, 2 }
  0x68   : > { %s5743_s22 = scalar_select %p4969_p0, 1, 0 }
  0x69   : > { %s4978_s9 = sand.u32 1, %s4697_s7   ;;  %p4980_p4 = por %p597_p2, %p69_p10 }
  0x6a   : > { %p4984_p9 = por %p603_p5, %p75_p12  ;;  %s5695_s8 = sshll.u32 %s4701_s28, 4 }
  0x6b   : > { %s5744_s23 = scalar_select %p4980_p4, 1, 0 }
  0x6c   : > { %s5746_s4 = scalar_select %p4984_p9, 1, 0 }
  0x6d   : > { %5745 = sst [smem:[#allocation37_spill]] %s5744_s23  ;;  %p4989_p11 = pnand %p4163_p8, %p71_p13 }
  0x6e   : > { %5747 = sst [smem:[#allocation38_spill]] %s5746_s4  ;;  %s5698_s30 = sand.u32 1, %s4701_s28  }
  0x6f   : > { %s5749_s26 = sld [smem:[#allocation40_spill]]  ;;  %s825_s18 = scalar_lea.vmem [#allocation5], %s4978_s9 }
  0x70   : > { %s832_s24 = sshll.u32 %s825_s18, 4  ;;  %s5004_s7 = scalar_lea.sflag [#allocation6], %s5698_s30  ;;  %s833_s24 = int_to_ptr.vmem [resolvable:$true] %s832_s24 }
  0x71   : > { %p5010_p12 = pneg %p4989_p11 }
  0x75   : > { %s4999_s12 = scalar_lea.hbm %s5749_s26, %s5695_s8  ;;  %s4372_s8 = scalar_lea.hbm %s5749_s26, 32 }
  0x76   : > { %s4367_s10 = scalar_lea.hbm %s4999_s12, 16  ;;  %p4373_p5 = scmp.lt.s32.totalorder %s4999_s12, %s5749_s26 }
  0x77   : > { %p4368_p10 = scmp.ne.s32.totalorder %s4999_s12, %s4367_s10  ;;  %p4374_p8 = scmp.lt.s32.totalorder %s4372_s8, %s4367_s10 }
  0x79   : > { %p4370_p13 = pnand %p5010_p12, %p4368_p10  ;;  %p4375_p1 = por %p4374_p8, %p4373_p5 }
  0x7b   : > { %p4371_p2 = pneg %p4370_p13 }
  0x7d   : > { %p4376_p9 = pnand %p4375_p1, %p4371_p2 }
  0x7f   : > { %4379 = shalt.err (!%p4376_p9)
}
  0x80   : > { %s4380_s30 = scalar_lea.vmem %s833_s24, 16  ;;  %s4713_s23 = smov [#allocation5]  }
  0x81   : > { %p4381_p4 = scmp.ne.s32.totalorder %s833_s24, %s4380_s30  ;;  %s4385_s21 = sshll.u32 %s4713_s23, 4  ;;  %s4386_s21 = int_to_ptr.vmem [resolvable:$false] %s4385_s21 }
  0x82   : > { %s4387_s19 = scalar_lea.vmem %s4386_s21, 32  ;;  %p4388_p10 = scmp.lt.s32.totalorder %s833_s24, %s4386_s21 }
  0x83   : > { %p4383_p0 = pnand %p4381_p4, %p5010_p12  ;;  %p4389_p13 = scmp.lt.s32.totalorder %s4387_s19, %s4380_s30 }
  0x85   : > { %p4384_p3 = pneg %p4383_p0  ;;  %p4390_p6 = por %p4389_p13, %p4388_p10 }
  0x87   : > { %p4391_p7 = pnand %p4390_p6, %p4384_p3 }
  0x89   : > { %4394 = shalt.err (!%p4391_p7)
}
  0x8a   : > { %4139 = dma.hbm_to_vmem [thread:$0]  (!%p4989_p11), %s4999_s12, 16, %s833_s24, %s5004_s7  }
  0x8b   : > { %s4714_s27 = smov [#allocation13]   ;;  %s4715_s8 = smov [#allocation16]  }
  0x8c   : > { %s712_s10 = sshll.u32 %s4714_s27, 4  ;;  %s744_s1 = sshll.u32 %s4715_s8, 4  ;;  %s713_s10 = int_to_ptr.vmem [resolvable:$true] %s712_s10  ;;  %s745_s1 = int_to_ptr.vmem [resolvable:$true] %s744_s1 }
  0x8d   : > { %s4406_s23 = scalar_lea.vmem %s713_s10, 2048  ;;  %p5751_p4 = scmp.ne.s32.totalorder %s5736_s6, 0 }
  0x8e   : > { %p4407_p1 = scmp.ne.s32.totalorder %s713_s10, %s4406_s23  ;;  %p4414_p2 = scmp.lt.s32.totalorder %s713_s10, %s713_s10 }
  0x8f   : > { %p4415_p3 = scmp.lt.s32.totalorder %s4406_s23, %s4406_s23 }
  0x90   : > { %p4409_p0 = pnand %p4407_p1, %p5751_p4 }
  0x91   : > { %p4416_p6 = por %p4415_p3, %p4414_p2 }
  0x92   : > { %p4410_p9 = pneg %p4409_p0 }
  0x94   : > { %p4417_p7 = pnand %p4416_p6, %p4410_p9 }
  0x96   : > { %4420 = shalt.err (!%p4417_p7)
}
  0x97   : > { %p5752_p5 = scmp.ne.s32.totalorder %s5735_s2, 0  ;;  %s5753_s19 = smov 8  }
  0x98   : > { %s5754_s12 = smov 128   ;;  %s5755_s30 = sld [smem:[#allocation49_spill]] }
  0x99   : > { %s4432_s25 = scalar_lea.vmem %s745_s1, 2048  ;;  %p4440_p1 = scmp.lt.s32.totalorder %s745_s1, %s745_s1 }
  0x9a   : > { %p4433_p8 = scmp.ne.s32.totalorder %s745_s1, %s4432_s25  ;;  %p4441_p0 = scmp.lt.s32.totalorder %s4432_s25, %s4432_s25 }
  0x9c   : > { %p4435_p10 = pnand %p4433_p8, %p5751_p4  ;;  %p4442_p2 = por %p4441_p0, %p4440_p1 }
  0x9e   : > { %4120 = dma.hbm_to_vmem [thread:$0]  (!%p5752_p5), %s5755_s30, 2048, %s713_s10, [#allocation12], %s5754_s12, %s5754_s12, %s5753_s19  }
  0x9f   : > { %p4436_p13 = pneg %p4435_p10 }
  0xa1   : > { %p4443_p9 = pnand %p4442_p2, %p4436_p13 }
  0xa3   : > { %4446 = shalt.err (!%p4443_p9)
}
  0xa4   : > { %s5756_s14 = sld [smem:[#allocation51_spill]]  ;;  %s4716_s10 = smov [#allocation19]  }
  0xa5   : > { %s782_s8 = sshll.u32 %s4716_s10, 4  ;;  %s5757_s23 = sshll.u32 %s4701_s28, 4  ;;  %s783_s8 = int_to_ptr.vmem [resolvable:$true] %s782_s8 }
  0xa6   : > { %s5758_s30 = sld [smem:[#allocation39_spill]]  ;;  %s4458_s26 = scalar_lea.vmem %s783_s8, 4096 }
  0xa7   : > { %p4459_p3 = scmp.ne.s32.totalorder %s783_s8, %s4458_s26  ;;  %p4466_p8 = scmp.lt.s32.totalorder %s783_s8, %s783_s8 }
  0xa8   : > { %p4467_p10 = scmp.lt.s32.totalorder %s4458_s26, %s4458_s26 }
  0xa9   : > { %p4461_p6 = pnand %p4459_p3, %p5751_p4 }
  0xaa   : > { %4126 = dma.hbm_to_vmem [thread:$0]  (!%p5752_p5), %s5756_s14, 2048, %s745_s1, [#allocation15], %s5754_s12, %s5754_s12, %s5753_s19  }
  0xab   : > { %p4462_p7 = pneg %p4461_p6  ;;  %p4468_p13 = por %p4467_p10, %p4466_p8 }
  0xac   : > { %s5054_s25 = scalar_lea.hbm %s5758_s30, %s5757_s23 }
  0xad   : > { %p4469_p1 = pnand %p4468_p13, %p4462_p7 }
  0xaf   : > { %4472 = shalt.err (!%p4469_p1)
}
  0xb0   : > { %4132 = dma.hbm_to_vmem [thread:$0]  (!%p5752_p5), %s5672_s20, 4096, %s783_s8, [#allocation18], %s5754_s12, %s5754_s12, %s5753_s19  }
  0xb1   : > { %s808_s26 = scalar_lea.vmem [#allocation2], %s4978_s9  ;;  %s3651_s27 = sshll.u32 %s4978_s9, 3 }
  0xb2   : > { %s815_s6 = sshll.u32 %s808_s26, 4  ;;  %s806_s10 = scalar_lea.sflag [#allocation3], %s4978_s9  ;;  %s816_s6 = int_to_ptr.vmem [resolvable:$true] %s815_s6 }
  0xb3   : > { %s4473_s2 = scalar_lea.hbm %s5054_s25, 16  ;;  %s4478_s24 = scalar_lea.hbm %s5758_s30, 32 }
  0xb4   : > { %p4474_p4 = scmp.ne.s32.totalorder %s5054_s25, %s4473_s2  ;;  %p4479_p9 = scmp.lt.s32.totalorder %s5054_s25, %s5758_s30 }
  0xb5   : > { %p4480_p3 = scmp.lt.s32.totalorder %s4478_s24, %s4473_s2 }
  0xb6   : > { %p4476_p0 = pnand %p4474_p4, %p5010_p12 }
  0xb7   : > { %p4481_p5 = por %p4480_p3, %p4479_p9 }
  0xb8   : > { %p4477_p2 = pneg %p4476_p0 }
  0xba   : > { %p4482_p6 = pnand %p4481_p5, %p4477_p2 }
  0xbc   : > { %4485 = shalt.err (!%p4482_p6)
}
  0xbd   : > { %s4486_s19 = scalar_lea.vmem %s816_s6, 16  ;;  %s4717_s12 = smov [#allocation2]  }
  0xbe   : > { %p4487_p7 = scmp.ne.s32.totalorder %s816_s6, %s4486_s19  ;;  %s4491_s8 = sshll.u32 %s4717_s12, 4  ;;  %s4492_s8 = int_to_ptr.vmem [resolvable:$false] %s4491_s8 }
  0xbf   : > { %s4493_s26 = scalar_lea.vmem %s4492_s8, 32  ;;  %p4494_p13 = scmp.lt.s32.totalorder %s816_s6, %s4492_s8 }
  0xc0   : > { %p4489_p8 = pnand %p4487_p7, %p5010_p12  ;;  %p4495_p1 = scmp.lt.s32.totalorder %s4493_s26, %s4486_s19 }
  0xc2   : > { %p4490_p10 = pneg %p4489_p8  ;;  %p4496_p4 = por %p4495_p1, %p4494_p13 }
  0xc4   : > { %p4497_p0 = pnand %p4496_p4, %p4490_p10 }
  0xc6   : > { %4500 = shalt.err (!%p4497_p0)
}
  0xc7   : > { %4136 = dma.hbm_to_vmem [thread:$0]  (!%p4989_p11), %s5054_s25, 16, %s816_s6, %s806_s10  }
  0xc8   : > { %s3652_s2 = sshll.u32 %s4701_s28, 7  ;;  %s843_s23 = scalar_lea.vmem [#allocation7], %s3651_s27 }
  0xc9   : > { %s850_s21 = sshll.u32 %s843_s23, 4  ;;  %s5759_s18 = sld [smem:[#allocation41_spill]]  ;;  %s851_s21 = int_to_ptr.vmem [resolvable:$true] %s850_s21 }
  0xcf   : > { %s848_s19 = scalar_lea.hbm %s5759_s18, %s3652_s2  ;;  %s4506_s14 = scalar_lea.hbm %s5759_s18, 256 }
  0xd0   : > { %s4501_s12 = scalar_lea.hbm %s848_s19, 128  ;;  %p4507_p5 = scmp.lt.s32.totalorder %s848_s19, %s5759_s18 }
  0xd1   : > { %p4502_p2 = scmp.ne.s32.totalorder %s848_s19, %s4501_s12  ;;  %p4508_p6 = scmp.lt.s32.totalorder %s4506_s14, %s4501_s12 }
  0xd3   : > { %p4504_p9 = pnand %p4502_p2, %p5010_p12  ;;  %p4509_p7 = por %p4508_p6, %p4507_p5 }
  0xd5   : > { %p4505_p3 = pneg %p4504_p9 }
  0xd7   : > { %p4510_p8 = pnand %p4509_p7, %p4505_p3 }
  0xd9   : > { %4513 = shalt.err (!%p4510_p8)
}
  0xda   : > { %s4514_s10 = scalar_lea.vmem %s851_s21, 128  ;;  %s4718_s23 = smov [#allocation7]  }
  0xdb   : > { %p4515_p10 = scmp.ne.s32.totalorder %s851_s21, %s4514_s10  ;;  %s4519_s24 = sshll.u32 %s4718_s23, 4  ;;  %s4520_s24 = int_to_ptr.vmem [resolvable:$false] %s4519_s24 }
  0xdc   : > { %s4521_s1 = scalar_lea.vmem %s4520_s24, 256  ;;  %p4522_p4 = scmp.lt.s32.totalorder %s851_s21, %s4520_s24 }
  0xdd   : > { %p4517_p13 = pnand %p4515_p10, %p5010_p12  ;;  %p4523_p0 = scmp.lt.s32.totalorder %s4521_s1, %s4514_s10 }
  0xdf   : > { %p4518_p1 = pneg %p4517_p13  ;;  %p4524_p2 = por %p4523_p0, %p4522_p4 }
  0xe1   : > { %p4525_p9 = pnand %p4524_p2, %p4518_p1 }
  0xe3   : > { %4528 = shalt.err (!%p4525_p9)
}
  0xe4   : > { %4142 = dma.hbm_to_vmem [thread:$0]  (!%p4989_p11), %s848_s19, 128, %s851_s21, %s5004_s7  }
  0xe5   : > { %s5760_s8 = sld [smem:[#allocation42_spill]]  ;;  %s861_s25 = scalar_lea.vmem [#allocation8], %s3651_s27 }
  0xe6   : > { %s868_s6 = sshll.u32 %s861_s25, 4  ;;  %s5761_s10 = sand.u32 1, %s4701_s28   ;;  %s869_s6 = int_to_ptr.vmem [resolvable:$true] %s868_s6 }
  0xe7   : > { %s858_s23 = scalar_lea.sflag [#allocation9], %s5761_s10 }
  0xeb   : > { %s5111_s26 = scalar_lea.hbm %s5760_s8, %s3652_s2  ;;  %s4534_s19 = scalar_lea.hbm %s5760_s8, 256 }
  0xec   : > { %s4529_s24 = scalar_lea.hbm %s5111_s26, 128  ;;  %p4535_p7 = scmp.lt.s32.totalorder %s5111_s26, %s5760_s8 }
  0xed   : > { %p4530_p3 = scmp.ne.s32.totalorder %s5111_s26, %s4529_s24  ;;  %p4536_p8 = scmp.lt.s32.totalorder %s4534_s19, %s4529_s24 }
  0xef   : > { %p4532_p5 = pnand %p4530_p3, %p5010_p12  ;;  %p4537_p10 = por %p4536_p8, %p4535_p7 }
  0xf1   : > { %p4533_p6 = pneg %p4532_p5 }
  0xf3   : > { %p4538_p13 = pnand %p4537_p10, %p4533_p6 }
  0xf5   : > { %4541 = shalt.err (!%p4538_p13)
}
  0xf6   : > { %s4542_s9 = scalar_lea.vmem %s869_s6, 128  ;;  %s4719_s27 = smov [#allocation8]  }
  0xf7   : > { %p4543_p1 = scmp.ne.s32.totalorder %s869_s6, %s4542_s9  ;;  %s4547_s14 = sshll.u32 %s4719_s27, 4  ;;  %s4548_s14 = int_to_ptr.vmem [resolvable:$false] %s4547_s14 }
  0xf8   : > { %s4549_s12 = scalar_lea.vmem %s4548_s14, 256  ;;  %p4550_p2 = scmp.lt.s32.totalorder %s869_s6, %s4548_s14 }
  0xf9   : > { %p4545_p4 = pnand %p4543_p1, %p5010_p12  ;;  %p4551_p9 = scmp.lt.s32.totalorder %s4549_s12, %s4542_s9 }
  0xfb   : > { %p4546_p0 = pneg %p4545_p4  ;;  %p4552_p3 = por %p4551_p9, %p4550_p2 }
  0xfd   : > { %p4553_p5 = pnand %p4552_p3, %p4546_p0 }
  0xff   : > { %4556 = shalt.err (!%p4553_p5)
}
 0x100   : > { %4145 = dma.hbm_to_vmem [thread:$0]  (!%p4989_p11), %s5111_s26, 128, %s869_s6, %s858_s23  }
 0x101   : > { %p5762_p6 = scmp.ne.s32.totalorder %s5734_s0, 0 }
 0x102   : > { %s5136_s4 = sand.u32 (!%p5762_p6), 1, %s4693_s3   ;;  %p5763_p12 = scmp.ne.s32.totalorder (!%p5762_p6), %s5743_s22, 0 }
 0x103   : > { %877 = sbr.rel (%p5762_p6) target bundleno = 7129 (0x1bd9), region = 116  ;;  %s880_s25 = scalar_lea.sflag (!%p5762_p6), [#allocation3], %s5136_s4 }
 0x104   : > { %s882_s10 = scalar_lea.vmem (!%p5762_p6), [#allocation2], %s5136_s4 }
 0x108   : > { %4652 = dma.done.wait (%p5763_p12), %s880_s25, 16  }
 0x109   : > { %4654 = vsyncadd (%p5763_p12), %s880_s25, 4294967280  ;;  %s5145_s5 = sand.u32 1, %s4887_s29   ;;  %s890_s26 = scalar_lea.vmem [#allocation5], %s5136_s4 }
 0x10a   : > { %s888_s0 = scalar_lea.sflag [#allocation6], %s5145_s5 }
 0x10b   : > { %4656 = dma.done.wait (%p5763_p12), %s888_s0, 144  }
 0x10c   : > { %4658 = vsyncadd (%p5763_p12), %s888_s0, 4294967152  ;;  %s5154_s6 = sshll.u32 %s5136_s4, 3  ;;  %s905_s24 = scalar_lea.sflag [#allocation9], %s5145_s5 }
 0x10d   : > { %s899_s23 = scalar_lea.vmem [#allocation7], %s5154_s6  ;;  %s908_s7 = scalar_lea.vmem [#allocation8], %s5154_s6 }
 0x10e   : > { %4660 = dma.done.wait (%p5763_p12), %s905_s24, 128  }
 0x10f   : > { %4662 = vsyncadd (%p5763_p12), %s905_s24, 4294967168  ;;  %p5764_p11 = scmp.eq.s32.totalorder %s4887_s29, 0 }
 0x111   : > { %4664 = dma.done.wait (%p5764_p11), [#allocation9], 6144   ;;  %p5765_p7 = pmov %p5764_p11 }
 0x113   : > { %4666 = vsyncadd (%p5765_p7), [#allocation9], 4294961152  ;;  %p5766_p8 = pmov %p5765_p7 }
 0x114   : > { %p5767_p10 = pmov %p5765_p7 }
 0x115   : > { %4668 = dma.done.wait (%p5766_p8), [#allocation12], 4096  }
 0x116   : > { %4670 = vsyncadd (%p5767_p10), [#allocation12], 4294963200  ;;  %p5768_p13 = pmov %p5765_p7 }
 0x117   : > { %p5769_p1 = pmov %p5765_p7 }
 0x118   : > { %4672 = dma.done.wait (%p5768_p13), [#allocation15], 6144  }
 0x119   : > { %4674 = vsyncadd (%p5769_p1), [#allocation15], 4294961152  ;;  %p5770_p4 = pmov %p5769_p1 }
 0x11a   : > { %p5771_p0 = pmov %p5769_p1 }
 0x11b   : > { %4676 = dma.done.wait (%p5770_p4), [#allocation18], 8192  }
 0x11c   : > { %4678 = vsyncadd (%p5771_p0), [#allocation18], 4294959104  ;;  %v4720_v0 = vmov 0.0   ;;  %v1092_v1 = vld [vmem:[#allocation10 + $0x170] sm:$0xff]  ;;  %v1091_v2 = vld [vmem:[#allocation10 + $0x168] sm:$0xff]  ;;  %vm4721_vm0 = vmmov 0   ;;  %v1034_v50 = vlaneseq }
 0x11d   : > { %1175 = vmatprep.mubr.f32.mxu0 %v4720_v0  ;;  %3849 = vmatprep.subr.mxu1 %v4720_v0  ;;  %v1089_v3 = vld [vmem:[#allocation10 + $0x158] sm:$0xff]  ;;  %v1088_v4 = vld [vmem:[#allocation10 + $0x150] sm:$0xff]  ;;  %v1086_v5 = vld [vmem:[#allocation10 + $0x140] sm:$0xff]  ;;  %s5772_s19 = sld [smem:[#allocation44_spill]]  ;;  %vm1271_vm1 = vcmask 261120   ;;  %s4722_s2 = smov 96  }
 0x11e   : > { %1111 = vmatprep.subr.mxu0 %v1092_v1  ;;  %v1085_v6 = vld [vmem:[#allocation10 + $0x138] sm:$0xff]  ;;  %v1083_v7 = vld [vmem:[#allocation10 + $0x128] sm:$0xff]  ;;  %v1082_v8 = vld [vmem:[#allocation10 + $0x120] sm:$0xff]  ;;  %3881 = vmatprep.mubr.msk.f32.mxu1 %vm4721_vm0, %v4720_v0  ;;  %v1035_v51 = vshrl.u32 %v1034_v50, 7  ;;  %vm1349_vm6 = vcmask 64512   ;;  %s3666_s1 = sshll.u32 %s5136_s4, 5 }
 0x11f   : > { %1112 = vmatpush1.msra.mxu0 %v1091_v2  ;;  %v1080_v9 = vld [vmem:[#allocation10 + $0x110] sm:$0xff]  ;;  %v1079_v10 = vld [vmem:[#allocation10 + $0x108] sm:$0xff]  ;;  %v1077_v11 = vld [vmem:[#allocation10 + $0xf8] sm:$0xff]  ;;  %s5254_s9 = scalar_lea.vmem [#allocation21], %s3666_s1  ;;  %s4724_s27 = smov 64   ;;  %vm1946_vm7 = vcmask 523264  }
 0x120   : > { %1113 = vmatprep.subr.mxu0 %v1089_v3  ;;  %v1076_v12 = vld [vmem:[#allocation10 + $0xf0] sm:$0xff]  ;;  %v1074_v13 = vld [vmem:[#allocation10 + $0xe0] sm:$0xff]  ;;  %v1073_v14 = vld [vmem:[#allocation10 + $0xd8] sm:$0xff]  ;;  %v5210_v52 = vsub.s32 1, %v1035_v51  ;;  %v5212_v53 = vsub.s32 0, %v1035_v51  ;;  %v1106_v61 = vsub.s32 2, %v1035_v51 }
 0x121   : > { %1114 = vmatpush1.msra.mxu0 %v1088_v4  ;;  %v1093_v15 = vld [vmem:[#allocation10 + $0x178] sm:$0xff]  ;;  %v1090_v16 = vld [vmem:[#allocation10 + $0x160] sm:$0xff]  ;;  %v1071_v17 = vld [vmem:[#allocation10 + $0xc8] sm:$0xff]  ;;  %v4723_v4 = vmov 0   ;;  %s4725_s14 = smov 32   ;;  %vm1948_vm8 = vcmask 785408  }
 0x122   : > { %1115 = vmatprep.subr.mxu0 %v1086_v5  ;;  %3850 = vmatpush3.msra.mxu1 %v1093_v15  ;;  %v1070_v18 = vld [vmem:[#allocation10 + $0xc0] sm:$0xff]  ;;  %v1087_v19 = vld [vmem:[#allocation10 + $0x148] sm:$0xff]  ;;  %v1068_v20 = vld [vmem:[#allocation10 + $0xb0] sm:$0xff]  ;;  %s5776_s24 = sld [smem:[#allocation47_spill]]  ;;  %s3363_s0 = sshll.u32 %s5254_s9, 4  ;;  %s5550_s0 = int_to_ptr.vmem [resolvable:$true] %s3363_s0 }
 0x123   : > { %1116 = vmatpush1.msra.mxu0 %v1085_v6  ;;  %3851 = vmatprep.subr.mxu1 %v4720_v0  ;;  %v1067_v21 = vld [vmem:[#allocation10 + $0xa8] sm:$0xff]  ;;  %v1084_v22 = vld [vmem:[#allocation10 + $0x130] sm:$0xff]  ;;  %v1065_v23 = vld [vmem:[#allocation10 + $0x98] sm:$0xff]  ;;  %v1037_v6 = vand.u32 127, %v1034_v50  ;;  %s5777_s21 = sld [smem:[#allocation48_spill]] }
 0x124   : > { %1117 = vmatprep.subr.mxu0 %v1083_v7  ;;  %3852 = vmatpush3.msra.mxu1 %v1090_v16  ;;  %v1064_v24 = vld [vmem:[#allocation10 + $0x90] sm:$0xff]  ;;  %v1081_v25 = vld [vmem:[#allocation10 + $0x118] sm:$0xff]  ;;  %v1062_v26 = vld [vmem:[#allocation10 + $0x80] sm:$0xff]  ;;  %s5780_s22 = sld [smem:[#allocation53_spill]] }
 0x125   : > { %1118 = vmatpush1.msra.mxu0 %v1082_v8  ;;  %3853 = vmatprep.subr.mxu1 %v4720_v0  ;;  %v1061_v27 = vld [vmem:[#allocation10 + $0x78] sm:$0xff]  ;;  %v1078_v28 = vld [vmem:[#allocation10 + $0x100] sm:$0xff]  ;;  %v1059_v29 = vld [vmem:[#allocation10 + $0x68] sm:$0xff]  ;;  %vm1038_vm3 = vcmp.gt.s32.totalorder %v1037_v6, %v1035_v51  ;;  %s5781_s12 = sld [smem:[#allocation54_spill]] }
 0x126   : > { %1119 = vmatprep.subr.mxu0 %v1080_v9  ;;  %3854 = vmatpush3.msra.mxu1 %v1087_v19  ;;  %v1058_v30 = vld [vmem:[#allocation10 + $0x60] sm:$0xff]  ;;  %v1075_v31 = vld [vmem:[#allocation10 + $0xe8] sm:$0xff]  ;;  %v1056_v32 = vld [vmem:[#allocation10 + $0x50] sm:$0xff]  ;;  %s5782_s25 = sld [smem:[#allocation37_spill]] }
 0x127   : > { %1120 = vmatpush1.msra.mxu0 %v1079_v10  ;;  %3855 = vmatprep.subr.mxu1 %v4720_v0  ;;  %v1055_v33 = vld [vmem:[#allocation10 + $0x48] sm:$0xff]  ;;  %v1072_v34 = vld [vmem:[#allocation10 + $0xd0] sm:$0xff]  ;;  %v1053_v35 = vld [vmem:[#allocation10 + $0x38] sm:$0xff] }
 0x128   : > { %1121 = vmatprep.subr.mxu0 %v1077_v11  ;;  %3856 = vmatpush3.msra.mxu1 %v1084_v22  ;;  %v1052_v36 = vld [vmem:[#allocation10 + $0x30] sm:$0xff]  ;;  %v1069_v37 = vld [vmem:[#allocation10 + $0xb8] sm:$0xff]  ;;  %v1050_v38 = vld [vmem:[#allocation10 + $0x20] sm:$0xff] }
 0x129   : > { %1122 = vmatpush1.msra.mxu0 %v1076_v12  ;;  %3857 = vmatprep.subr.mxu1 %v4720_v0  ;;  %v1049_v39 = vld [vmem:[#allocation10 + $0x18] sm:$0xff]  ;;  %v1066_v40 = vld [vmem:[#allocation10 + $0xa0] sm:$0xff]  ;;  %v1047_v41 = vld [vmem:[#allocation10 + $0x8] sm:$0xff] }
 0x12a   : > { %1123 = vmatprep.subr.mxu0 %v1074_v13  ;;  %3858 = vmatpush3.msra.mxu1 %v1081_v25  ;;  %v1046_v42 = vld [vmem:[#allocation10] sm:$0xff]  ;;  %v1063_v43 = vld [vmem:[#allocation10 + $0x88] sm:$0xff]  ;;  %v1060_v45 = vld [vmem:[#allocation10 + $0x70] sm:$0xff] }
 0x12b   : > { %1124 = vmatpush1.msra.mxu0 %v1073_v14  ;;  %3859 = vmatprep.subr.mxu1 %v4720_v0  ;;  %v5192_v44 = vld [vmem:[%s899_s23] sm:$0xff]  ;;  %v1057_v46 = vld [vmem:[#allocation10 + $0x58] sm:$0xff]  ;;  %v1048_v49 = vld [vmem:[#allocation10 + $0x10] sm:$0xff]  ;;  %s3332_s23 = scalar_lea.sflag [#allocation22], %s5145_s5 }
 0x12c   : > { %1125 = vmatprep.subr.mxu0 %v1071_v17  ;;  %3860 = vmatpush3.msra.mxu1 %v1078_v28  ;;  %v1054_v47 = vld [vmem:[#allocation10 + $0x40] sm:$0xff]  ;;  %v1051_v48 = vld [vmem:[#allocation10 + $0x28] sm:$0xff]  ;;  %v1094_v54 = vld [vmem:[%s5772_s19] sm:$0x7]  ;;  %p5784_p9 = scmp.ne.s32.totalorder %s5782_s25, 0 }
 0x12d   : > { %1126 = vmatpush1.msra.mxu0 %v1070_v18  ;;  %3861 = vmatprep.subr.mxu1 %v4720_v0  ;;  %v1103_v55 = vrot.slane %v1094_v54, %v5210_v52  ;;  %v1099_v57 = vrot.slane %v1094_v54, %v5212_v53  ;;  %v1107_v62 = vrot.slane %v1094_v54, %v1106_v61  ;;  %v1030_v3 = vld [vmem:[%s882_s10] sm:$0x1]  ;;  %s5775_s10 = sld [smem:[#allocation46_spill]] }
 0x12e   : > { %1127 = vmatprep.subr.mxu0 %v1068_v20  ;;  %3862 = vmatpush3.msra.mxu1 %v1075_v31  ;;  %vm1031_vm2 = vcmp.eq.s32.totalorder %v1030_v3, 0 }
 0x12f   : > { %1128 = vmatpush1.msra.mxu0 %v1067_v21  ;;  %3863 = vmatprep.subr.mxu1 %v4720_v0  ;;  %v1039_v5 = vsel %vm1031_vm2, 1, %v4723_v4 }
 0x130   : > { %1129 = vmatprep.subr.mxu0 %v1065_v23  ;;  %3864 = vmatpush3.msra.mxu1 %v1072_v34  ;;  %v1043_v7 = vrot.slane %v1039_v5, %v5212_v53 }
 0x131   : > { %1130 = vmatpush1.msra.mxu0 %v1064_v24  ;;  %3865 = vmatprep.subr.mxu1 %v4720_v0 }
 0x132   : > { %1131 = vmatprep.subr.mxu0 %v1062_v26  ;;  %3866 = vmatpush3.msra.mxu1 %v1069_v37  ;;  %vm1044_vm4 = vcmp.eq.s32.totalorder %v1043_v7, 1 }
 0x133   : > { %1132 = vmatpush1.msra.mxu0 %v1061_v27  ;;  %3867 = vmatprep.subr.mxu1 %v4720_v0  ;;  %vm5242_vm5 = vmor %vm1044_vm4, %vm1038_vm3 }
 0x134   : > { %1133 = vmatprep.subr.mxu0 %v1059_v29  ;;  %3868 = vmatpush3.msra.mxu1 %v1066_v40 }
 0x135   : > { %1134 = vmatpush1.msra.mxu0 %v1058_v30  ;;  %3869 = vmatprep.subr.mxu1 %v4720_v0 }
 0x136   : > { %1135 = vmatprep.subr.mxu0 %v1056_v32  ;;  %3870 = vmatpush3.msra.mxu1 %v1063_v43 }
 0x137   : > { %1136 = vmatpush1.msra.mxu0 %v1055_v33  ;;  %3871 = vmatprep.subr.mxu1 %v4720_v0 }
 0x138   : > { %1137 = vmatprep.subr.mxu0 %v1053_v35  ;;  %3872 = vmatpush3.msra.mxu1 %v1060_v45 }
 0x139   : > { %1138 = vmatpush1.msra.mxu0 %v1052_v36  ;;  %3873 = vmatprep.subr.mxu1 %v4720_v0 }
 0x13a   : > { %1139 = vmatprep.subr.mxu0 %v1050_v38  ;;  %3874 = vmatpush3.msra.mxu1 %v1057_v46 }
 0x13b   : > { %1140 = vmatpush1.msra.mxu0 %v1049_v39  ;;  %3875 = vmatprep.subr.mxu1 %v4720_v0 }
 0x13c   : > { %1141 = vmatprep.subr.mxu0 %v1047_v41  ;;  %3876 = vmatpush3.msra.mxu1 %v1054_v47 }
 0x13d   : > { %1142 = vmatpush1.msra.mxu0 %v1046_v42  ;;  %3877 = vmatprep.subr.mxu1 %v4720_v0 }
 0x13e   : > { %1176 = vmatmul.mubr.f32.vlgmr.msra.gmra.mxu0 %v5192_v44  ;;  %3924 = vmatprep.subr.mxu0 %v4720_v0 }
 0x13f   : > { %3878 = vmatpush3.msra.mxu1 %v1051_v48  ;;  %3956 = vmatprep.mubr.msk.f32.mxu0 %vm4721_vm0, %v4720_v0 }
 0x140   : > { %3879 = vmatprep.subr.mxu1 %v4720_v0 }
 0x141   : > { %3880 = vmatpush3.msra.mxu1 %v1048_v49 }
 0x142   : > { %3882 = vmatmul.mubr.f32.vlgmr.msra.gmra.mxu1 %v5192_v44  ;;  %3884 = vmatprep.subr.mxu1 %v4720_v0 }
 0x143   : > { %3886 = vmatprep.mubr.msk.f32.mxu1 %vm4721_vm0, %v4720_v0 }
 0x1fe   : > { %v1177_v56 = vpop.f32.mrf.mxu0 }
 0x1ff   : > { %v5225_v60 = vadd.f32 %v1177_v56, %v1099_v57 }
 0x200   : > { %v1179_v58 = vpop.f32.mrf.mxu0 }
 0x201   : > { %v5219_v59 = vadd.f32 %v1179_v58, %v1103_v55 }
 0x202   : > { %v1248_v63 = vpop.f32.mrf.mxu1 }
 0x203   : > { %1436 = vrot.lane.b32.xlu1 %v5219_v59, %s4722_s2  ;;  %3885 = vmatpush3.xpose.msk.msra.mxu1 %vm1271_vm1, %v5219_v59  ;;  %v5234_v1 = vadd.f32 %v1248_v63, %v1107_v62 }
 0x204   : > { %3889 = vmatprep.subr.mxu1 %v4720_v0  ;;  %v3883_v2 = vpop.f32.mrf.mxu1 }
 0x206   : > { %3887 = vmatmul.mubr.msk.f32.vlgmr.msra.gmra.mxu1 %vm1271_vm1, %v5225_v60 }
 0x207   : > { %1434 = vrot.lane.b32.xlu1 %v5225_v60, %s4722_s2  ;;  %3891 = vmatprep.mubr.msk.f32.mxu1 %vm4721_vm0, %v4720_v0 }
 0x208   : > { %3890 = vmatpush3.msra.mxu1 %v5234_v1 }
 0x209   : > { %3894 = vmatprep.subr.mxu1 %v4720_v0 }
 0x275   : > { %v1437_v20 = vpop.permute.xlu1 %1436 }
 0x279   : > { %v1435_v22 = vpop.permute.xlu1 %1434 }
 0x2c6   : > { %v1344_v9 = vpop.f32.mrf.mxu1 }
 0x2c7   : > { %v1348_v10 = vsel %vm5242_vm5, -1e+09, %v1344_v9 }
 0x2c8   : > { %v3888_v11 = vpop.f32.mrf.mxu1  ;;  %v1350_v12 = vsel %vm1349_vm6, %v1348_v10, -inf }
 0x2c9   : > { %1351 = vmax.xlane.f32.xlu0 %v1350_v12 }
 0x352   : > { %v1352_v13 = vpop.xlane.xlu0 %1351 }
 0x353   : > { %v1353_v14 = vsub.f32 %v1348_v10, %v1352_v13  ;;  %v1267_v13 = vld [vmem:[#allocation11 + $0x78] sm:$0xff] }
 0x354   : > { %3925 = vmatpush3.msra.mxu0 %v1267_v13  ;;  %v2065_v13 = vld [vmem:[#allocation13 + $0x40] sm:$0xff] }
 0x355   : > { %v1354_v15 = vmul.f32 1.442695, %v1353_v14  ;;  %v1266_v14 = vld [vmem:[#allocation11 + $0x70] sm:$0xff]  ;;  %3926 = vmatprep.subr.mxu0 %v4720_v0 }
 0x356   : > { %3927 = vmatpush3.msra.mxu0 %v1266_v14  ;;  %v2161_v14 = vld [vmem:[#allocation14 + $0x58] sm:$0xff] }
 0x357   : > { %4225 = vpow2.f32 %v1354_v15  ;;  %v1265_v15 = vld [vmem:[#allocation11 + $0x68] sm:$0xff]  ;;  %3928 = vmatprep.subr.mxu0 %v4720_v0 }
 0x358   : > { %3929 = vmatpush3.msra.mxu0 %v1265_v15  ;;  %v2160_v15 = vld [vmem:[#allocation14 + $0x50] sm:$0xff] }
 0x359   : > { %3930 = vmatprep.subr.mxu0 %v4720_v0 }
 0x364   : > { %v4226_v16 = vpop.eup %4225 }
 0x365   : > { %v1356_v17 = vsel %vm1349_vm6, %v4226_v16, 0.0 }
 0x366   : > { %1357 = vadd.xlane.f32.xlu0 %v1356_v17  ;;  %v1263_v17 = vld [vmem:[#allocation11 + $0x58] sm:$0xff] }
 0x3ef   : > { %v1358_v18 = vpop.xlane.xlu0 %1357 }
 0x3f0   : > { %4227 = vrcp.f32 %v1358_v18  ;;  %v1262_v18 = vld [vmem:[#allocation11 + $0x50] sm:$0xff] }
 0x3fd   : > { %v4228_v19 = vpop.eup %4227 }
 0x3fe   : > { %v1360_v21 = vmul.f32 %v4228_v19, %v4226_v16  ;;  %v1264_v16 = vld [vmem:[#allocation11 + $0x60] sm:$0xff]  ;;  %v1261_v19 = vld [vmem:[#allocation11 + $0x48] sm:$0xff] }
 0x3ff   : > { %3931 = vmatpush3.msra.mxu0 %v1264_v16  ;;  %v2064_v16 = vld [vmem:[#allocation13 + $0x38] sm:$0xff] }
 0x400   : > { %3892 = vmatmul.mubr.msk.f32.vlgmr.msra.gmra.mxu1 %vm1349_vm6, %v1360_v21  ;;  %2053 = vst.msk [vmem:[%s5254_s9] sm:$0xff] %vm1349_vm6, %v1360_v21  ;;  %3932 = vmatprep.subr.mxu0 %v4720_v0  ;;  %v1259_v21 = vld [vmem:[#allocation11 + $0x38] sm:$0xff] }
 0x401   : > { %3895 = vmatpush3.xpose.msk.msra.mxu1 %vm1271_vm1, %v1437_v20  ;;  %3896 = vmatprep.mubr.msk.f32.mxu1 %vm4721_vm0, %v4720_v0  ;;  %v1260_v20 = vld [vmem:[#allocation11 + $0x40] sm:$0xff] }
 0x402   : > { %3899 = vmatprep.subr.mxu1 %v4720_v0  ;;  %3933 = vmatpush3.msra.mxu0 %v1263_v17  ;;  %v2159_v17 = vld [vmem:[#allocation14 + $0x48] sm:$0xff] }
 0x403   : > { %3934 = vmatprep.subr.mxu0 %v4720_v0 }
 0x404   : > { %3897 = vmatmul.mubr.msk.f32.vlgmr.msra.gmra.mxu1 %vm1271_vm1, %v1435_v22  ;;  %3935 = vmatpush3.msra.mxu0 %v1262_v18  ;;  %v1258_v22 = vld [vmem:[#allocation11 + $0x30] sm:$0xff]  ;;  %v2158_v18 = vld [vmem:[#allocation14 + $0x40] sm:$0xff] }
 0x405   : > { %3901 = vmatprep.mubr.msk.f32.mxu1 %vm4721_vm0, %v4720_v0  ;;  %3936 = vmatprep.subr.mxu0 %v4720_v0 }
 0x406   : > { %3937 = vmatpush3.msra.mxu0 %v1261_v19  ;;  %v2063_v19 = vld [vmem:[#allocation13 + $0x30] sm:$0xff] }
 0x407   : > { %3938 = vmatprep.subr.mxu0 %v4720_v0 }
 0x408   : > { %3939 = vmatpush3.msra.mxu0 %v1260_v20  ;;  %v2157_v20 = vld [vmem:[#allocation14 + $0x38] sm:$0xff] }
 0x409   : > { %3940 = vmatprep.subr.mxu0 %v4720_v0 }
 0x40a   : > { %3941 = vmatpush3.msra.mxu0 %v1259_v21  ;;  %v2156_v21 = vld [vmem:[#allocation14 + $0x30] sm:$0xff] }
 0x40b   : > { %3942 = vmatprep.subr.mxu0 %v4720_v0 }
 0x40c   : > { %3943 = vmatpush3.msra.mxu0 %v1258_v22  ;;  %v2062_v22 = vld [vmem:[#allocation13 + $0x28] sm:$0xff] }
 0x40d   : > { %3944 = vmatprep.subr.mxu0 %v4720_v0 }
 0x4c0   : > { %v5265_v23 = vpop.f32.mrf.mxu1 }
 0x4c2   : > { %v3893_v24 = vpop.f32.mrf.mxu1 }
 0x4c3   : > { %v1257_v24 = vld [vmem:[#allocation11 + $0x28] sm:$0xff] }
 0x4c4   : > { %v1508_v25 = vpop.f32.mrf.mxu1  ;;  %3945 = vmatpush3.msra.mxu0 %v1257_v24  ;;  %v2155_v24 = vld [vmem:[#allocation14 + $0x28] sm:$0xff] }
 0x4c5   : > { %v1512_v26 = vsel %vm5242_vm5, -1e+09, %v1508_v25  ;;  %v1256_v25 = vld [vmem:[#allocation11 + $0x20] sm:$0xff]  ;;  %3946 = vmatprep.subr.mxu0 %v4720_v0 }
 0x4c6   : > { %v3898_v27 = vpop.f32.mrf.mxu1  ;;  %v1513_v28 = vsel %vm1349_vm6, %v1512_v26, -inf  ;;  %3947 = vmatpush3.msra.mxu0 %v1256_v25  ;;  %v2154_v25 = vld [vmem:[#allocation14 + $0x20] sm:$0xff] }
 0x4c7   : > { %1514 = vmax.xlane.f32.xlu0 %v1513_v28  ;;  %3948 = vmatprep.subr.mxu0 %v4720_v0  ;;  %v1254_v27 = vld [vmem:[#allocation11 + $0x10] sm:$0xff]  ;;  %v1253_v28 = vld [vmem:[#allocation11 + $0x8] sm:$0xff] }
 0x4dd   : > { %1525 = vrot.lane.b32.xlu0 %v5234_v1, %s4722_s2 }
 0x4e1   : > { %1603 = vrot.lane.b32.xlu0 %v5219_v59, %s4724_s27 }
 0x4e5   : > { %1601 = vrot.lane.b32.xlu0 %v5225_v60, %s4724_s27 }
 0x550   : > { %v1515_v29 = vpop.xlane.xlu0 %1514 }
 0x551   : > { %v1516_v30 = vsub.f32 %v1512_v26, %v1515_v29  ;;  %v1255_v26 = vld [vmem:[#allocation11 + $0x18] sm:$0xff]  ;;  %v1252_v29 = vld [vmem:[#allocation11] sm:$0xff] }
 0x552   : > { %3949 = vmatpush3.msra.mxu0 %v1255_v26  ;;  %v2061_v26 = vld [vmem:[#allocation13 + $0x20] sm:$0xff] }
 0x553   : > { %v1517_v31 = vmul.f32 1.442695, %v1516_v30  ;;  %3950 = vmatprep.subr.mxu0 %v4720_v0 }
 0x554   : > { %v1526_v32 = vpop.permute.xlu0 %1525  ;;  %3951 = vmatpush3.msra.mxu0 %v1254_v27  ;;  %v2153_v27 = vld [vmem:[#allocation14 + $0x18] sm:$0xff] }
 0x555   : > { %4229 = vpow2.f32 %v1517_v31  ;;  %3900 = vmatpush3.msra.mxu1 %v1526_v32  ;;  %3952 = vmatprep.subr.mxu0 %v4720_v0 }
 0x556   : > { %3904 = vmatprep.subr.mxu1 %v4720_v0  ;;  %3953 = vmatpush3.msra.mxu0 %v1253_v28  ;;  %v2152_v28 = vld [vmem:[#allocation14 + $0x10] sm:$0xff] }
 0x557   : > { %3954 = vmatprep.subr.mxu0 %v4720_v0 }
 0x558   : > { %v1604_v37 = vpop.permute.xlu0 %1603  ;;  %3955 = vmatpush3.msra.mxu0 %v1252_v29  ;;  %v2060_v29 = vld [vmem:[#allocation13 + $0x18] sm:$0xff] }
 0x55c   : > { %v1602_v39 = vpop.permute.xlu0 %1601 }
 0x562   : > { %v4230_v33 = vpop.eup %4229 }
 0x563   : > { %v1519_v34 = vsel %vm1349_vm6, %v4230_v33, 0.0 }
 0x564   : > { %1520 = vadd.xlane.f32.xlu1 %v1519_v34 }
 0x575   : > { %1691 = vrot.lane.b32.xlu1 %v5234_v1, %s4724_s27 }
 0x579   : > { %1769 = vrot.lane.b32.xlu1 %v5219_v59, %s4725_s14 }
 0x5ed   : > { %v1521_v35 = vpop.xlane.xlu1 %1520 }
 0x5ee   : > { %4231 = vrcp.f32 %v1521_v35 }
 0x5f1   : > { %v1692_v40 = vpop.permute.xlu1 %1691 }
 0x5f5   : > { %v1770_v55 = vpop.permute.xlu1 %1769 }
 0x5fb   : > { %v4232_v36 = vpop.eup %4231 }
 0x5fc   : > { %v1523_v38 = vmul.f32 %v4232_v36, %v4230_v33 }
 0x5fe   : > { %3902 = vmatmul.mubr.msk.f32.vlgmr.msra.gmra.mxu1 %vm1349_vm6, %v1523_v38  ;;  %2054 = vst.msk [vmem:[%s5254_s9 + $0x8] sm:$0xff] %vm1349_vm6, %v1523_v38  ;;  %v3680_v38 = vld [vmem:[%s5775_s10] ss:$0 sm:$0xff]  ;;  %s3712_s10 = sshll.u32 %s4887_s29, 9 }
 0x5ff   : > { %3905 = vmatpush3.xpose.msk.msra.mxu1 %vm1271_vm1, %v1604_v37  ;;  %3906 = vmatprep.mubr.msk.f32.mxu1 %vm4721_vm0, %v4720_v0 }
 0x600   : > { %3909 = vmatprep.subr.mxu1 %v4720_v0 }
 0x602   : > { %3907 = vmatmul.mubr.msk.f32.vlgmr.msra.gmra.mxu1 %vm1271_vm1, %v1602_v39 }
 0x603   : > { %3910 = vmatpush3.msra.mxu1 %v1692_v40  ;;  %3911 = vmatprep.mubr.msk.f32.mxu1 %vm4721_vm0, %v4720_v0 }
 0x604   : > { %3914 = vmatprep.subr.mxu1 %v4720_v0 }
 0x6be   : > { %v1597_v41 = vpop.f32.mrf.mxu1 }
 0x6c0   : > { %v3903_v42 = vpop.f32.mrf.mxu1 }
 0x6c2   : > { %v1675_v43 = vpop.f32.mrf.mxu1 }
 0x6c3   : > { %v1679_v45 = vsel %vm5242_vm5, -1e+09, %v1675_v43  ;;  %v2181_v43 = vld [vmem:[#allocation14 + $0xf8] sm:$0xff] }
 0x6c4   : > { %v3908_v46 = vpop.f32.mrf.mxu1  ;;  %v1680_v47 = vsel %vm1349_vm6, %v1679_v45, -inf  ;;  %2194 = vmatprep.subr.mxu0 %v2181_v43 }
 0x6c5   : > { %1681 = vmax.xlane.f32.xlu0 %v1680_v47  ;;  %v2178_v46 = vld [vmem:[#allocation14 + $0xe0] sm:$0xff]  ;;  %v2177_v47 = vld [vmem:[#allocation14 + $0xd8] sm:$0xff] }
 0x74e   : > { %v1682_v48 = vpop.xlane.xlu0 %1681 }
 0x74f   : > { %v1683_v49 = vsub.f32 %v1679_v45, %v1682_v48  ;;  %v2179_v45 = vld [vmem:[#allocation14 + $0xe8] sm:$0xff]  ;;  %v2072_v48 = vld [vmem:[#allocation13 + $0x78] sm:$0xff] }
 0x751   : > { %v1684_v50 = vmul.f32 1.442695, %v1683_v49  ;;  %v2176_v49 = vld [vmem:[#allocation14 + $0xd0] sm:$0xff] }
 0x753   : > { %4233 = vpow2.f32 %v1684_v50  ;;  %v2071_v50 = vld [vmem:[#allocation13 + $0x70] sm:$0xff] }
 0x760   : > { %v4234_v51 = vpop.eup %4233 }
 0x761   : > { %v1686_v54 = vsel %vm1349_vm6, %v4234_v51, 0.0 }
 0x762   : > { %1687 = vadd.xlane.f32.xlu1 %v1686_v54  ;;  %v2070_v54 = vld [vmem:[#allocation13 + $0x68] sm:$0xff] }
 0x773   : > { %1767 = vrot.lane.b32.xlu1 %v5225_v60, %s4725_s14 }
 0x7eb   : > { %v1688_v56 = vpop.xlane.xlu1 %1687 }
 0x7ec   : > { %4235 = vrcp.f32 %v1688_v56  ;;  %v2069_v56 = vld [vmem:[#allocation13 + $0x60] sm:$0xff] }
 0x7ef   : > { %v1768_v59 = vpop.permute.xlu1 %1767 }
 0x7f9   : > { %v4236_v57 = vpop.eup %4235 }
 0x7fa   : > { %v1690_v58 = vmul.f32 %v4236_v57, %v4234_v51  ;;  %v2175_v51 = vld [vmem:[#allocation14 + $0xc8] sm:$0xff]  ;;  %v2172_v57 = vld [vmem:[#allocation14 + $0xb0] sm:$0xff] }
 0x7fc   : > { %3912 = vmatmul.mubr.msk.f32.vlgmr.msra.gmra.mxu1 %vm1349_vm6, %v1690_v58  ;;  %2055 = vst.msk [vmem:[%s5254_s9 + $0x10] sm:$0xff] %vm1349_vm6, %v1690_v58  ;;  %v2171_v58 = vld [vmem:[#allocation14 + $0xa8] sm:$0xff] }
 0x7fd   : > { %3915 = vmatpush3.xpose.msk.msra.mxu1 %vm1271_vm1, %v1770_v55  ;;  %3916 = vmatprep.mubr.msk.f32.mxu1 %vm4721_vm0, %v4720_v0  ;;  %v2173_v55 = vld [vmem:[#allocation14 + $0xb8] sm:$0xff] }
 0x7fe   : > { %3919 = vmatprep.subr.mxu1 %v4720_v0 }
 0x800   : > { %3917 = vmatmul.mubr.msk.f32.vlgmr.msra.gmra.mxu1 %vm1271_vm1, %v1768_v59  ;;  %v2170_v59 = vld [vmem:[#allocation14 + $0xa0] sm:$0xff] }
 0x801   : > { %3921 = vmatprep.mubr.msk.f32.mxu1 %vm4721_vm0, %v4720_v0 }
 0x8bc   : > { %v1763_v60 = vpop.f32.mrf.mxu1 }
 0x8be   : > { %v3913_v61 = vpop.f32.mrf.mxu1 }
 0x8c0   : > { %v1841_v62 = vpop.f32.mrf.mxu1 }
 0x8c1   : > { %v1845_v63 = vsel %vm5242_vm5, -1e+09, %v1841_v62 }
 0x8c2   : > { %v3918_v2 = vpop.f32.mrf.mxu1  ;;  %v1846_v3 = vsel %vm1349_vm6, %v1845_v63, -inf }
 0x8c3   : > { %1847 = vmax.xlane.f32.xlu0 %v1846_v3  ;;  %v2168_v3 = vld [vmem:[#allocation14 + $0x90] sm:$0xff] }
 0x8d9   : > { %1857 = vrot.lane.b32.xlu0 %v5234_v1, %s4725_s14 }
 0x8dd   : > { %1934 = vrot.lane.b32.xlu0 %v1597_v41, %s4725_s14 }
 0x8e1   : > { %1938 = vrot.lane.b32.xlu0 %v1763_v60, %s4724_s27  ;;  %v2169_v60 = vld [vmem:[#allocation14 + $0x98] sm:$0xff] }
 0x94c   : > { %v1848_v5 = vpop.xlane.xlu0 %1847 }
 0x94d   : > { %v1849_v6 = vsub.f32 %v1845_v63, %v1848_v5  ;;  %v2068_v5 = vld [vmem:[#allocation13 + $0x58] sm:$0xff] }
 0x94f   : > { %v1850_v7 = vmul.f32 1.442695, %v1849_v6  ;;  %v2167_v6 = vld [vmem:[#allocation14 + $0x88] sm:$0xff] }
 0x950   : > { %v1858_v9 = vpop.permute.xlu0 %1857 }
 0x951   : > { %4237 = vpow2.f32 %v1850_v7  ;;  %3920 = vmatpush3.msra.mxu1 %v1858_v9  ;;  %v2166_v7 = vld [vmem:[#allocation14 + $0x80] sm:$0xff]  ;;  %v2067_v9 = vld [vmem:[#allocation13 + $0x50] sm:$0xff] }
 0x952   : > { %3959 = vmatprep.subr.mxu1 %v4720_v0 }
 0x954   : > { %v1935_v32 = vpop.permute.xlu0 %1934 }
 0x955   : > { %v1945_v34 = vsel %vm1271_vm1, %v5265_v23, %v1935_v32  ;;  %v2180_v23 = vld [vmem:[#allocation14 + $0xf0] sm:$0xff] }
 0x956   : > { %v2059_v32 = vld [vmem:[#allocation13 + $0x10] sm:$0xff] }
 0x958   : > { %v1939_v33 = vpop.permute.xlu0 %1938 }
 0x959   : > { %v1947_v35 = vsel %vm1946_vm7, %v1945_v34, %v1939_v33  ;;  %v1029_v33 = vld [vmem:[%s908_s7] sm:$0xff]  ;;  %v2058_v34 = vld [vmem:[#allocation13 + $0x8] sm:$0xff]  ;;  %s4726_s7 = smov [#allocation21]  }
 0x95e   : > { %v4238_v8 = vpop.eup %4237 }
 0x95f   : > { %v1852_v10 = vsel %vm1349_vm6, %v4238_v8, 0.0 }
 0x960   : > { %1853 = vadd.xlane.f32.xlu1 %v1852_v10  ;;  %v2164_v10 = vld [vmem:[#allocation14 + $0x70] sm:$0xff] }
 0x9e9   : > { %v1854_v11 = vpop.xlane.xlu1 %1853 }
 0x9ea   : > { %4239 = vrcp.f32 %v1854_v11  ;;  %v2066_v11 = vld [vmem:[#allocation13 + $0x48] sm:$0xff] }
 0x9f7   : > { %v4240_v1 = vpop.eup %4239 }
 0x9f8   : > { %v1856_v12 = vmul.f32 %v4240_v1, %v4238_v8  ;;  %v2165_v8 = vld [vmem:[#allocation14 + $0x78] sm:$0xff]  ;;  %v2163_v1 = vld [vmem:[#allocation14 + $0x68] sm:$0xff] }
 0x9fa   : > { %3922 = vmatmul.mubr.msk.f32.vlgmr.msra.gmra.mxu1 %vm1349_vm6, %v1856_v12  ;;  %2056 = vst.msk [vmem:[%s5254_s9 + $0x18] sm:$0xff] %vm1349_vm6, %v1856_v12  ;;  %v2162_v12 = vld [vmem:[#allocation14 + $0x60] sm:$0xff] }
 0x9fb   : > { %3991 = vmatprep.mubr.msk.f32.mxu1 %vm4721_vm0, %v4720_v0  ;;  %3960 = vmatpush3.msra.mxu1 %v2072_v48 }
 0x9fc   : > { %3961 = vmatprep.subr.mxu1 %v4720_v0 }
 0x9fd   : > { %3962 = vmatpush3.msra.mxu1 %v2071_v50  ;;  %v3683_v50 = vld [vmem:[%s5663_s11] ss:$0 sm:$0xff] }
 0x9fe   : > { %3963 = vmatprep.subr.mxu1 %v4720_v0 }
 0x9ff   : > { %3964 = vmatpush3.msra.mxu1 %v2070_v54 }
 0xa00   : > { %3965 = vmatprep.subr.mxu1 %v4720_v0 }
 0xa01   : > { %3966 = vmatpush3.msra.mxu1 %v2069_v56 }
 0xa02   : > { %3967 = vmatprep.subr.mxu1 %v4720_v0 }
 0xa03   : > { %3968 = vmatpush3.msra.mxu1 %v2068_v5 }
 0xa04   : > { %3969 = vmatprep.subr.mxu1 %v4720_v0 }
 0xa05   : > { %3970 = vmatpush3.msra.mxu1 %v2067_v9 }
 0xa06   : > { %3971 = vmatprep.subr.mxu1 %v4720_v0 }
 0xa07   : > { %3972 = vmatpush3.msra.mxu1 %v2066_v11 }
 0xa08   : > { %3973 = vmatprep.subr.mxu1 %v4720_v0 }
 0xa09   : > { %3974 = vmatpush3.msra.mxu1 %v2065_v13 }
 0xa0a   : > { %3975 = vmatprep.subr.mxu1 %v4720_v0 }
 0xa0b   : > { %3976 = vmatpush3.msra.mxu1 %v2064_v16 }
 0xa0c   : > { %3977 = vmatprep.subr.mxu1 %v4720_v0 }
 0xa0d   : > { %3978 = vmatpush3.msra.mxu1 %v2063_v19 }
 0xa0e   : > { %3979 = vmatprep.subr.mxu1 %v4720_v0 }
 0xa0f   : > { %3980 = vmatpush3.msra.mxu1 %v2062_v22 }
 0xa10   : > { %3981 = vmatprep.subr.mxu1 %v4720_v0 }
 0xa11   : > { %3982 = vmatpush3.msra.mxu1 %v2061_v26 }
 0xa12   : > { %3983 = vmatprep.subr.mxu1 %v4720_v0 }
 0xa13   : > { %3984 = vmatpush3.msra.mxu1 %v2060_v29 }
 0xa14   : > { %3985 = vmatprep.subr.mxu1 %v4720_v0 }
 0xa15   : > { %3986 = vmatpush3.msra.mxu1 %v2059_v32 }
 0xa16   : > { %3987 = vmatprep.subr.mxu1 %v4720_v0 }
 0xa17   : > { %3988 = vmatpush3.msra.mxu1 %v2058_v34 }
 0xa18   : > { %3989 = vmatprep.subr.mxu1 %v4720_v0 }
 0xaba   : > { %v1929_v30 = vpop.f32.mrf.mxu1 }
 0xabb   : > { %1942 = vrot.lane.b32.xlu0 %v1929_v30, %s4722_s2  ;;  %v2151_v30 = vld [vmem:[#allocation14 + $0x8] sm:$0xff] }
 0xabc   : > { %v3923_v31 = vpop.f32.mrf.mxu1 }
 0xabd   : > { %v2150_v31 = vld [vmem:[#allocation14] sm:$0xff] }
 0xb2d   : > { %v1943_v36 = vpop.permute.xlu0 %1942 }
 0xb2e   : > { %v1949_v37 = vsel %vm1948_vm8, %v1947_v35, %v1943_v36  ;;  %v2057_v35 = vld [vmem:[#allocation13] sm:$0xff] }
 0xb2f   : > { %3957 = vmatmul.mubr.f32.vlgmr.msra.gmra.mxu0 %v1949_v37  ;;  %3990 = vmatpush3.msra.mxu1 %v2057_v35 }
 0xb30   : > { %2258 = vmatprep.mubr.f32.mxu0 %v4720_v0  ;;  %2195 = vmatpush1.msra.mxu0 %v2180_v23 }
 0xb31   : > { %2196 = vmatprep.subr.mxu0 %v2179_v45  ;;  %3994 = vmatprep.subr.mxu1 %v4720_v0  ;;  %v2182_v45 = vld [vmem:[%s5665_s13] sm:$0x3] }
 0xb32   : > { %2197 = vmatpush1.msra.mxu0 %v2178_v46  ;;  %v2187_v46 = vrot.slane %v2182_v45, %v5212_v53 }
 0xb33   : > { %2198 = vmatprep.subr.mxu0 %v2177_v47 }
 0xb34   : > { %2199 = vmatpush1.msra.mxu0 %v2176_v49  ;;  %v2191_v49 = vrot.slane %v2182_v45, %v5210_v52 }
 0xb35   : > { %2200 = vmatprep.subr.mxu0 %v2175_v51 }
 0xbef   : > { %v2022_v39 = vpop.f32.mrf.mxu0 }
 0xbf0   : > { %v2023_v40 = vadd.f32 %v3680_v38, %v2022_v39 }
 0xbf1   : > { %v3958_v41 = vpop.f32.mrf.mxu0 }
 0xbf2   : > { %v2026_v42 = vadd.f32 %v2023_v40, %v5192_v44  ;;  %v2174_v44 = vld [vmem:[#allocation14 + $0xc0] sm:$0xff]  ;;  %v3681_v40 = vld [vmem:[%s5776_s24] ss:$0 sm:$0xff]  ;;  %s4557_s24 = scalar_lea.vmem %s5550_s0, 512 }
 0xbf3   : > { %2201 = vmatpush1.msra.mxu0 %v2174_v44  ;;  %p4558_p2 = scmp.ne.s32.totalorder %s5550_s0, %s4557_s24 }
 0xbf4   : > { %2027 = vadd.xlane.f32.xlu1 %v2026_v42  ;;  %2202 = vmatprep.subr.mxu0 %v2173_v55 }
 0xbf5   : > { %2203 = vmatpush1.msra.mxu0 %v2172_v57  ;;  %v1032_v57 = vld [vmem:[%s890_s26] sm:$0x1]  ;;  %s5427_s26 = scalar_lea.vmem [#allocation23], %s3666_s1  ;;  %p4559_p3 = pnand %p4558_p2, %p5784_p9 }
 0xbf6   : > { %2204 = vmatprep.subr.mxu0 %v2171_v58  ;;  %vm1033_vm9 = vcmp.eq.s32.totalorder %v1032_v57, 0 }
 0xbf7   : > { %2205 = vmatpush1.msra.mxu0 %v2170_v59  ;;  %v2360_v58 = vsel %vm1033_vm9, 1, %v4723_v4  ;;  %p4560_p5 = pneg %p4559_p3 }
 0xbf8   : > { %2206 = vmatprep.subr.mxu0 %v2169_v60  ;;  %v2364_v59 = vrot.slane %v2360_v58, %v5212_v53 }
 0xbf9   : > { %2207 = vmatpush1.msra.mxu0 %v2168_v3 }
 0xbfa   : > { %2208 = vmatprep.subr.mxu0 %v2167_v6  ;;  %vm5412_vm10 = vcmp.eq.s32.totalorder %v2364_v59, 1 }
 0xbfb   : > { %2209 = vmatpush1.msra.mxu0 %v2166_v7 }
 0xbfc   : > { %2210 = vmatprep.subr.mxu0 %v2165_v8 }
 0xbfd   : > { %2211 = vmatpush1.msra.mxu0 %v2164_v10 }
 0xbfe   : > { %2212 = vmatprep.subr.mxu0 %v2163_v1 }
 0xbff   : > { %2213 = vmatpush1.msra.mxu0 %v2162_v12 }
 0xc00   : > { %2214 = vmatprep.subr.mxu0 %v2161_v14 }
 0xc01   : > { %2215 = vmatpush1.msra.mxu0 %v2160_v15 }
 0xc02   : > { %2216 = vmatprep.subr.mxu0 %v2159_v17 }
 0xc03   : > { %2217 = vmatpush1.msra.mxu0 %v2158_v18 }
 0xc04   : > { %2218 = vmatprep.subr.mxu0 %v2157_v20 }
 0xc05   : > { %2219 = vmatpush1.msra.mxu0 %v2156_v21 }
 0xc06   : > { %2220 = vmatprep.subr.mxu0 %v2155_v24 }
 0xc07   : > { %2221 = vmatpush1.msra.mxu0 %v2154_v25 }
 0xc08   : > { %2222 = vmatprep.subr.mxu0 %v2153_v27 }
 0xc09   : > { %2223 = vmatpush1.msra.mxu0 %v2152_v28 }
 0xc0a   : > { %2224 = vmatprep.subr.mxu0 %v2151_v30 }
 0xc0b   : > { %2225 = vmatpush1.msra.mxu0 %v2150_v31 }
 0xc0c   : > { %2259 = vmatmul.mubr.f32.vlgmr.msra.gmra.mxu0 %v1029_v33  ;;  %4034 = vmatprep.subr.mxu0 %v4720_v0 }
 0xc0d   : > { %4066 = vmatprep.mubr.msk.f32.mxu0 %vm4721_vm0, %v4720_v0 }
 0xc7d   : > { %v2028_v61 = vpop.xlane.xlu1 %2027 }
 0xc7e   : > { %v2030_v62 = vmul.f32 0.0078125, %v2028_v61 }
 0xc80   : > { %v5352_v63 = vsub.f32 %v2026_v42, %v2030_v62  ;;  %v3682_v42 = vld [vmem:[%s5777_s21] ss:$0 sm:$0xff] }
 0xc82   : > { %v2032_v2 = vmul.f32 %v5352_v63, %v5352_v63 }
 0xc84   : > { %2033 = vadd.xlane.f32.xlu0 %v2032_v2 }
 0xccc   : > { %v2260_v47 = vpop.f32.mrf.mxu0 }
 0xccd   : > { %v5389_v48 = vadd.f32 %v2260_v47, %v2187_v46 }
 0xcce   : > { %v2262_v51 = vpop.f32.mrf.mxu0 }
 0xccf   : > { %v5400_v55 = vadd.f32 %v2262_v51, %v2191_v49 }
 0xd0d   : > { %v2034_v36 = vpop.xlane.xlu0 %2033 }
 0xd0e   : > { %v2035_v37 = vmul.f32 0.0078125, %v2034_v36 }
 0xd10   : > { %v2036_v38 = vadd.f32 1e-05, %v2035_v37 }
 0xd12   : > { %4241 = vrsqrt.f32 %v2036_v38 }
 0xd1f   : > { %v4242_v39 = vpop.eup %4241 }
 0xd20   : > { %v2038_v41 = vmul.f32 %v4242_v39, %v5352_v63 }
 0xd22   : > { %v2045_v43 = vmul.f32 %v3681_v40, %v2038_v41 }
 0xd24   : > { %v5380_v23 = vadd.f32 %v3682_v42, %v2045_v43 }
 0xd26   : > { %3992 = vmatmul.mubr.f32.vlgmr.msra.gmra.mxu1 %v5380_v23 }
 0xd27   : > { %3996 = vmatprep.mubr.msk.f32.mxu1 %vm4721_vm0, %v4720_v0  ;;  %3995 = vmatpush3.xpose.msk.msra.mxu1 %vm1271_vm1, %v5389_v48 }
 0xd28   : > { %3999 = vmatprep.subr.mxu1 %v4720_v0 }
 0xde6   : > { %v2146_v54 = vpop.f32.mrf.mxu1 }
 0xde7   : > { %v5398_v44 = vadd.f32 %v3683_v50, %v2146_v54 }
 0xde8   : > { %v3993_v56 = vpop.f32.mrf.mxu1 }
 0xde9   : > { %3997 = vmatmul.mubr.msk.f32.vlgmr.msra.gmra.mxu1 %vm1271_vm1, %v5398_v44 }
 0xdea   : > { %4000 = vmatpush3.msra.mxu1 %v5400_v55  ;;  %4001 = vmatprep.mubr.msk.f32.mxu1 %vm4721_vm0, %v4720_v0 }
 0xdeb   : > { %4004 = vmatprep.subr.mxu1 %v4720_v0 }
 0xea9   : > { %v2356_v61 = vpop.f32.mrf.mxu1 }
 0xeaa   : > { %v2366_v62 = vsel %vm5412_vm10, -1e+09, %v2356_v61 }
 0xeab   : > { %v3998_v63 = vpop.f32.mrf.mxu1  ;;  %v2367_v2 = vsel %vm1349_vm6, %v2366_v62, -inf }
 0xeac   : > { %2368 = vmax.xlane.f32.xlu1 %v2367_v2 }
 0xebd   : > { %2453 = vrot.lane.b32.xlu1 %v5389_v48, %s4722_s2 }
 0xf35   : > { %v2369_v3 = vpop.xlane.xlu1 %2368 }
 0xf36   : > { %v2370_v4 = vsub.f32 %v2366_v62, %v2369_v3  ;;  %v2279_v3 = vld [vmem:[#allocation16 + $0x70] sm:$0xff] }
 0xf38   : > { %v2371_v5 = vmul.f32 1.442695, %v2370_v4  ;;  %v2278_v4 = vld [vmem:[#allocation16 + $0x68] sm:$0xff] }
 0xf39   : > { %v2454_v9 = vpop.permute.xlu1 %2453 }
 0xf3a   : > { %4243 = vpow2.f32 %v2371_v5  ;;  %v2277_v5 = vld [vmem:[#allocation16 + $0x60] sm:$0xff] }
 0xf47   : > { %v4244_v6 = vpop.eup %4243 }
 0xf48   : > { %v2373_v7 = vsel %vm1349_vm6, %v4244_v6, 0.0 }
 0xf49   : > { %2374 = vadd.xlane.f32.xlu1 %v2373_v7  ;;  %v2275_v7 = vld [vmem:[#allocation16 + $0x50] sm:$0xff] }
 0xf5a   : > { %2451 = vrot.lane.b32.xlu1 %v5398_v44, %s4722_s2 }
 0xfd2   : > { %v2375_v8 = vpop.xlane.xlu1 %2374 }
 0xfd3   : > { %4245 = vrcp.f32 %v2375_v8  ;;  %v2273_v8 = vld [vmem:[#allocation16 + $0x40] sm:$0xff] }
 0xfd6   : > { %v2452_v1 = vpop.permute.xlu1 %2451 }
 0xfe0   : > { %v4246_v10 = vpop.eup %4245 }
 0xfe1   : > { %v2377_v11 = vmul.f32 %v4246_v10, %v4244_v6  ;;  %v2276_v6 = vld [vmem:[#allocation16 + $0x58] sm:$0xff] }
 0xfe2   : > { %v2272_v10 = vld [vmem:[#allocation16 + $0x38] sm:$0xff] }
 0xfe3   : > { %4002 = vmatmul.mubr.msk.f32.vlgmr.msra.gmra.mxu1 %vm1349_vm6, %v2377_v11  ;;  %3067 = vst.msk [vmem:[%s5427_s26] sm:$0xff] %vm1349_vm6, %v2377_v11  ;;  %v2271_v11 = vld [vmem:[#allocation16 + $0x30] sm:$0xff] }
 0xfe4   : > { %4005 = vmatpush3.xpose.msk.msra.mxu1 %vm1271_vm1, %v2454_v9  ;;  %4006 = vmatprep.mubr.msk.f32.mxu1 %vm4721_vm0, %v4720_v0  ;;  %v2274_v9 = vld [vmem:[#allocation16 + $0x48] sm:$0xff] }
 0xfe5   : > { %4009 = vmatprep.subr.mxu1 %v4720_v0 }
 0xfe7   : > { %4007 = vmatmul.mubr.msk.f32.vlgmr.msra.gmra.mxu1 %vm1271_vm1, %v2452_v1  ;;  %v2270_v1 = vld [vmem:[#allocation16 + $0x28] sm:$0xff] }
 0xfe8   : > { %4011 = vmatprep.mubr.msk.f32.mxu1 %vm4721_vm0, %v4720_v0 }
0x10a3   : > { %v5438_v12 = vpop.f32.mrf.mxu1 }
0x10a5   : > { %v4003_v13 = vpop.f32.mrf.mxu1 }
0x10a6   : > { %v2269_v13 = vld [vmem:[#allocation16 + $0x20] sm:$0xff] }
0x10a7   : > { %v2525_v14 = vpop.f32.mrf.mxu1 }
0x10a8   : > { %v2529_v15 = vsel %vm5412_vm10, -1e+09, %v2525_v14  ;;  %v2268_v14 = vld [vmem:[#allocation16 + $0x18] sm:$0xff] }
0x10a9   : > { %v4008_v16 = vpop.f32.mrf.mxu1  ;;  %v2530_v17 = vsel %vm1349_vm6, %v2529_v15, -inf }
0x10aa   : > { %2531 = vmax.xlane.f32.xlu0 %v2530_v17  ;;  %v2266_v16 = vld [vmem:[#allocation16 + $0x8] sm:$0xff]  ;;  %v2265_v17 = vld [vmem:[#allocation16] sm:$0xff] }
0x10c0   : > { %2542 = vrot.lane.b32.xlu0 %v5400_v55, %s4722_s2 }
0x10c4   : > { %2620 = vrot.lane.b32.xlu0 %v5389_v48, %s4724_s27 }
0x10c8   : > { %2618 = vrot.lane.b32.xlu0 %v5398_v44, %s4724_s27 }
0x1133   : > { %v2532_v18 = vpop.xlane.xlu0 %2531 }
0x1134   : > { %v2533_v19 = vsub.f32 %v2529_v15, %v2532_v18  ;;  %v2267_v15 = vld [vmem:[#allocation16 + $0x10] sm:$0xff] }
0x1136   : > { %v2534_v20 = vmul.f32 1.442695, %v2533_v19 }
0x1137   : > { %v2543_v21 = vpop.permute.xlu0 %2542 }
0x1138   : > { %4247 = vpow2.f32 %v2534_v20  ;;  %4010 = vmatpush3.msra.mxu1 %v2543_v21 }
0x1139   : > { %4014 = vmatprep.subr.mxu1 %v4720_v0 }
0x113b   : > { %v2621_v27 = vpop.permute.xlu0 %2620 }
0x113f   : > { %v2619_v29 = vpop.permute.xlu0 %2618 }
0x1145   : > { %v4248_v22 = vpop.eup %4247 }
0x1146   : > { %v2536_v24 = vsel %vm1349_vm6, %v4248_v22, 0.0 }
0x1147   : > { %2537 = vadd.xlane.f32.xlu1 %v2536_v24 }
0x1158   : > { %2708 = vrot.lane.b32.xlu1 %v5400_v55, %s4724_s27 }
0x115c   : > { %2786 = vrot.lane.b32.xlu1 %v5389_v48, %s4725_s14 }
0x11d0   : > { %v2538_v25 = vpop.xlane.xlu1 %2537 }
0x11d1   : > { %4249 = vrcp.f32 %v2538_v25 }
0x11d4   : > { %v2709_v30 = vpop.permute.xlu1 %2708 }
0x11d8   : > { %v2787_v42 = vpop.permute.xlu1 %2786 }
0x11de   : > { %v4250_v26 = vpop.eup %4249 }
0x11df   : > { %v2540_v28 = vmul.f32 %v4250_v26, %v4248_v22 }
0x11e1   : > { %4012 = vmatmul.mubr.msk.f32.vlgmr.msra.gmra.mxu1 %vm1349_vm6, %v2540_v28  ;;  %3068 = vst.msk [vmem:[%s5427_s26 + $0x8] sm:$0xff] %vm1349_vm6, %v2540_v28 }
0x11e2   : > { %4015 = vmatpush3.xpose.msk.msra.mxu1 %vm1271_vm1, %v2621_v27  ;;  %4016 = vmatprep.mubr.msk.f32.mxu1 %vm4721_vm0, %v4720_v0 }
0x11e3   : > { %4019 = vmatprep.subr.mxu1 %v4720_v0 }
0x11e5   : > { %4017 = vmatmul.mubr.msk.f32.vlgmr.msra.gmra.mxu1 %vm1271_vm1, %v2619_v29 }
0x11e6   : > { %4020 = vmatpush3.msra.mxu1 %v2709_v30  ;;  %4021 = vmatprep.mubr.msk.f32.mxu1 %vm4721_vm0, %v4720_v0 }
0x11e7   : > { %4024 = vmatprep.subr.mxu1 %v4720_v0 }
0x12a1   : > { %v2614_v31 = vpop.f32.mrf.mxu1 }
0x12a3   : > { %v4013_v32 = vpop.f32.mrf.mxu1 }
0x12a4   : > { %v3101_v32 = vld [vmem:[#allocation17 + $0xf0] sm:$0xff] }
0x12a5   : > { %v2692_v33 = vpop.f32.mrf.mxu1 }
0x12a6   : > { %v2696_v34 = vsel %vm5412_vm10, -1e+09, %v2692_v33  ;;  %v3100_v33 = vld [vmem:[#allocation17 + $0xe8] sm:$0xff] }
0x12a7   : > { %v4018_v35 = vpop.f32.mrf.mxu1  ;;  %v2697_v36 = vsel %vm1349_vm6, %v2696_v34, -inf }
0x12a8   : > { %2698 = vmax.xlane.f32.xlu0 %v2697_v36  ;;  %v3097_v35 = vld [vmem:[#allocation17 + $0xd0] sm:$0xff]  ;;  %v3096_v36 = vld [vmem:[#allocation17 + $0xc8] sm:$0xff] }
0x1331   : > { %v2699_v37 = vpop.xlane.xlu0 %2698 }
0x1332   : > { %v2700_v38 = vsub.f32 %v2696_v34, %v2699_v37  ;;  %v3098_v34 = vld [vmem:[#allocation17 + $0xd8] sm:$0xff]  ;;  %v3095_v37 = vld [vmem:[#allocation17 + $0xc0] sm:$0xff] }
0x1334   : > { %v2701_v39 = vmul.f32 1.442695, %v2700_v38 }
0x1336   : > { %4251 = vpow2.f32 %v2701_v39 }
0x1343   : > { %v4252_v40 = vpop.eup %4251 }
0x1344   : > { %v2703_v41 = vsel %vm1349_vm6, %v4252_v40, 0.0 }
0x1345   : > { %2704 = vadd.xlane.f32.xlu1 %v2703_v41  ;;  %v3094_v41 = vld [vmem:[#allocation17 + $0xb8] sm:$0xff] }
0x1356   : > { %2784 = vrot.lane.b32.xlu1 %v5398_v44, %s4725_s14 }
0x13ce   : > { %v2705_v43 = vpop.xlane.xlu1 %2704 }
0x13cf   : > { %4253 = vrcp.f32 %v2705_v43  ;;  %v3092_v43 = vld [vmem:[#allocation17 + $0xa8] sm:$0xff] }
0x13d2   : > { %v2785_v47 = vpop.permute.xlu1 %2784 }
0x13dc   : > { %v4254_v45 = vpop.eup %4253 }
0x13dd   : > { %v2707_v46 = vmul.f32 %v4254_v45, %v4252_v40  ;;  %v3091_v45 = vld [vmem:[#allocation17 + $0xa0] sm:$0xff] }
0x13df   : > { %4022 = vmatmul.mubr.msk.f32.vlgmr.msra.gmra.mxu1 %vm1349_vm6, %v2707_v46  ;;  %3069 = vst.msk [vmem:[%s5427_s26 + $0x10] sm:$0xff] %vm1349_vm6, %v2707_v46  ;;  %v3090_v46 = vld [vmem:[#allocation17 + $0x98] sm:$0xff] }
0x13e0   : > { %4025 = vmatpush3.xpose.msk.msra.mxu1 %vm1271_vm1, %v2787_v42  ;;  %4026 = vmatprep.mubr.msk.f32.mxu1 %vm4721_vm0, %v4720_v0  ;;  %v3093_v42 = vld [vmem:[#allocation17 + $0xb0] sm:$0xff] }
0x13e1   : > { %4029 = vmatprep.subr.mxu1 %v4720_v0 }
0x13e3   : > { %4027 = vmatmul.mubr.msk.f32.vlgmr.msra.gmra.mxu1 %vm1271_vm1, %v2785_v47  ;;  %v3089_v47 = vld [vmem:[#allocation17 + $0x90] sm:$0xff] }
0x13e4   : > { %4031 = vmatprep.mubr.msk.f32.mxu1 %vm4721_vm0, %v4720_v0 }
0x149f   : > { %v2780_v48 = vpop.f32.mrf.mxu1 }
0x14a1   : > { %v4023_v49 = vpop.f32.mrf.mxu1 }
0x14a2   : > { %v3087_v49 = vld [vmem:[#allocation17 + $0x80] sm:$0xff] }
0x14a3   : > { %v2858_v50 = vpop.f32.mrf.mxu1 }
0x14a4   : > { %v2862_v51 = vsel %vm5412_vm10, -1e+09, %v2858_v50  ;;  %v3086_v50 = vld [vmem:[#allocation17 + $0x78] sm:$0xff] }
0x14a5   : > { %v4028_v54 = vpop.f32.mrf.mxu1  ;;  %v2863_v44 = vsel %vm1349_vm6, %v2862_v51, -inf }
0x14a6   : > { %2864 = vmax.xlane.f32.xlu0 %v2863_v44  ;;  %v3084_v54 = vld [vmem:[#allocation17 + $0x68] sm:$0xff]  ;;  %v3083_v44 = vld [vmem:[#allocation17 + $0x60] sm:$0xff] }
0x14bc   : > { %2874 = vrot.lane.b32.xlu0 %v5400_v55, %s4725_s14  ;;  %v2280_v55 = vld [vmem:[#allocation16 + $0x78] sm:$0xff] }
0x14bd   : > { %4035 = vmatpush3.msra.mxu0 %v2280_v55  ;;  %v3073_v55 = vld [vmem:[#allocation17 + $0x10] sm:$0xff] }
0x14be   : > { %4036 = vmatprep.subr.mxu0 %v4720_v0 }
0x14bf   : > { %4037 = vmatpush3.msra.mxu0 %v2279_v3  ;;  %v3072_v3 = vld [vmem:[#allocation17 + $0x8] sm:$0xff] }
0x14c0   : > { %2951 = vrot.lane.b32.xlu0 %v2614_v31, %s4725_s14  ;;  %4038 = vmatprep.subr.mxu0 %v4720_v0  ;;  %v3102_v31 = vld [vmem:[#allocation17 + $0xf8] sm:$0xff] }
0x14c1   : > { %4039 = vmatpush3.msra.mxu0 %v2278_v4  ;;  %v3071_v4 = vld [vmem:[#allocation17] sm:$0xff] }
0x14c2   : > { %4040 = vmatprep.subr.mxu0 %v4720_v0 }
0x14c3   : > { %4041 = vmatpush3.msra.mxu0 %v2277_v5  ;;  %v3219_v5 = vld [vmem:[#allocation19 + $0xf8] sm:$0xff] }
0x14c4   : > { %2955 = vrot.lane.b32.xlu0 %v2780_v48, %s4724_s27  ;;  %4042 = vmatprep.subr.mxu0 %v4720_v0  ;;  %v3088_v48 = vld [vmem:[#allocation17 + $0x88] sm:$0xff] }
0x14c5   : > { %4043 = vmatpush3.msra.mxu0 %v2276_v6  ;;  %v3203_v6 = vld [vmem:[#allocation19 + $0x78] sm:$0xff] }
0x14c6   : > { %4044 = vmatprep.subr.mxu0 %v4720_v0 }
0x14c7   : > { %4045 = vmatpush3.msra.mxu0 %v2275_v7  ;;  %v3218_v7 = vld [vmem:[#allocation19 + $0xf0] sm:$0xff] }
0x14c8   : > { %4046 = vmatprep.subr.mxu0 %v4720_v0 }
0x14c9   : > { %4047 = vmatpush3.msra.mxu0 %v2274_v9  ;;  %v3202_v9 = vld [vmem:[#allocation19 + $0x70] sm:$0xff] }
0x14ca   : > { %4048 = vmatprep.subr.mxu0 %v4720_v0 }
0x14cb   : > { %4049 = vmatpush3.msra.mxu0 %v2273_v8  ;;  %v3217_v8 = vld [vmem:[#allocation19 + $0xe8] sm:$0xff] }
0x14cc   : > { %4050 = vmatprep.subr.mxu0 %v4720_v0 }
0x14cd   : > { %4051 = vmatpush3.msra.mxu0 %v2272_v10  ;;  %v3201_v10 = vld [vmem:[#allocation19 + $0x68] sm:$0xff] }
0x14ce   : > { %4052 = vmatprep.subr.mxu0 %v4720_v0 }
0x14cf   : > { %4053 = vmatpush3.msra.mxu0 %v2271_v11  ;;  %v3216_v11 = vld [vmem:[#allocation19 + $0xe0] sm:$0xff] }
0x14d0   : > { %4054 = vmatprep.subr.mxu0 %v4720_v0 }
0x14d1   : > { %4055 = vmatpush3.msra.mxu0 %v2270_v1  ;;  %v3200_v1 = vld [vmem:[#allocation19 + $0x60] sm:$0xff] }
0x14d2   : > { %4056 = vmatprep.subr.mxu0 %v4720_v0 }
0x14d3   : > { %4057 = vmatpush3.msra.mxu0 %v2269_v13  ;;  %v3215_v13 = vld [vmem:[#allocation19 + $0xd8] sm:$0xff] }
0x14d4   : > { %4058 = vmatprep.subr.mxu0 %v4720_v0 }
0x14d5   : > { %4059 = vmatpush3.msra.mxu0 %v2268_v14  ;;  %v3199_v14 = vld [vmem:[#allocation19 + $0x58] sm:$0xff] }
0x14d6   : > { %4060 = vmatprep.subr.mxu0 %v4720_v0 }
0x14d7   : > { %4061 = vmatpush3.msra.mxu0 %v2267_v15  ;;  %v3214_v15 = vld [vmem:[#allocation19 + $0xd0] sm:$0xff] }
0x14d8   : > { %4062 = vmatprep.subr.mxu0 %v4720_v0 }
0x14d9   : > { %4063 = vmatpush3.msra.mxu0 %v2266_v16  ;;  %v3198_v16 = vld [vmem:[#allocation19 + $0x50] sm:$0xff] }
0x14da   : > { %4064 = vmatprep.subr.mxu0 %v4720_v0 }
0x14db   : > { %4065 = vmatpush3.msra.mxu0 %v2265_v17  ;;  %v3213_v17 = vld [vmem:[#allocation19 + $0xc8] sm:$0xff] }
0x14dc   : > { %3814 = vmatprep.subr.mxu0 %v3219_v5 }
0x152f   : > { %v2865_v56 = vpop.xlane.xlu0 %2864 }
0x1530   : > { %v2866_v57 = vsub.f32 %v2862_v51, %v2865_v56  ;;  %v3085_v51 = vld [vmem:[#allocation17 + $0x70] sm:$0xff]  ;;  %v3082_v56 = vld [vmem:[#allocation17 + $0x58] sm:$0xff] }
0x1532   : > { %v2867_v58 = vmul.f32 1.442695, %v2866_v57  ;;  %v3081_v57 = vld [vmem:[#allocation17 + $0x50] sm:$0xff] }
0x1533   : > { %v2875_v59 = vpop.permute.xlu0 %2874 }
0x1534   : > { %4255 = vpow2.f32 %v2867_v58  ;;  %4030 = vmatpush3.msra.mxu1 %v2875_v59  ;;  %v3080_v58 = vld [vmem:[#allocation17 + $0x48] sm:$0xff]  ;;  %v3079_v59 = vld [vmem:[#allocation17 + $0x40] sm:$0xff] }
0x1535   : > { %3115 = vmatprep.subr.mxu1 %v3102_v31 }
0x1537   : > { %v2952_v20 = vpop.permute.xlu0 %2951 }
0x1538   : > { %v2962_v22 = vsel %vm1271_vm1, %v5438_v12, %v2952_v20  ;;  %v3099_v12 = vld [vmem:[#allocation17 + $0xe0] sm:$0xff] }
0x1539   : > { %v3196_v20 = vld [vmem:[#allocation19 + $0x40] sm:$0xff] }
0x153b   : > { %v2956_v21 = vpop.permute.xlu0 %2955 }
0x153c   : > { %v2963_v24 = vsel %vm1946_vm7, %v2962_v22, %v2956_v21  ;;  %v3211_v21 = vld [vmem:[#allocation19 + $0xb8] sm:$0xff] }
0x153d   : > { %v3195_v22 = vld [vmem:[#allocation19 + $0x38] sm:$0xff] }
0x1541   : > { %v4256_v60 = vpop.eup %4255 }
0x1542   : > { %v2869_v61 = vsel %vm1349_vm6, %v4256_v60, 0.0 }
0x1543   : > { %2870 = vadd.xlane.f32.xlu1 %v2869_v61  ;;  %v3077_v61 = vld [vmem:[#allocation17 + $0x30] sm:$0xff] }
0x15cc   : > { %v2871_v62 = vpop.xlane.xlu1 %2870 }
0x15cd   : > { %4257 = vrcp.f32 %v2871_v62  ;;  %v3076_v62 = vld [vmem:[#allocation17 + $0x28] sm:$0xff] }
0x15da   : > { %v4258_v63 = vpop.eup %4257 }
0x15db   : > { %v2873_v2 = vmul.f32 %v4258_v63, %v4256_v60  ;;  %v3078_v60 = vld [vmem:[#allocation17 + $0x38] sm:$0xff]  ;;  %v3075_v63 = vld [vmem:[#allocation17 + $0x20] sm:$0xff] }
0x15dd   : > { %4032 = vmatmul.mubr.msk.f32.vlgmr.msra.gmra.mxu1 %vm1349_vm6, %v2873_v2  ;;  %3070 = vst.msk [vmem:[%s5427_s26 + $0x18] sm:$0xff] %vm1349_vm6, %v2873_v2  ;;  %v3074_v2 = vld [vmem:[#allocation17 + $0x18] sm:$0xff] }
0x15de   : > { %3179 = vmatprep.mubr.f32.mxu1 %v4720_v0  ;;  %v3696_v0 = vld [vmem:[%s5667_s15] ss:$0 sm:$0xff]  ;;  %3116 = vmatpush1.msra.mxu1 %v3101_v32 }
0x15df   : > { %3117 = vmatprep.subr.mxu1 %v3100_v33  ;;  %v3697_v33 = vld [vmem:[%s5668_s16] ss:$0 sm:$0xff] }
0x15e0   : > { %3118 = vmatpush1.msra.mxu1 %v3099_v12 }
0x15e1   : > { %3119 = vmatprep.subr.mxu1 %v3098_v34  ;;  %v3698_v34 = vld [vmem:[%s5669_s17] ss:$0 sm:$0xff] }
0x15e2   : > { %3120 = vmatpush1.msra.mxu1 %v3097_v35 }
0x15e3   : > { %3121 = vmatprep.subr.mxu1 %v3096_v36 }
0x15e4   : > { %3122 = vmatpush1.msra.mxu1 %v3095_v37  ;;  %v3207_v37 = vld [vmem:[#allocation19 + $0x98] sm:$0xff] }
0x15e5   : > { %3123 = vmatprep.subr.mxu1 %v3094_v41  ;;  %v3205_v41 = vld [vmem:[#allocation19 + $0x88] sm:$0xff] }
0x15e6   : > { %3124 = vmatpush1.msra.mxu1 %v3093_v42  ;;  %v3189_v42 = vld [vmem:[#allocation19 + $0x8] sm:$0xff] }
0x15e7   : > { %3125 = vmatprep.subr.mxu1 %v3092_v43  ;;  %v3204_v43 = vld [vmem:[#allocation19 + $0x80] sm:$0xff] }
0x15e8   : > { %3126 = vmatpush1.msra.mxu1 %v3091_v45  ;;  %v3103_v45 = vld [vmem:[%s5780_s22] sm:$0x3]  ;;  %s4561_s22 = sshll.u32 %s4726_s7, 4  ;;  %s4562_s22 = int_to_ptr.vmem [resolvable:$false] %s4561_s22 }
0x15e9   : > { %3127 = vmatprep.subr.mxu1 %v3090_v46  ;;  %v3108_v46 = vrot.slane %v3103_v45, %v5212_v53  ;;  %s4563_s21 = scalar_lea.vmem %s4562_s22, 1024  ;;  %p4564_p6 = scmp.lt.s32.totalorder %s5550_s0, %s4562_s22 }
0x15ea   : > { %3128 = vmatpush1.msra.mxu1 %v3089_v47  ;;  %v3112_v47 = vrot.slane %v3103_v45, %v5210_v52  ;;  %p4565_p12 = scmp.lt.s32.totalorder %s4563_s21, %s4557_s24 }
0x15eb   : > { %3129 = vmatprep.subr.mxu1 %v3088_v48 }
0x15ec   : > { %3130 = vmatpush1.msra.mxu1 %v3087_v49  ;;  %p4566_p11 = por %p4565_p12, %p4564_p6 }
0x15ed   : > { %3131 = vmatprep.subr.mxu1 %v3086_v50 }
0x15ee   : > { %3132 = vmatpush1.msra.mxu1 %v3085_v51  ;;  %p4567_p7 = pnand %p4566_p11, %p4560_p5 }
0x15ef   : > { %3133 = vmatprep.subr.mxu1 %v3084_v54 }
0x15f0   : > { %3134 = vmatpush1.msra.mxu1 %v3083_v44 }
0x15f1   : > { %3135 = vmatprep.subr.mxu1 %v3082_v56 }
0x15f2   : > { %3136 = vmatpush1.msra.mxu1 %v3081_v57  ;;  %v3699_v57 = vld [vmem:[%s5781_s12] ss:$0 sm:$0xff] }
0x15f3   : > { %3137 = vmatprep.subr.mxu1 %v3080_v58 }
0x15f4   : > { %3138 = vmatpush1.msra.mxu1 %v3079_v59 }
0x15f5   : > { %3139 = vmatprep.subr.mxu1 %v3078_v60 }
0x15f6   : > { %3140 = vmatpush1.msra.mxu1 %v3077_v61 }
0x15f7   : > { %3141 = vmatprep.subr.mxu1 %v3076_v62 }
0x15f8   : > { %3142 = vmatpush1.msra.mxu1 %v3075_v63 }
0x15f9   : > { %3143 = vmatprep.subr.mxu1 %v3074_v2 }
0x15fa   : > { %3144 = vmatpush1.msra.mxu1 %v3073_v55 }
0x15fb   : > { %3145 = vmatprep.subr.mxu1 %v3072_v3 }
0x15fc   : > { %3146 = vmatpush1.msra.mxu1 %v3071_v4 }
0x169d   : > { %v2946_v18 = vpop.f32.mrf.mxu1 }
0x169e   : > { %2959 = vrot.lane.b32.xlu0 %v2946_v18, %s4722_s2  ;;  %v3197_v18 = vld [vmem:[#allocation19 + $0x48] sm:$0xff]  ;;  %s5783_s2 = sld [smem:[#allocation58_spill]] }
0x169f   : > { %v4033_v19 = vpop.f32.mrf.mxu1 }
0x16a0   : > { %v3212_v19 = vld [vmem:[#allocation19 + $0xc0] sm:$0xff] }
0x16a4   : > { %s5547_s14 = scalar_lea.hbm %s5783_s2, %s3712_s10 }
0x1710   : > { %v2960_v25 = vpop.permute.xlu0 %2959 }
0x1711   : > { %v2964_v26 = vsel %vm1948_vm8, %v2963_v24, %v2960_v25  ;;  %v3210_v24 = vld [vmem:[#allocation19 + $0xb0] sm:$0xff] }
0x1712   : > { %4067 = vmatmul.mubr.f32.vlgmr.msra.gmra.mxu0 %v2964_v26  ;;  %v3194_v25 = vld [vmem:[#allocation19 + $0x30] sm:$0xff]  ;;  %v3209_v26 = vld [vmem:[#allocation19 + $0xa8] sm:$0xff] }
0x1713   : > { %3815 = vmatpush3.msra.mxu0 %v3203_v6 }
0x1714   : > { %3816 = vmatprep.subr.mxu0 %v3218_v7 }
0x1715   : > { %3817 = vmatpush3.msra.mxu0 %v3202_v9 }
0x1716   : > { %3818 = vmatprep.subr.mxu0 %v3217_v8 }
0x1717   : > { %3819 = vmatpush3.msra.mxu0 %v3201_v10 }
0x1718   : > { %3820 = vmatprep.subr.mxu0 %v3216_v11 }
0x1719   : > { %3821 = vmatpush3.msra.mxu0 %v3200_v1 }
0x171a   : > { %3822 = vmatprep.subr.mxu0 %v3215_v13 }
0x171b   : > { %3823 = vmatpush3.msra.mxu0 %v3199_v14 }
0x171c   : > { %3824 = vmatprep.subr.mxu0 %v3214_v15 }
0x171d   : > { %3825 = vmatpush3.msra.mxu0 %v3198_v16 }
0x171e   : > { %3826 = vmatprep.subr.mxu0 %v3213_v17 }
0x171f   : > { %3827 = vmatpush3.msra.mxu0 %v3197_v18 }
0x1720   : > { %3828 = vmatprep.subr.mxu0 %v3212_v19 }
0x1721   : > { %3829 = vmatpush3.msra.mxu0 %v3196_v20 }
0x1722   : > { %3830 = vmatprep.subr.mxu0 %v3211_v21 }
0x1723   : > { %3831 = vmatpush3.msra.mxu0 %v3195_v22 }
0x1724   : > { %3832 = vmatprep.subr.mxu0 %v3210_v24 }
0x1725   : > { %3833 = vmatpush3.msra.mxu0 %v3194_v25 }
0x1726   : > { %3834 = vmatprep.subr.mxu0 %v3209_v26 }
0x17d2   : > { %v3037_v27 = vpop.f32.mrf.mxu0 }
0x17d3   : > { %v3038_v28 = vadd.f32 %v3696_v0, %v3037_v27  ;;  %v3193_v0 = vld [vmem:[#allocation19 + $0x28] sm:$0xff]  ;;  %v3208_v27 = vld [vmem:[#allocation19 + $0xa0] sm:$0xff] }
0x17d4   : > { %v4068_v29 = vpop.f32.mrf.mxu0  ;;  %3835 = vmatpush3.msra.mxu0 %v3193_v0 }
0x17d5   : > { %v3041_v30 = vadd.f32 %v3038_v28, %v5380_v23  ;;  %v3192_v28 = vld [vmem:[#allocation19 + $0x20] sm:$0xff]  ;;  %3836 = vmatprep.subr.mxu0 %v3208_v27 }
0x17d6   : > { %3837 = vmatpush3.msra.mxu0 %v3192_v28 }
0x17d7   : > { %3042 = vadd.xlane.f32.xlu1 %v3041_v30  ;;  %3838 = vmatprep.subr.mxu0 %v3207_v37 }
0x1860   : > { %v3043_v38 = vpop.xlane.xlu1 %3042 }
0x1861   : > { %v3044_v39 = vmul.f32 0.0078125, %v3043_v38  ;;  %v3191_v38 = vld [vmem:[#allocation19 + $0x18] sm:$0xff] }
0x1862   : > { %3839 = vmatpush3.msra.mxu0 %v3191_v38 }
0x1863   : > { %v5518_v23 = vsub.f32 %v3041_v30, %v3044_v39  ;;  %v3206_v39 = vld [vmem:[#allocation19 + $0x90] sm:$0xff] }
0x1864   : > { %3840 = vmatprep.subr.mxu0 %v3206_v39 }
0x1865   : > { %v3046_v40 = vmul.f32 %v5518_v23, %v5518_v23 }
0x1867   : > { %3047 = vadd.xlane.f32.xlu0 %v3046_v40  ;;  %v3190_v40 = vld [vmem:[#allocation19 + $0x10] sm:$0xff] }
0x1868   : > { %3841 = vmatpush3.msra.mxu0 %v3190_v40 }
0x1869   : > { %3842 = vmatprep.subr.mxu0 %v3205_v41 }
0x186a   : > { %3843 = vmatpush3.msra.mxu0 %v3189_v42 }
0x186b   : > { %3844 = vmatprep.subr.mxu0 %v3204_v43 }
0x18f0   : > { %v3048_v29 = vpop.xlane.xlu0 %3047 }
0x18f1   : > { %v3049_v30 = vmul.f32 0.0078125, %v3048_v29 }
0x18f3   : > { %v3050_v31 = vadd.f32 1e-05, %v3049_v30 }
0x18f5   : > { %4259 = vrsqrt.f32 %v3050_v31 }
0x1902   : > { %v4260_v32 = vpop.eup %4259 }
0x1903   : > { %v3052_v12 = vmul.f32 %v4260_v32, %v5518_v23  ;;  %v3188_v23 = vld [vmem:[#allocation19] sm:$0xff] }
0x1904   : > { %3845 = vmatpush3.msra.mxu0 %v3188_v23 }
0x1905   : > { %v3059_v35 = vmul.f32 %v3697_v33, %v3052_v12 }
0x1907   : > { %v3066_v36 = vadd.f32 %v3698_v34, %v3059_v35 }
0x1909   : > { %3180 = vmatmul.mubr.f32.vlgmr.msra.gmra.mxu1 %v3066_v36 }
0x19c9   : > { %v3181_v48 = vpop.f32.mrf.mxu1 }
0x19ca   : > { %v3182_v49 = vadd.f32 %v3181_v48, %v3108_v46 }
0x19cb   : > { %v3183_v50 = vpop.f32.mrf.mxu1 }
0x19cc   : > { %v3184_v51 = vadd.f32 %v3183_v50, %v3112_v47  ;;  %v3186_v44 = vmax.f32 %v3182_v49, 0.0 }
0x19ce   : > { %v3187_v54 = vmax.f32 %v3184_v51, 0.0 }
0x19d0   : > { %3291 = vmatprep.mubr.f32.mxu0 %v3187_v54 }
0x19d1   : > { %3292 = vmatmul.mubr.f32.vlgmr.msra.gmra.mxu0 %v3186_v44 }
0x1a91   : > { %v3846_v56 = vpop.f32.mrf.mxu0 }
0x1a93   : > { %v3847_v53 = vpop.f32.mrf.mxu0 }
0x1a94   : > { %v3848_v58 = vadd.f32 %v3847_v53, %v3846_v56 }
0x1a96   : > { %v3294_v52 = vadd.f32 %v3848_v58, %v3699_v57 }
0x1a98   : > { %v3297_v59 = vadd.f32 %v3294_v52, %v3066_v36 }
0x1a9a   : > { %3300 = vadd.xlane.f32.xlu1 %v3297_v59 }
0x1b23   : > { %v3301_v60 = vpop.xlane.xlu1 %3300 }
0x1b24   : > { %v3302_v61 = vmul.f32 0.0078125, %v3301_v60 }
0x1b26   : > { %v5537_v62 = vsub.f32 %v3297_v59, %v3302_v61 }
0x1b28   : > { %v3304_v63 = vmul.f32 %v5537_v62, %v5537_v62 }
0x1b2a   : > { %3305 = vadd.xlane.f32.xlu1 %v3304_v63 }
0x1b2b   : > { %4570 = shalt.err (!%p4567_p7)
}
0x1b2c   : > { %s4571_s9 = scalar_lea.hbm %s5547_s14, 512  ;;  %s4575_s1 = scalar_lea.hbm %s5783_s2, 1024 }
0x1b2d   : > { %p4572_p8 = scmp.ne.s32.totalorder %s5547_s14, %s4571_s9  ;;  %p4576_p1 = scmp.lt.s32.totalorder %s5547_s14, %s5783_s2 }
0x1b2e   : > { %p4577_p4 = scmp.lt.s32.totalorder %s4575_s1, %s4571_s9 }
0x1b2f   : > { %p4573_p10 = pnand %p4572_p8, %p5784_p9 }
0x1b30   : > { %p4578_p0 = por %p4577_p4, %p4576_p1 }
0x1b31   : > { %p4574_p13 = pneg %p4573_p10 }
0x1b33   : > { %p4579_p2 = pnand %p4578_p0, %p4574_p13 }
0x1b35   : > { %4582 = shalt.err (!%p4579_p2)
}
0x1b36   : > { %s4727_s24 = smov 128   ;;  %s4728_s22 = smov 8  }
0x1b37   : > { %4106 = dma.vmem_to_hbm [thread:$0]  (%p5784_p9), %s5550_s0, 512, %s5547_s14, %s3332_s23, %s4727_s24, %s4727_s24, %s4728_s22  }
0x1b38   : > { %s5785_s19 = sld [smem:[#allocation59_spill]]  ;;  %s3379_s1 = sshll.u32 %s5427_s26, 4  ;;  %s3380_s1 = int_to_ptr.vmem [resolvable:$true] %s3379_s1 }
0x1b39   : > { %s4583_s27 = scalar_lea.vmem %s3380_s1, 512  ;;  %s4729_s7 = smov [#allocation23]  }
0x1b3a   : > { %p4584_p3 = scmp.ne.s32.totalorder %s3380_s1, %s4583_s27  ;;  %s4587_s2 = sshll.u32 %s4729_s7, 4  ;;  %s4588_s2 = int_to_ptr.vmem [resolvable:$false] %s4587_s2 }
0x1b3b   : > { %s4589_s8 = scalar_lea.vmem %s4588_s2, 1024  ;;  %p4590_p12 = scmp.lt.s32.totalorder %s3380_s1, %s4588_s2 }
0x1b3c   : > { %p4585_p5 = pnand %p4584_p3, %p5784_p9  ;;  %p4591_p11 = scmp.lt.s32.totalorder %s4589_s8, %s4583_s27 }
0x1b3e   : > { %s5583_s12 = scalar_lea.hbm %s5785_s19, %s3712_s10  ;;  %p4586_p6 = pneg %p4585_p5 }
0x1b3f   : > { %p4592_p7 = por %p4591_p11, %p4590_p12 }
0x1b41   : > { %p4593_p8 = pnand %p4592_p7, %p4586_p6 }
0x1b43   : > { %4596 = shalt.err (!%p4593_p8)
}
0x1b44   : > { %s4597_s26 = scalar_lea.hbm %s5583_s12, 512  ;;  %s4601_s0 = scalar_lea.hbm %s5785_s19, 1024 }
0x1b45   : > { %p4598_p10 = scmp.ne.s32.totalorder %s5583_s12, %s4597_s26  ;;  %p4602_p4 = scmp.lt.s32.totalorder %s5583_s12, %s5785_s19 }
0x1b46   : > { %p4603_p0 = scmp.lt.s32.totalorder %s4601_s0, %s4597_s26 }
0x1b47   : > { %p4599_p13 = pnand %p4598_p10, %p5784_p9 }
0x1b48   : > { %p4604_p2 = por %p4603_p0, %p4602_p4 }
0x1b49   : > { %p4600_p1 = pneg %p4599_p13 }
0x1b4b   : > { %p4605_p3 = pnand %p4604_p2, %p4600_p1 }
0x1b4d   : > { %4608 = shalt.err (!%p4605_p3)
}
0x1b4e   : > { %4107 = dma.vmem_to_hbm [thread:$0]  (%p5784_p9), %s3380_s1, 512, %s5583_s12, %s3332_s23, %s4727_s24, %s4727_s24, %s4728_s22  }
0x1b4f   : > { %s5786_s27 = sld [smem:[#allocation55_spill]]  ;;  %s3705_s10 = sshll.u32 %s4887_s29, 7 }
0x1b50   : > { %s5787_s5 = sld [smem:[#allocation56_spill]]  ;;  %s1013_s14 = scalar_lea.vmem [#allocation20], %s5154_s6 }
0x1b51   : > { %s3350_s23 = sshll.u32 %s1013_s14, 4  ;;  %s5788_s12 = sld [smem:[#allocation57_spill]]  ;;  %s3351_s23 = int_to_ptr.vmem [resolvable:$true] %s3350_s23 }
0x1b52   : > { %s3327_s0 = scalar_lea.sflag [#allocation4], %s5136_s4  ;;  %s4609_s21 = scalar_lea.vmem %s3351_s23, 128 }
0x1b53   : > { %p4610_p5 = scmp.ne.s32.totalorder %s3351_s23, %s4609_s21  ;;  %s4730_s9 = smov [#allocation20]  }
0x1b54   : > { %s4613_s8 = sshll.u32 %s4730_s9, 4  ;;  %s4614_s8 = int_to_ptr.vmem [resolvable:$false] %s4613_s8 }
0x1b55   : > { %v3700_v5 = vld [vmem:[%s5786_s27] ss:$0 sm:$0xff]  ;;  %p4611_p6 = pnand %p4610_p5, %p5784_p9  ;;  %s4615_s29 = scalar_lea.vmem %s4614_s8, 256 }
0x1b56   : > { %v3701_v7 = vld [vmem:[%s5787_s5] ss:$0 sm:$0xff]  ;;  %p4616_p11 = scmp.lt.s32.totalorder %s3351_s23, %s4614_s8  ;;  %p4617_p7 = scmp.lt.s32.totalorder %s4615_s29, %s4609_s21 }
0x1b57   : > { %s3348_s1 = scalar_lea.hbm %s5788_s12, %s3705_s10  ;;  %p4612_p12 = pneg %p4611_p6 }
0x1b58   : > { %p4618_p8 = por %p4617_p7, %p4616_p11 }
0x1b5a   : > { %p4619_p10 = pnand %p4618_p8, %p4612_p12 }
0x1bb3   : > { %v3306_v2 = vpop.xlane.xlu1 %3305 }
0x1bb4   : > { %v3307_v55 = vmul.f32 0.0078125, %v3306_v2 }
0x1bb6   : > { %v3308_v3 = vadd.f32 1e-05, %v3307_v55 }
0x1bb8   : > { %4261 = vrsqrt.f32 %v3308_v3 }
0x1bc5   : > { %v4262_v4 = vpop.eup %4261 }
0x1bc6   : > { %v3310_v6 = vmul.f32 %v4262_v4, %v5537_v62 }
0x1bc8   : > { %v3317_v9 = vmul.f32 %v3700_v5, %v3310_v6 }
0x1bca   : > { %v3324_v8 = vadd.f32 %v3701_v7, %v3317_v9 }
0x1bcc   : > { %3325 = vst [vmem:[%s1013_s14] sm:$0xff] %v3324_v8 }
0x1bcd   : > { %4622 = shalt.err (!%p4619_p10)
}
0x1bce   : > { %s4623_s6 = scalar_lea.hbm %s3348_s1, 128  ;;  %s4627_s27 = scalar_lea.hbm %s5788_s12, 256 }
0x1bcf   : > { %p4624_p13 = scmp.ne.s32.totalorder %s3348_s1, %s4623_s6  ;;  %p4628_p0 = scmp.lt.s32.totalorder %s3348_s1, %s5788_s12 }
0x1bd0   : > { %p4629_p2 = scmp.lt.s32.totalorder %s4627_s27, %s4623_s6 }
0x1bd1   : > { %p4625_p1 = pnand %p4624_p13, %p5784_p9 }
0x1bd2   : > { %p4630_p3 = por %p4629_p2, %p4628_p0 }
0x1bd3   : > { %p4626_p4 = pneg %p4625_p1 }
0x1bd5   : > { %p4631_p5 = pnand %p4630_p3, %p4626_p4 }
0x1bd7   : > { %4634 = shalt.err (!%p4631_p5)
}
0x1bd8   : > { %4105 = dma.vmem_to_hbm [thread:$0]  (%p5784_p9), %s3351_s23, 128, %s3348_s1, %s3327_s0  }
0x1bd9 PF: > { %s5789_s5 = sld [smem:[#allocation33_spill]]  ;;  %p5792_p12 = scmp.ge.s32.totalorder %s4701_s28, 2 }
0x1bda   : > { %s5790_s10 = sld [smem:[#allocation38_spill]] }
0x1bdf   : > { %s3394_s14 = sand.u32 1, %s5789_s5  }
0x1be0   : > { %p5791_p6 = scmp.ne.s32.totalorder %s5790_s10, 0  ;;  %s3395_s24 = scalar_lea.sflag [#allocation4], %s3394_s14 }
0x1be2   : > { %p4147_p11 = pnand %p5792_p12, %p5791_p6 }
0x1be4   : > { %p4148_p7 = pneg %p4147_p11 }
0x1be6   : > { %4680 = dma.done.wait (%p4148_p7), %s3395_s24, 128  }
0x1be7   : > { %4682 = vsyncadd (%p4148_p7), %s3395_s24, 4294967168  ;;  %s5793_s22 = sadd.s32 4294967294, %s4701_s28  }
0x1be8   : > { %s3403_s21 = sand.u32 1, %s5793_s22  }
0x1be9   : > { %s3404_s9 = scalar_lea.sflag [#allocation22], %s3403_s21 }
0x1bea   : > { %4684 = dma.done.wait (%p4148_p7), %s3404_s9, 1024  }
0x1beb   : > { %4686 = vsyncadd (%p4148_p7), %s3404_s9, 4294966272  ;;  %s5794_s28 = sld [smem:[#allocation35_spill]]  ;;  %s5797_s27 = smov %s4693_s3 }
0x1bec   : > { %s5795_s25 = sld [smem:[#allocation34_spill]] }
0x1bed   : > { %s5796_s7 = sld [smem:[#allocation36_spill]] }
0x1bf1   : > { %p52_p9 = scmp.ge.s32.totalorder %s5794_s28, 4  }
0x1bf2   : > { %s5798_s3 = smov %s5795_s25 }
0x1bf3   :  { %54 = sbr.rel (!%p52_p9) target bundleno = 36 (0x24), region = 258 }
0x1bf8   :  { %3418 = vsyncpa [#allocation3], 1 }
0x1bf9   :  { %3420 = vsyncpa [#allocation3 + $0x1], 1 }
0x1bfa   :  { %3421 = vsyncpa [#allocation6], 1 }
0x1bfb   :  { %3423 = vsyncpa [#allocation6 + $0x1], 1 }
0x1bfc   :  { %3424 = vsyncpa [#allocation9], 1 }
0x1bfd   :  { %3426 = vsyncpa [#allocation9 + $0x1], 1 }
0x1bfe   :  { %3427 = vsyncpa [#allocation12], 1 }
0x1bff   :  { %3428 = vsyncpa [#allocation15], 1 }
0x1c00   :  { %3429 = vsyncpa [#allocation18], 1 }
0x1c01   :  { %3430 = vsyncpa [#allocation4], 1 }
0x1c02   :  { %3432 = vsyncpa [#allocation4 + $0x1], 1 }
0x1c03   :  { %3433 = vsyncpa [#allocation22], 1 }
0x1c04   :  { %3435 = vsyncpa [#allocation22 + $0x1], 1 }

</bundles_post_ra>
